<compile_context>
chip_gen: v5e
topology: v5e:2x2
jax: 0.10.0
libtpu: 0.0.40
codegen_flags: <defaults>
</compile_context>

<pallas_src>
import jax
import jax.numpy as jnp
from jax.experimental import pallas as pl
from jax.experimental.pallas import tpu as pltpu

# columns used to build xx = x[:, :, _SEL] (input of rnn2); requires input_size >= 15
_SEL = (0, 2, 10, 11, 12, 13, 14)


# ----------------------------------------------------------------------------
# In-kernel math helpers (plain jnp; traced inside the fused Pallas kernel)
# ----------------------------------------------------------------------------

def _sigmoid(x):
    # 1/(1+exp(-x)); exp + divide lower cleanly to the EUP.
    return 1.0 / (1.0 + jnp.exp(-x))


def _elu(x):
    # F.elu (alpha=1).  exp(min(x,0)) - 1: the clamp avoids inf from the unselected
    # branch; expm1 would be marginally more accurate near 0 but exp is the safely
    # lowered primitive on the Mosaic backend.
    return jnp.where(x > 0, x, jnp.exp(jnp.minimum(x, 0.0)) - 1.0)


def _lstm_layer(step_proj, w_hh, B, D):
    """One LSTM layer over time.  step_proj[t] = x_t @ W_ih + (b_ih + b_hh), shape (B, 4D).
    Gate order matches PyTorch: i, f, g, o.  Sequence length is small & static -> unrolled."""
    h = jnp.zeros((B, D), jnp.float32)
    c = jnp.zeros((B, D), jnp.float32)
    outs = []
    for g_x in step_proj:
        gates = g_x + jnp.dot(h, w_hh, preferred_element_type=jnp.float32)  # (B, 4D)
        i = _sigmoid(gates[:, 0 * D:1 * D])
        f = _sigmoid(gates[:, 1 * D:2 * D])
        g = jnp.tanh(gates[:, 2 * D:3 * D])
        o = _sigmoid(gates[:, 3 * D:4 * D])
        c = f * c + i * g
        h = o * jnp.tanh(c)
        outs.append(h)
    return outs, h


def _lstm_stack(x_tm, layers, B, S, D):
    """Stacked unidirectional LSTM; returns the final hidden state of every layer.
    x_tm is the time-major flattened input (S*B, F); layers[l] = (w_ih, w_hh, b)."""
    w_ih0, w_hh0, b0 = layers[0]
    # Collapse (batch, seq) into MXU rows for the layer-0 input projection: one
    # (S*B, F) @ (F, 4D) matmul with a lane-dense 4D = 128 output, hoisted out of
    # the sequential recurrence.
    proj0 = jnp.dot(x_tm, w_ih0, preferred_element_type=jnp.float32) + b0   # (S*B, 4D)
    step_proj = [proj0[t * B:(t + 1) * B, :] for t in range(S)]
    outs, h_last = _lstm_layer(step_proj, w_hh0, B, D)
    h_finals = [h_last]
    for w_ih, w_hh, b in layers[1:]:
        # TODO(synk): PyTorch applies dropout(p=0.2) between LSTM layers in train mode
        # only; eval mode is identity, which is what we implement.
        step_proj = [jnp.dot(o, w_ih, preferred_element_type=jnp.float32) + b for o in outs]
        outs, h_last = _lstm_layer(step_proj, w_hh, B, D)
        h_finals.append(h_last)
    return h_finals


def _head(h_a, h_b, w1, b1, w2, b2, D):
    """fc_out(elu(fc_in(cat(h_a, h_b)))) with the concat realized as split matmuls."""
    hdn = _elu(jnp.dot(h_a, w1[:D, :], preferred_element_type=jnp.float32)
               + jnp.dot(h_b, w1[D:, :], preferred_element_type=jnp.float32) + b1)
    return jnp.dot(hdn, w2, preferred_element_type=jnp.float32) + b2


# ----------------------------------------------------------------------------
# Fused kernel (single pallas_call, no grid, everything resident in VMEM)
# ----------------------------------------------------------------------------

def _make_kernel(B, S, D, n_layers):
    def kernel(*refs):
        o_ref = refs[-1]
        it = iter(refs[:-1])

        x_tm = next(it)[...]                                               # (S*B, F)
        lstm1 = [tuple(next(it)[...] for _ in range(3)) for _ in range(n_layers)]
        lstm2 = [tuple(next(it)[...] for _ in range(3)) for _ in range(n_layers)]
        (fc1_w, fc1_b, fc2_w, fc2_b,
         fc3_w, fc3_b, fc4_w, fc4_b, alpha) = (next(it)[...] for _ in range(9))

        h1 = _lstm_stack(x_tm, lstm1, B, S, D)   # rnn  (full input, selection folded: no)
        h2 = _lstm_stack(x_tm, lstm2, B, S, D)   # rnn2 (xx selection folded into layer-0 W_ih)

        y1 = _head(h1[-2], h1[-1], fc1_w, fc1_b, fc2_w, fc2_b, D)          # (B, 1)
        y2 = _head(h2[-2], h2[-1], fc3_w, fc3_b, fc4_w, fc4_b, D)          # (B, 1)

        mix = _sigmoid(alpha)                                              # (1, 1)
        # single (B,1) masked store -> negligible inside the one fused call
        o_ref[...] = mix * y1 + (1.0 - mix) * y2

    return kernel


def boost_rnn_forward(params, x):
    """x: (batch, seq, input_size) f32 -> (batch, 1) f32.  One fused pallas_call."""
    B, S, F = x.shape
    L = len(params["rnn"])
    D = params["rnn"][0][1].shape[0]            # w_hh: (D, 4D)

    # layout plumbing only: time-major flatten so the layer-0 projection is one matmul
    x_tm = jnp.transpose(x, (1, 0, 2)).reshape(S * B, F)

    args = [x_tm]
    for lstm in (params["rnn"], params["rnn2"]):
        for (w_ih, w_hh, b) in lstm:
            args += [w_ih, w_hh, b]
    args += [params["fc1_w"], params["fc1_b"], params["fc2_w"], params["fc2_b"],
             params["fc3_w"], params["fc3_b"], params["fc4_w"], params["fc4_b"],
             params["alpha"]]

    vmem = pl.BlockSpec(memory_space=pltpu.MemorySpace.VMEM)
    return pl.pallas_call(
        _make_kernel(B, S, D, L),
        out_shape=jax.ShapeDtypeStruct((B, 1), jnp.float32),
        in_specs=[vmem] * len(args),
        out_specs=vmem,
        compiler_params=pltpu.CompilerParams(vmem_limit_bytes=32 * 1024 * 1024),
    )(*args)


# ----------------------------------------------------------------------------
# Parameters (PyTorch layout) and the torch-layout -> kernel-layout prep
# ----------------------------------------------------------------------------

def make_torch_params(key, dim_val, input_size, n_layers):
    """Deterministic synthetic parameters in PyTorch layout (LSTM / Linear conventions)."""
    assert n_layers >= 2, "BoostRNN.forward uses hn[-2]; needs n_layers >= 2"
    keys = iter(jax.random.split(key, 256))

    def W(*shape):
        return jax.random.normal(next(keys), shape, jnp.float32) * 0.05

    def lstm_params(in_size):
        layers = []
        for l in range(n_layers):
            i = in_size if l == 0 else dim_val
            layers.append(dict(w_ih=W(4 * dim_val, i), w_hh=W(4 * dim_val, dim_val),
                               b_ih=W(4 * dim_val), b_hh=W(4 * dim_val)))
        return layers

    H2 = 2 * dim_val
    return dict(
        dim_val=dim_val, n_layers=n_layers, input_size=input_size,
        rnn=lstm_params(input_size),
        rnn2=lstm_params(len(_SEL)),
        fc1_w=W(H2, H2), fc1_b=W(H2),
        fc2_w=W(1, H2), fc2_b=W(1),
        fc3_w=W(H2, H2), fc3_b=W(H2),
        fc4_w=W(1, H2), fc4_b=W(1),
        alpha=W(1),
        # NOTE: fc0 exists in the PyTorch module but is unused in forward(); omitted.
    )


def prepare_params(tp):
    """Torch layout -> kernel layout: transpose weights to (in, out), fuse the two LSTM
    biases, and fold the xx = x[:, :, _SEL] column selection into rnn2's layer-0 W_ih."""
    D, F = tp["dim_val"], tp["input_size"]

    def lstm_layers(layers, fold_sel):
        out = []
        for l, lyr in enumerate(layers):
            w_ih = lyr["w_ih"].T                                          # (in, 4D)
            if fold_sel and l == 0:
                # xx_t @ W == x_t @ (Sel @ W): scatter the 7 selected rows into an (F, 4D) weight.
                w_ih = jnp.zeros((F, 4 * D), jnp.float32).at[jnp.array(_SEL), :].set(w_ih)
            w_hh = lyr["w_hh"].T                                          # (D, 4D)
            b = (lyr["b_ih"] + lyr["b_hh"]).reshape(1, 4 * D)
            out.append((w_ih, w_hh, b))
        return out

    return dict(
        rnn=lstm_layers(tp["rnn"], fold_sel=False),
        rnn2=lstm_layers(tp["rnn2"], fold_sel=True),
        fc1_w=tp["fc1_w"].T, fc1_b=tp["fc1_b"].reshape(1, -1),
        fc2_w=tp["fc2_w"].T, fc2_b=tp["fc2_b"].reshape(1, -1),
        fc3_w=tp["fc3_w"].T, fc3_b=tp["fc3_b"].reshape(1, -1),
        fc4_w=tp["fc4_w"].T, fc4_b=tp["fc4_b"].reshape(1, -1),
        alpha=tp["alpha"].reshape(1, 1),
    )


# ----------------------------------------------------------------------------
# Pure-JAX reference of BoostRNN.forward (eval mode) for verification
# ----------------------------------------------------------------------------

def reference_forward(tp, x):
    hp = jax.lax.Precision.HIGHEST

    def lstm(x_seq, layers):
        B = x_seq.shape[0]
        D = layers[0]["w_hh"].shape[1]
        h_finals, inp = [], x_seq
        for lyr in layers:
            h = jnp.zeros((B, D), jnp.float32)
            c = jnp.zeros((B, D), jnp.float32)
            outs = []
            for t in range(inp.shape[1]):
                gates = (jnp.dot(inp[:, t, :], lyr["w_ih"].T, precision=hp) + lyr["b_ih"]
                         + jnp.dot(h, lyr["w_hh"].T, precision=hp) + lyr["b_hh"])
                i, f, g, o = jnp.split(gates, 4, axis=1)
                c = jax.nn.sigmoid(f) * c + jax.nn.sigmoid(i) * jnp.tanh(g)
                h = jax.nn.sigmoid(o) * jnp.tanh(c)
                outs.append(h)
            inp = jnp.stack(outs, axis=1)
            h_finals.append(h)
        return h_finals

    def linear(v, w, b):
        return jnp.dot(v, w.T, precision=hp) + b

    xx = x[:, :, jnp.array(_SEL)]
    h1 = lstm(x, tp["rnn"])
    h2 = lstm(xx, tp["rnn2"])
    hn1 = jnp.concatenate([h1[-2], h1[-1]], axis=1)
    hn2 = jnp.concatenate([h2[-2], h2[-1]], axis=1)
    y1 = linear(jax.nn.elu(linear(hn1, tp["fc1_w"], tp["fc1_b"])), tp["fc2_w"], tp["fc2_b"])
    y2 = linear(jax.nn.elu(linear(hn2, tp["fc3_w"], tp["fc3_b"])), tp["fc4_w"], tp["fc4_b"])
    mix = jax.nn.sigmoid(tp["alpha"])
    return mix * y1 + (1.0 - mix) * y2


# ----------------------------------------------------------------------------
# Main
# ----------------------------------------------------------------------------

if __name__ == "__main__":
    batch, seq_len, input_size = 2, 8, 16     # input_size >= 15 (rnn2 reads cols 0,2,10..14)
    dim_val, n_layers = 32, 2                 # n_heads is unused by BoostRNN.forward

    key = jax.random.PRNGKey(0)
    kx, kp = jax.random.split(key)
    x = jax.random.normal(kx, (batch, seq_len, input_size), jnp.float32)

    torch_params = make_torch_params(kp, dim_val, input_size, n_layers)
    kparams = prepare_params(torch_params)

    fwd = jax.jit(boost_rnn_forward)
    y = jax.block_until_ready(fwd(kparams, x))
    assert y.shape == (batch, 1) and y.dtype == jnp.float32

    y_ref = reference_forward(torch_params, x)
    assert jnp.allclose(y, y_ref, atol=1e-3, rtol=1e-3), (y, y_ref)

    print("KERNEL_OK")
</pallas_src>

<mosaic_0001>
module attributes {stable_mosaic.version = 11 : i64} {
  func.func @kernel(%arg0: memref<16x16xf32, #tpu.memory_space<vmem>>, %arg1: memref<16x128xf32, #tpu.memory_space<vmem>>, %arg2: memref<32x128xf32, #tpu.memory_space<vmem>>, %arg3: memref<1x128xf32, #tpu.memory_space<vmem>>, %arg4: memref<32x128xf32, #tpu.memory_space<vmem>>, %arg5: memref<32x128xf32, #tpu.memory_space<vmem>>, %arg6: memref<1x128xf32, #tpu.memory_space<vmem>>, %arg7: memref<16x128xf32, #tpu.memory_space<vmem>>, %arg8: memref<32x128xf32, #tpu.memory_space<vmem>>, %arg9: memref<1x128xf32, #tpu.memory_space<vmem>>, %arg10: memref<32x128xf32, #tpu.memory_space<vmem>>, %arg11: memref<32x128xf32, #tpu.memory_space<vmem>>, %arg12: memref<1x128xf32, #tpu.memory_space<vmem>>, %arg13: memref<64x64xf32, #tpu.memory_space<vmem>>, %arg14: memref<1x64xf32, #tpu.memory_space<vmem>>, %arg15: memref<64x1xf32, #tpu.memory_space<vmem>>, %arg16: memref<1x1xf32, #tpu.memory_space<vmem>>, %arg17: memref<64x64xf32, #tpu.memory_space<vmem>>, %arg18: memref<1x64xf32, #tpu.memory_space<vmem>>, %arg19: memref<64x1xf32, #tpu.memory_space<vmem>>, %arg20: memref<1x1xf32, #tpu.memory_space<vmem>>, %arg21: memref<1x1xf32, #tpu.memory_space<vmem>>, %arg22: memref<2x1xf32, #tpu.memory_space<vmem>>) attributes {dimension_semantics = [], scalar_prefetch = 0 : i64, scratch_operands = 0 : i64, tpu.core_type = #tpu.core_type<tc>} {
    %c0 = arith.constant 0 : index
    %c0_0 = arith.constant 0 : index
    %0 = vector.load %arg0[%c0, %c0_0] : memref<16x16xf32, #tpu.memory_space<vmem>>, vector<16x16xf32>
    %c0_1 = arith.constant 0 : index
    %c0_2 = arith.constant 0 : index
    %1 = vector.load %arg1[%c0_1, %c0_2] : memref<16x128xf32, #tpu.memory_space<vmem>>, vector<16x128xf32>
    %c0_3 = arith.constant 0 : index
    %c0_4 = arith.constant 0 : index
    %2 = vector.load %arg2[%c0_3, %c0_4] : memref<32x128xf32, #tpu.memory_space<vmem>>, vector<32x128xf32>
    %c0_5 = arith.constant 0 : index
    %c0_6 = arith.constant 0 : index
    %3 = vector.load %arg3[%c0_5, %c0_6] : memref<1x128xf32, #tpu.memory_space<vmem>>, vector<1x128xf32>
    %c0_7 = arith.constant 0 : index
    %c0_8 = arith.constant 0 : index
    %4 = vector.load %arg4[%c0_7, %c0_8] : memref<32x128xf32, #tpu.memory_space<vmem>>, vector<32x128xf32>
    %c0_9 = arith.constant 0 : index
    %c0_10 = arith.constant 0 : index
    %5 = vector.load %arg5[%c0_9, %c0_10] : memref<32x128xf32, #tpu.memory_space<vmem>>, vector<32x128xf32>
    %c0_11 = arith.constant 0 : index
    %c0_12 = arith.constant 0 : index
    %6 = vector.load %arg6[%c0_11, %c0_12] : memref<1x128xf32, #tpu.memory_space<vmem>>, vector<1x128xf32>
    %c0_13 = arith.constant 0 : index
    %c0_14 = arith.constant 0 : index
    %7 = vector.load %arg7[%c0_13, %c0_14] : memref<16x128xf32, #tpu.memory_space<vmem>>, vector<16x128xf32>
    %c0_15 = arith.constant 0 : index
    %c0_16 = arith.constant 0 : index
    %8 = vector.load %arg8[%c0_15, %c0_16] : memref<32x128xf32, #tpu.memory_space<vmem>>, vector<32x128xf32>
    %c0_17 = arith.constant 0 : index
    %c0_18 = arith.constant 0 : index
    %9 = vector.load %arg9[%c0_17, %c0_18] : memref<1x128xf32, #tpu.memory_space<vmem>>, vector<1x128xf32>
    %c0_19 = arith.constant 0 : index
    %c0_20 = arith.constant 0 : index
    %10 = vector.load %arg10[%c0_19, %c0_20] : memref<32x128xf32, #tpu.memory_space<vmem>>, vector<32x128xf32>
    %c0_21 = arith.constant 0 : index
    %c0_22 = arith.constant 0 : index
    %11 = vector.load %arg11[%c0_21, %c0_22] : memref<32x128xf32, #tpu.memory_space<vmem>>, vector<32x128xf32>
    %c0_23 = arith.constant 0 : index
    %c0_24 = arith.constant 0 : index
    %12 = vector.load %arg12[%c0_23, %c0_24] : memref<1x128xf32, #tpu.memory_space<vmem>>, vector<1x128xf32>
    %c0_25 = arith.constant 0 : index
    %c0_26 = arith.constant 0 : index
    %13 = vector.load %arg13[%c0_25, %c0_26] : memref<64x64xf32, #tpu.memory_space<vmem>>, vector<64x64xf32>
    %c0_27 = arith.constant 0 : index
    %c0_28 = arith.constant 0 : index
    %14 = vector.load %arg14[%c0_27, %c0_28] : memref<1x64xf32, #tpu.memory_space<vmem>>, vector<1x64xf32>
    %c0_29 = arith.constant 0 : index
    %c0_30 = arith.constant 0 : index
    %15 = vector.load %arg15[%c0_29, %c0_30] : memref<64x1xf32, #tpu.memory_space<vmem>>, vector<64x1xf32>
    %c0_31 = arith.constant 0 : index
    %c0_32 = arith.constant 0 : index
    %16 = vector.load %arg16[%c0_31, %c0_32] : memref<1x1xf32, #tpu.memory_space<vmem>>, vector<1x1xf32>
    %c0_33 = arith.constant 0 : index
    %c0_34 = arith.constant 0 : index
    %17 = vector.load %arg17[%c0_33, %c0_34] : memref<64x64xf32, #tpu.memory_space<vmem>>, vector<64x64xf32>
    %c0_35 = arith.constant 0 : index
    %c0_36 = arith.constant 0 : index
    %18 = vector.load %arg18[%c0_35, %c0_36] : memref<1x64xf32, #tpu.memory_space<vmem>>, vector<1x64xf32>
    %c0_37 = arith.constant 0 : index
    %c0_38 = arith.constant 0 : index
    %19 = vector.load %arg19[%c0_37, %c0_38] : memref<64x1xf32, #tpu.memory_space<vmem>>, vector<64x1xf32>
    %c0_39 = arith.constant 0 : index
    %c0_40 = arith.constant 0 : index
    %20 = vector.load %arg20[%c0_39, %c0_40] : memref<1x1xf32, #tpu.memory_space<vmem>>, vector<1x1xf32>
    %c0_41 = arith.constant 0 : index
    %c0_42 = arith.constant 0 : index
    %21 = vector.load %arg21[%c0_41, %c0_42] : memref<1x1xf32, #tpu.memory_space<vmem>>, vector<1x1xf32>
    %cst = arith.constant dense<0.000000e+00> : vector<16x128xf32>
    %22 = tpu.matmul %0, %1, %cst {dimension_numbers = #tpu.dot_dimension_numbers<[1], [0], [0], [1], [0, 0, 1, 1], [], []>} : vector<16x16xf32>, vector<16x128xf32>, vector<16x128xf32> -> vector<16x128xf32>
    %23 = vector.broadcast %3 : vector<1x128xf32> to vector<16x128xf32>
    %24 = arith.addf %22, %23 : vector<16x128xf32>
    %25 = vector.extract_strided_slice %24 {offsets = [0, 0], sizes = [2, 128], strides = [1, 1]} : vector<16x128xf32> to vector<2x128xf32>
    %26 = vector.extract_strided_slice %24 {offsets = [2, 0], sizes = [2, 128], strides = [1, 1]} : vector<16x128xf32> to vector<2x128xf32>
    %27 = vector.extract_strided_slice %24 {offsets = [4, 0], sizes = [2, 128], strides = [1, 1]} : vector<16x128xf32> to vector<2x128xf32>
    %28 = vector.extract_strided_slice %24 {offsets = [6, 0], sizes = [2, 128], strides = [1, 1]} : vector<16x128xf32> to vector<2x128xf32>
    %29 = vector.extract_strided_slice %24 {offsets = [8, 0], sizes = [2, 128], strides = [1, 1]} : vector<16x128xf32> to vector<2x128xf32>
    %30 = vector.extract_strided_slice %24 {offsets = [10, 0], sizes = [2, 128], strides = [1, 1]} : vector<16x128xf32> to vector<2x128xf32>
    %31 = vector.extract_strided_slice %24 {offsets = [12, 0], sizes = [2, 128], strides = [1, 1]} : vector<16x128xf32> to vector<2x128xf32>
    %32 = vector.extract_strided_slice %24 {offsets = [14, 0], sizes = [2, 128], strides = [1, 1]} : vector<16x128xf32> to vector<2x128xf32>
    %cst_43 = arith.constant 0.000000e+00 : f32
    %33 = vector.broadcast %cst_43 : f32 to vector<2x32xf32>
    %cst_44 = arith.constant 0.000000e+00 : f32
    %34 = vector.broadcast %cst_44 : f32 to vector<2x32xf32>
    %cst_45 = arith.constant dense<0.000000e+00> : vector<2x128xf32>
    %35 = tpu.matmul %33, %2, %cst_45 {dimension_numbers = #tpu.dot_dimension_numbers<[1], [0], [0], [1], [0, 0, 1, 1], [], []>} : vector<2x32xf32>, vector<32x128xf32>, vector<2x128xf32> -> vector<2x128xf32>
    %36 = arith.addf %25, %35 : vector<2x128xf32>
    %37 = vector.extract_strided_slice %36 {offsets = [0, 0], sizes = [2, 32], strides = [1, 1]} : vector<2x128xf32> to vector<2x32xf32>
    %cst_46 = arith.constant 0.000000e+00 : f32
    %38 = vector.broadcast %cst_46 : f32 to vector<2x32xf32>
    %39 = arith.subf %38, %37 : vector<2x32xf32>
    %40 = math.exp %39 : vector<2x32xf32>
    %cst_47 = arith.constant 1.000000e+00 : f32
    %41 = vector.broadcast %cst_47 : f32 to vector<2x32xf32>
    %42 = arith.addf %41, %40 : vector<2x32xf32>
    %cst_48 = arith.constant 1.000000e+00 : f32
    %43 = vector.broadcast %cst_48 : f32 to vector<2x32xf32>
    %44 = arith.divf %43, %42 : vector<2x32xf32>
    %45 = vector.extract_strided_slice %36 {offsets = [0, 32], sizes = [2, 32], strides = [1, 1]} : vector<2x128xf32> to vector<2x32xf32>
    %cst_49 = arith.constant 0.000000e+00 : f32
    %46 = vector.broadcast %cst_49 : f32 to vector<2x32xf32>
    %47 = arith.subf %46, %45 : vector<2x32xf32>
    %48 = math.exp %47 : vector<2x32xf32>
    %cst_50 = arith.constant 1.000000e+00 : f32
    %49 = vector.broadcast %cst_50 : f32 to vector<2x32xf32>
    %50 = arith.addf %49, %48 : vector<2x32xf32>
    %cst_51 = arith.constant 1.000000e+00 : f32
    %51 = vector.broadcast %cst_51 : f32 to vector<2x32xf32>
    %52 = arith.divf %51, %50 : vector<2x32xf32>
    %53 = vector.extract_strided_slice %36 {offsets = [0, 64], sizes = [2, 32], strides = [1, 1]} : vector<2x128xf32> to vector<2x32xf32>
    %54 = math.tanh %53 : vector<2x32xf32>
    %55 = vector.extract_strided_slice %36 {offsets = [0, 96], sizes = [2, 32], strides = [1, 1]} : vector<2x128xf32> to vector<2x32xf32>
    %cst_52 = arith.constant 0.000000e+00 : f32
    %56 = vector.broadcast %cst_52 : f32 to vector<2x32xf32>
    %57 = arith.subf %56, %55 : vector<2x32xf32>
    %58 = math.exp %57 : vector<2x32xf32>
    %cst_53 = arith.constant 1.000000e+00 : f32
    %59 = vector.broadcast %cst_53 : f32 to vector<2x32xf32>
    %60 = arith.addf %59, %58 : vector<2x32xf32>
    %cst_54 = arith.constant 1.000000e+00 : f32
    %61 = vector.broadcast %cst_54 : f32 to vector<2x32xf32>
    %62 = arith.divf %61, %60 : vector<2x32xf32>
    %63 = arith.mulf %52, %34 : vector<2x32xf32>
    %64 = arith.mulf %44, %54 : vector<2x32xf32>
    %65 = arith.addf %63, %64 : vector<2x32xf32>
    %66 = math.tanh %65 : vector<2x32xf32>
    %67 = arith.mulf %62, %66 : vector<2x32xf32>
    %cst_55 = arith.constant dense<0.000000e+00> : vector<2x128xf32>
    %68 = tpu.matmul %67, %2, %cst_55 {dimension_numbers = #tpu.dot_dimension_numbers<[1], [0], [0], [1], [0, 0, 1, 1], [], []>} : vector<2x32xf32>, vector<32x128xf32>, vector<2x128xf32> -> vector<2x128xf32>
    %69 = arith.addf %26, %68 : vector<2x128xf32>
    %70 = vector.extract_strided_slice %69 {offsets = [0, 0], sizes = [2, 32], strides = [1, 1]} : vector<2x128xf32> to vector<2x32xf32>
    %cst_56 = arith.constant 0.000000e+00 : f32
    %71 = vector.broadcast %cst_56 : f32 to vector<2x32xf32>
    %72 = arith.subf %71, %70 : vector<2x32xf32>
    %73 = math.exp %72 : vector<2x32xf32>
    %cst_57 = arith.constant 1.000000e+00 : f32
    %74 = vector.broadcast %cst_57 : f32 to vector<2x32xf32>
    %75 = arith.addf %74, %73 : vector<2x32xf32>
    %cst_58 = arith.constant 1.000000e+00 : f32
    %76 = vector.broadcast %cst_58 : f32 to vector<2x32xf32>
    %77 = arith.divf %76, %75 : vector<2x32xf32>
    %78 = vector.extract_strided_slice %69 {offsets = [0, 32], sizes = [2, 32], strides = [1, 1]} : vector<2x128xf32> to vector<2x32xf32>
    %cst_59 = arith.constant 0.000000e+00 : f32
    %79 = vector.broadcast %cst_59 : f32 to vector<2x32xf32>
    %80 = arith.subf %79, %78 : vector<2x32xf32>
    %81 = math.exp %80 : vector<2x32xf32>
    %cst_60 = arith.constant 1.000000e+00 : f32
    %82 = vector.broadcast %cst_60 : f32 to vector<2x32xf32>
    %83 = arith.addf %82, %81 : vector<2x32xf32>
    %cst_61 = arith.constant 1.000000e+00 : f32
    %84 = vector.broadcast %cst_61 : f32 to vector<2x32xf32>
    %85 = arith.divf %84, %83 : vector<2x32xf32>
    %86 = vector.extract_strided_slice %69 {offsets = [0, 64], sizes = [2, 32], strides = [1, 1]} : vector<2x128xf32> to vector<2x32xf32>
    %87 = math.tanh %86 : vector<2x32xf32>
    %88 = vector.extract_strided_slice %69 {offsets = [0, 96], sizes = [2, 32], strides = [1, 1]} : vector<2x128xf32> to vector<2x32xf32>
    %cst_62 = arith.constant 0.000000e+00 : f32
    %89 = vector.broadcast %cst_62 : f32 to vector<2x32xf32>
    %90 = arith.subf %89, %88 : vector<2x32xf32>
    %91 = math.exp %90 : vector<2x32xf32>
    %cst_63 = arith.constant 1.000000e+00 : f32
    %92 = vector.broadcast %cst_63 : f32 to vector<2x32xf32>
    %93 = arith.addf %92, %91 : vector<2x32xf32>
    %cst_64 = arith.constant 1.000000e+00 : f32
    %94 = vector.broadcast %cst_64 : f32 to vector<2x32xf32>
    %95 = arith.divf %94, %93 : vector<2x32xf32>
    %96 = arith.mulf %85, %65 : vector<2x32xf32>
    %97 = arith.mulf %77, %87 : vector<2x32xf32>
    %98 = arith.addf %96, %97 : vector<2x32xf32>
    %99 = math.tanh %98 : vector<2x32xf32>
    %100 = arith.mulf %95, %99 : vector<2x32xf32>
    %cst_65 = arith.constant dense<0.000000e+00> : vector<2x128xf32>
    %101 = tpu.matmul %100, %2, %cst_65 {dimension_numbers = #tpu.dot_dimension_numbers<[1], [0], [0], [1], [0, 0, 1, 1], [], []>} : vector<2x32xf32>, vector<32x128xf32>, vector<2x128xf32> -> vector<2x128xf32>
    %102 = arith.addf %27, %101 : vector<2x128xf32>
    %103 = vector.extract_strided_slice %102 {offsets = [0, 0], sizes = [2, 32], strides = [1, 1]} : vector<2x128xf32> to vector<2x32xf32>
    %cst_66 = arith.constant 0.000000e+00 : f32
    %104 = vector.broadcast %cst_66 : f32 to vector<2x32xf32>
    %105 = arith.subf %104, %103 : vector<2x32xf32>
    %106 = math.exp %105 : vector<2x32xf32>
    %cst_67 = arith.constant 1.000000e+00 : f32
    %107 = vector.broadcast %cst_67 : f32 to vector<2x32xf32>
    %108 = arith.addf %107, %106 : vector<2x32xf32>
    %cst_68 = arith.constant 1.000000e+00 : f32
    %109 = vector.broadcast %cst_68 : f32 to vector<2x32xf32>
    %110 = arith.divf %109, %108 : vector<2x32xf32>
    %111 = vector.extract_strided_slice %102 {offsets = [0, 32], sizes = [2, 32], strides = [1, 1]} : vector<2x128xf32> to vector<2x32xf32>
    %cst_69 = arith.constant 0.000000e+00 : f32
    %112 = vector.broadcast %cst_69 : f32 to vector<2x32xf32>
    %113 = arith.subf %112, %111 : vector<2x32xf32>
    %114 = math.exp %113 : vector<2x32xf32>
    %cst_70 = arith.constant 1.000000e+00 : f32
    %115 = vector.broadcast %cst_70 : f32 to vector<2x32xf32>
    %116 = arith.addf %115, %114 : vector<2x32xf32>
    %cst_71 = arith.constant 1.000000e+00 : f32
    %117 = vector.broadcast %cst_71 : f32 to vector<2x32xf32>
    %118 = arith.divf %117, %116 : vector<2x32xf32>
    %119 = vector.extract_strided_slice %102 {offsets = [0, 64], sizes = [2, 32], strides = [1, 1]} : vector<2x128xf32> to vector<2x32xf32>
    %120 = math.tanh %119 : vector<2x32xf32>
    %121 = vector.extract_strided_slice %102 {offsets = [0, 96], sizes = [2, 32], strides = [1, 1]} : vector<2x128xf32> to vector<2x32xf32>
    %cst_72 = arith.constant 0.000000e+00 : f32
    %122 = vector.broadcast %cst_72 : f32 to vector<2x32xf32>
    %123 = arith.subf %122, %121 : vector<2x32xf32>
    %124 = math.exp %123 : vector<2x32xf32>
    %cst_73 = arith.constant 1.000000e+00 : f32
    %125 = vector.broadcast %cst_73 : f32 to vector<2x32xf32>
    %126 = arith.addf %125, %124 : vector<2x32xf32>
    %cst_74 = arith.constant 1.000000e+00 : f32
    %127 = vector.broadcast %cst_74 : f32 to vector<2x32xf32>
    %128 = arith.divf %127, %126 : vector<2x32xf32>
    %129 = arith.mulf %118, %98 : vector<2x32xf32>
    %130 = arith.mulf %110, %120 : vector<2x32xf32>
    %131 = arith.addf %129, %130 : vector<2x32xf32>
    %132 = math.tanh %131 : vector<2x32xf32>
    %133 = arith.mulf %128, %132 : vector<2x32xf32>
    %cst_75 = arith.constant dense<0.000000e+00> : vector<2x128xf32>
    %134 = tpu.matmul %133, %2, %cst_75 {dimension_numbers = #tpu.dot_dimension_numbers<[1], [0], [0], [1], [0, 0, 1, 1], [], []>} : vector<2x32xf32>, vector<32x128xf32>, vector<2x128xf32> -> vector<2x128xf32>
    %135 = arith.addf %28, %134 : vector<2x128xf32>
    %136 = vector.extract_strided_slice %135 {offsets = [0, 0], sizes = [2, 32], strides = [1, 1]} : vector<2x128xf32> to vector<2x32xf32>
    %cst_76 = arith.constant 0.000000e+00 : f32
    %137 = vector.broadcast %cst_76 : f32 to vector<2x32xf32>
    %138 = arith.subf %137, %136 : vector<2x32xf32>
    %139 = math.exp %138 : vector<2x32xf32>
    %cst_77 = arith.constant 1.000000e+00 : f32
    %140 = vector.broadcast %cst_77 : f32 to vector<2x32xf32>
    %141 = arith.addf %140, %139 : vector<2x32xf32>
    %cst_78 = arith.constant 1.000000e+00 : f32
    %142 = vector.broadcast %cst_78 : f32 to vector<2x32xf32>
    %143 = arith.divf %142, %141 : vector<2x32xf32>
    %144 = vector.extract_strided_slice %135 {offsets = [0, 32], sizes = [2, 32], strides = [1, 1]} : vector<2x128xf32> to vector<2x32xf32>
    %cst_79 = arith.constant 0.000000e+00 : f32
    %145 = vector.broadcast %cst_79 : f32 to vector<2x32xf32>
    %146 = arith.subf %145, %144 : vector<2x32xf32>
    %147 = math.exp %146 : vector<2x32xf32>
    %cst_80 = arith.constant 1.000000e+00 : f32
    %148 = vector.broadcast %cst_80 : f32 to vector<2x32xf32>
    %149 = arith.addf %148, %147 : vector<2x32xf32>
    %cst_81 = arith.constant 1.000000e+00 : f32
    %150 = vector.broadcast %cst_81 : f32 to vector<2x32xf32>
    %151 = arith.divf %150, %149 : vector<2x32xf32>
    %152 = vector.extract_strided_slice %135 {offsets = [0, 64], sizes = [2, 32], strides = [1, 1]} : vector<2x128xf32> to vector<2x32xf32>
    %153 = math.tanh %152 : vector<2x32xf32>
    %154 = vector.extract_strided_slice %135 {offsets = [0, 96], sizes = [2, 32], strides = [1, 1]} : vector<2x128xf32> to vector<2x32xf32>
    %cst_82 = arith.constant 0.000000e+00 : f32
    %155 = vector.broadcast %cst_82 : f32 to vector<2x32xf32>
    %156 = arith.subf %155, %154 : vector<2x32xf32>
    %157 = math.exp %156 : vector<2x32xf32>
    %cst_83 = arith.constant 1.000000e+00 : f32
    %158 = vector.broadcast %cst_83 : f32 to vector<2x32xf32>
    %159 = arith.addf %158, %157 : vector<2x32xf32>
    %cst_84 = arith.constant 1.000000e+00 : f32
    %160 = vector.broadcast %cst_84 : f32 to vector<2x32xf32>
    %161 = arith.divf %160, %159 : vector<2x32xf32>
    %162 = arith.mulf %151, %131 : vector<2x32xf32>
    %163 = arith.mulf %143, %153 : vector<2x32xf32>
    %164 = arith.addf %162, %163 : vector<2x32xf32>
    %165 = math.tanh %164 : vector<2x32xf32>
    %166 = arith.mulf %161, %165 : vector<2x32xf32>
    %cst_85 = arith.constant dense<0.000000e+00> : vector<2x128xf32>
    %167 = tpu.matmul %166, %2, %cst_85 {dimension_numbers = #tpu.dot_dimension_numbers<[1], [0], [0], [1], [0, 0, 1, 1], [], []>} : vector<2x32xf32>, vector<32x128xf32>, vector<2x128xf32> -> vector<2x128xf32>
    %168 = arith.addf %29, %167 : vector<2x128xf32>
    %169 = vector.extract_strided_slice %168 {offsets = [0, 0], sizes = [2, 32], strides = [1, 1]} : vector<2x128xf32> to vector<2x32xf32>
    %cst_86 = arith.constant 0.000000e+00 : f32
    %170 = vector.broadcast %cst_86 : f32 to vector<2x32xf32>
    %171 = arith.subf %170, %169 : vector<2x32xf32>
    %172 = math.exp %171 : vector<2x32xf32>
    %cst_87 = arith.constant 1.000000e+00 : f32
    %173 = vector.broadcast %cst_87 : f32 to vector<2x32xf32>
    %174 = arith.addf %173, %172 : vector<2x32xf32>
    %cst_88 = arith.constant 1.000000e+00 : f32
    %175 = vector.broadcast %cst_88 : f32 to vector<2x32xf32>
    %176 = arith.divf %175, %174 : vector<2x32xf32>
    %177 = vector.extract_strided_slice %168 {offsets = [0, 32], sizes = [2, 32], strides = [1, 1]} : vector<2x128xf32> to vector<2x32xf32>
    %cst_89 = arith.constant 0.000000e+00 : f32
    %178 = vector.broadcast %cst_89 : f32 to vector<2x32xf32>
    %179 = arith.subf %178, %177 : vector<2x32xf32>
    %180 = math.exp %179 : vector<2x32xf32>
    %cst_90 = arith.constant 1.000000e+00 : f32
    %181 = vector.broadcast %cst_90 : f32 to vector<2x32xf32>
    %182 = arith.addf %181, %180 : vector<2x32xf32>
    %cst_91 = arith.constant 1.000000e+00 : f32
    %183 = vector.broadcast %cst_91 : f32 to vector<2x32xf32>
    %184 = arith.divf %183, %182 : vector<2x32xf32>
    %185 = vector.extract_strided_slice %168 {offsets = [0, 64], sizes = [2, 32], strides = [1, 1]} : vector<2x128xf32> to vector<2x32xf32>
    %186 = math.tanh %185 : vector<2x32xf32>
    %187 = vector.extract_strided_slice %168 {offsets = [0, 96], sizes = [2, 32], strides = [1, 1]} : vector<2x128xf32> to vector<2x32xf32>
    %cst_92 = arith.constant 0.000000e+00 : f32
    %188 = vector.broadcast %cst_92 : f32 to vector<2x32xf32>
    %189 = arith.subf %188, %187 : vector<2x32xf32>
    %190 = math.exp %189 : vector<2x32xf32>
    %cst_93 = arith.constant 1.000000e+00 : f32
    %191 = vector.broadcast %cst_93 : f32 to vector<2x32xf32>
    %192 = arith.addf %191, %190 : vector<2x32xf32>
    %cst_94 = arith.constant 1.000000e+00 : f32
    %193 = vector.broadcast %cst_94 : f32 to vector<2x32xf32>
    %194 = arith.divf %193, %192 : vector<2x32xf32>
    %195 = arith.mulf %184, %164 : vector<2x32xf32>
    %196 = arith.mulf %176, %186 : vector<2x32xf32>
    %197 = arith.addf %195, %196 : vector<2x32xf32>
    %198 = math.tanh %197 : vector<2x32xf32>
    %199 = arith.mulf %194, %198 : vector<2x32xf32>
    %cst_95 = arith.constant dense<0.000000e+00> : vector<2x128xf32>
    %200 = tpu.matmul %199, %2, %cst_95 {dimension_numbers = #tpu.dot_dimension_numbers<[1], [0], [0], [1], [0, 0, 1, 1], [], []>} : vector<2x32xf32>, vector<32x128xf32>, vector<2x128xf32> -> vector<2x128xf32>
    %201 = arith.addf %30, %200 : vector<2x128xf32>
    %202 = vector.extract_strided_slice %201 {offsets = [0, 0], sizes = [2, 32], strides = [1, 1]} : vector<2x128xf32> to vector<2x32xf32>
    %cst_96 = arith.constant 0.000000e+00 : f32
    %203 = vector.broadcast %cst_96 : f32 to vector<2x32xf32>
    %204 = arith.subf %203, %202 : vector<2x32xf32>
    %205 = math.exp %204 : vector<2x32xf32>
    %cst_97 = arith.constant 1.000000e+00 : f32
    %206 = vector.broadcast %cst_97 : f32 to vector<2x32xf32>
    %207 = arith.addf %206, %205 : vector<2x32xf32>
    %cst_98 = arith.constant 1.000000e+00 : f32
    %208 = vector.broadcast %cst_98 : f32 to vector<2x32xf32>
    %209 = arith.divf %208, %207 : vector<2x32xf32>
    %210 = vector.extract_strided_slice %201 {offsets = [0, 32], sizes = [2, 32], strides = [1, 1]} : vector<2x128xf32> to vector<2x32xf32>
    %cst_99 = arith.constant 0.000000e+00 : f32
    %211 = vector.broadcast %cst_99 : f32 to vector<2x32xf32>
    %212 = arith.subf %211, %210 : vector<2x32xf32>
    %213 = math.exp %212 : vector<2x32xf32>
    %cst_100 = arith.constant 1.000000e+00 : f32
    %214 = vector.broadcast %cst_100 : f32 to vector<2x32xf32>
    %215 = arith.addf %214, %213 : vector<2x32xf32>
    %cst_101 = arith.constant 1.000000e+00 : f32
    %216 = vector.broadcast %cst_101 : f32 to vector<2x32xf32>
    %217 = arith.divf %216, %215 : vector<2x32xf32>
    %218 = vector.extract_strided_slice %201 {offsets = [0, 64], sizes = [2, 32], strides = [1, 1]} : vector<2x128xf32> to vector<2x32xf32>
    %219 = math.tanh %218 : vector<2x32xf32>
    %220 = vector.extract_strided_slice %201 {offsets = [0, 96], sizes = [2, 32], strides = [1, 1]} : vector<2x128xf32> to vector<2x32xf32>
    %cst_102 = arith.constant 0.000000e+00 : f32
    %221 = vector.broadcast %cst_102 : f32 to vector<2x32xf32>
    %222 = arith.subf %221, %220 : vector<2x32xf32>
    %223 = math.exp %222 : vector<2x32xf32>
    %cst_103 = arith.constant 1.000000e+00 : f32
    %224 = vector.broadcast %cst_103 : f32 to vector<2x32xf32>
    %225 = arith.addf %224, %223 : vector<2x32xf32>
    %cst_104 = arith.constant 1.000000e+00 : f32
    %226 = vector.broadcast %cst_104 : f32 to vector<2x32xf32>
    %227 = arith.divf %226, %225 : vector<2x32xf32>
    %228 = arith.mulf %217, %197 : vector<2x32xf32>
    %229 = arith.mulf %209, %219 : vector<2x32xf32>
    %230 = arith.addf %228, %229 : vector<2x32xf32>
    %231 = math.tanh %230 : vector<2x32xf32>
    %232 = arith.mulf %227, %231 : vector<2x32xf32>
    %cst_105 = arith.constant dense<0.000000e+00> : vector<2x128xf32>
    %233 = tpu.matmul %232, %2, %cst_105 {dimension_numbers = #tpu.dot_dimension_numbers<[1], [0], [0], [1], [0, 0, 1, 1], [], []>} : vector<2x32xf32>, vector<32x128xf32>, vector<2x128xf32> -> vector<2x128xf32>
    %234 = arith.addf %31, %233 : vector<2x128xf32>
    %235 = vector.extract_strided_slice %234 {offsets = [0, 0], sizes = [2, 32], strides = [1, 1]} : vector<2x128xf32> to vector<2x32xf32>
    %cst_106 = arith.constant 0.000000e+00 : f32
    %236 = vector.broadcast %cst_106 : f32 to vector<2x32xf32>
    %237 = arith.subf %236, %235 : vector<2x32xf32>
    %238 = math.exp %237 : vector<2x32xf32>
    %cst_107 = arith.constant 1.000000e+00 : f32
    %239 = vector.broadcast %cst_107 : f32 to vector<2x32xf32>
    %240 = arith.addf %239, %238 : vector<2x32xf32>
    %cst_108 = arith.constant 1.000000e+00 : f32
    %241 = vector.broadcast %cst_108 : f32 to vector<2x32xf32>
    %242 = arith.divf %241, %240 : vector<2x32xf32>
    %243 = vector.extract_strided_slice %234 {offsets = [0, 32], sizes = [2, 32], strides = [1, 1]} : vector<2x128xf32> to vector<2x32xf32>
    %cst_109 = arith.constant 0.000000e+00 : f32
    %244 = vector.broadcast %cst_109 : f32 to vector<2x32xf32>
    %245 = arith.subf %244, %243 : vector<2x32xf32>
    %246 = math.exp %245 : vector<2x32xf32>
    %cst_110 = arith.constant 1.000000e+00 : f32
    %247 = vector.broadcast %cst_110 : f32 to vector<2x32xf32>
    %248 = arith.addf %247, %246 : vector<2x32xf32>
    %cst_111 = arith.constant 1.000000e+00 : f32
    %249 = vector.broadcast %cst_111 : f32 to vector<2x32xf32>
    %250 = arith.divf %249, %248 : vector<2x32xf32>
    %251 = vector.extract_strided_slice %234 {offsets = [0, 64], sizes = [2, 32], strides = [1, 1]} : vector<2x128xf32> to vector<2x32xf32>
    %252 = math.tanh %251 : vector<2x32xf32>
    %253 = vector.extract_strided_slice %234 {offsets = [0, 96], sizes = [2, 32], strides = [1, 1]} : vector<2x128xf32> to vector<2x32xf32>
    %cst_112 = arith.constant 0.000000e+00 : f32
    %254 = vector.broadcast %cst_112 : f32 to vector<2x32xf32>
    %255 = arith.subf %254, %253 : vector<2x32xf32>
    %256 = math.exp %255 : vector<2x32xf32>
    %cst_113 = arith.constant 1.000000e+00 : f32
    %257 = vector.broadcast %cst_113 : f32 to vector<2x32xf32>
    %258 = arith.addf %257, %256 : vector<2x32xf32>
    %cst_114 = arith.constant 1.000000e+00 : f32
    %259 = vector.broadcast %cst_114 : f32 to vector<2x32xf32>
    %260 = arith.divf %259, %258 : vector<2x32xf32>
    %261 = arith.mulf %250, %230 : vector<2x32xf32>
    %262 = arith.mulf %242, %252 : vector<2x32xf32>
    %263 = arith.addf %261, %262 : vector<2x32xf32>
    %264 = math.tanh %263 : vector<2x32xf32>
    %265 = arith.mulf %260, %264 : vector<2x32xf32>
    %cst_115 = arith.constant dense<0.000000e+00> : vector<2x128xf32>
    %266 = tpu.matmul %265, %2, %cst_115 {dimension_numbers = #tpu.dot_dimension_numbers<[1], [0], [0], [1], [0, 0, 1, 1], [], []>} : vector<2x32xf32>, vector<32x128xf32>, vector<2x128xf32> -> vector<2x128xf32>
    %267 = arith.addf %32, %266 : vector<2x128xf32>
    %268 = vector.extract_strided_slice %267 {offsets = [0, 0], sizes = [2, 32], strides = [1, 1]} : vector<2x128xf32> to vector<2x32xf32>
    %cst_116 = arith.constant 0.000000e+00 : f32
    %269 = vector.broadcast %cst_116 : f32 to vector<2x32xf32>
    %270 = arith.subf %269, %268 : vector<2x32xf32>
    %271 = math.exp %270 : vector<2x32xf32>
    %cst_117 = arith.constant 1.000000e+00 : f32
    %272 = vector.broadcast %cst_117 : f32 to vector<2x32xf32>
    %273 = arith.addf %272, %271 : vector<2x32xf32>
    %cst_118 = arith.constant 1.000000e+00 : f32
    %274 = vector.broadcast %cst_118 : f32 to vector<2x32xf32>
    %275 = arith.divf %274, %273 : vector<2x32xf32>
    %276 = vector.extract_strided_slice %267 {offsets = [0, 32], sizes = [2, 32], strides = [1, 1]} : vector<2x128xf32> to vector<2x32xf32>
    %cst_119 = arith.constant 0.000000e+00 : f32
    %277 = vector.broadcast %cst_119 : f32 to vector<2x32xf32>
    %278 = arith.subf %277, %276 : vector<2x32xf32>
    %279 = math.exp %278 : vector<2x32xf32>
    %cst_120 = arith.constant 1.000000e+00 : f32
    %280 = vector.broadcast %cst_120 : f32 to vector<2x32xf32>
    %281 = arith.addf %280, %279 : vector<2x32xf32>
    %cst_121 = arith.constant 1.000000e+00 : f32
    %282 = vector.broadcast %cst_121 : f32 to vector<2x32xf32>
    %283 = arith.divf %282, %281 : vector<2x32xf32>
    %284 = vector.extract_strided_slice %267 {offsets = [0, 64], sizes = [2, 32], strides = [1, 1]} : vector<2x128xf32> to vector<2x32xf32>
    %285 = math.tanh %284 : vector<2x32xf32>
    %286 = vector.extract_strided_slice %267 {offsets = [0, 96], sizes = [2, 32], strides = [1, 1]} : vector<2x128xf32> to vector<2x32xf32>
    %cst_122 = arith.constant 0.000000e+00 : f32
    %287 = vector.broadcast %cst_122 : f32 to vector<2x32xf32>
    %288 = arith.subf %287, %286 : vector<2x32xf32>
    %289 = math.exp %288 : vector<2x32xf32>
    %cst_123 = arith.constant 1.000000e+00 : f32
    %290 = vector.broadcast %cst_123 : f32 to vector<2x32xf32>
    %291 = arith.addf %290, %289 : vector<2x32xf32>
    %cst_124 = arith.constant 1.000000e+00 : f32
    %292 = vector.broadcast %cst_124 : f32 to vector<2x32xf32>
    %293 = arith.divf %292, %291 : vector<2x32xf32>
    %294 = arith.mulf %283, %263 : vector<2x32xf32>
    %295 = arith.mulf %275, %285 : vector<2x32xf32>
    %296 = arith.addf %294, %295 : vector<2x32xf32>
    %297 = math.tanh %296 : vector<2x32xf32>
    %298 = arith.mulf %293, %297 : vector<2x32xf32>
    %cst_125 = arith.constant dense<0.000000e+00> : vector<2x128xf32>
    %299 = tpu.matmul %67, %4, %cst_125 {dimension_numbers = #tpu.dot_dimension_numbers<[1], [0], [0], [1], [0, 0, 1, 1], [], []>} : vector<2x32xf32>, vector<32x128xf32>, vector<2x128xf32> -> vector<2x128xf32>
    %300 = vector.broadcast %6 : vector<1x128xf32> to vector<2x128xf32>
    %301 = arith.addf %299, %300 : vector<2x128xf32>
    %cst_126 = arith.constant dense<0.000000e+00> : vector<2x128xf32>
    %302 = tpu.matmul %100, %4, %cst_126 {dimension_numbers = #tpu.dot_dimension_numbers<[1], [0], [0], [1], [0, 0, 1, 1], [], []>} : vector<2x32xf32>, vector<32x128xf32>, vector<2x128xf32> -> vector<2x128xf32>
    %303 = vector.broadcast %6 : vector<1x128xf32> to vector<2x128xf32>
    %304 = arith.addf %302, %303 : vector<2x128xf32>
    %cst_127 = arith.constant dense<0.000000e+00> : vector<2x128xf32>
    %305 = tpu.matmul %133, %4, %cst_127 {dimension_numbers = #tpu.dot_dimension_numbers<[1], [0], [0], [1], [0, 0, 1, 1], [], []>} : vector<2x32xf32>, vector<32x128xf32>, vector<2x128xf32> -> vector<2x128xf32>
    %306 = vector.broadcast %6 : vector<1x128xf32> to vector<2x128xf32>
    %307 = arith.addf %305, %306 : vector<2x128xf32>
    %cst_128 = arith.constant dense<0.000000e+00> : vector<2x128xf32>
    %308 = tpu.matmul %166, %4, %cst_128 {dimension_numbers = #tpu.dot_dimension_numbers<[1], [0], [0], [1], [0, 0, 1, 1], [], []>} : vector<2x32xf32>, vector<32x128xf32>, vector<2x128xf32> -> vector<2x128xf32>
    %309 = vector.broadcast %6 : vector<1x128xf32> to vector<2x128xf32>
    %310 = arith.addf %308, %309 : vector<2x128xf32>
    %cst_129 = arith.constant dense<0.000000e+00> : vector<2x128xf32>
    %311 = tpu.matmul %199, %4, %cst_129 {dimension_numbers = #tpu.dot_dimension_numbers<[1], [0], [0], [1], [0, 0, 1, 1], [], []>} : vector<2x32xf32>, vector<32x128xf32>, vector<2x128xf32> -> vector<2x128xf32>
    %312 = vector.broadcast %6 : vector<1x128xf32> to vector<2x128xf32>
    %313 = arith.addf %311, %312 : vector<2x128xf32>
    %cst_130 = arith.constant dense<0.000000e+00> : vector<2x128xf32>
    %314 = tpu.matmul %232, %4, %cst_130 {dimension_numbers = #tpu.dot_dimension_numbers<[1], [0], [0], [1], [0, 0, 1, 1], [], []>} : vector<2x32xf32>, vector<32x128xf32>, vector<2x128xf32> -> vector<2x128xf32>
    %315 = vector.broadcast %6 : vector<1x128xf32> to vector<2x128xf32>
    %316 = arith.addf %314, %315 : vector<2x128xf32>
    %cst_131 = arith.constant dense<0.000000e+00> : vector<2x128xf32>
    %317 = tpu.matmul %265, %4, %cst_131 {dimension_numbers = #tpu.dot_dimension_numbers<[1], [0], [0], [1], [0, 0, 1, 1], [], []>} : vector<2x32xf32>, vector<32x128xf32>, vector<2x128xf32> -> vector<2x128xf32>
    %318 = vector.broadcast %6 : vector<1x128xf32> to vector<2x128xf32>
    %319 = arith.addf %317, %318 : vector<2x128xf32>
    %cst_132 = arith.constant dense<0.000000e+00> : vector<2x128xf32>
    %320 = tpu.matmul %298, %4, %cst_132 {dimension_numbers = #tpu.dot_dimension_numbers<[1], [0], [0], [1], [0, 0, 1, 1], [], []>} : vector<2x32xf32>, vector<32x128xf32>, vector<2x128xf32> -> vector<2x128xf32>
    %321 = vector.broadcast %6 : vector<1x128xf32> to vector<2x128xf32>
    %322 = arith.addf %320, %321 : vector<2x128xf32>
    %cst_133 = arith.constant 0.000000e+00 : f32
    %323 = vector.broadcast %cst_133 : f32 to vector<2x32xf32>
    %cst_134 = arith.constant 0.000000e+00 : f32
    %324 = vector.broadcast %cst_134 : f32 to vector<2x32xf32>
    %cst_135 = arith.constant dense<0.000000e+00> : vector<2x128xf32>
    %325 = tpu.matmul %323, %5, %cst_135 {dimension_numbers = #tpu.dot_dimension_numbers<[1], [0], [0], [1], [0, 0, 1, 1], [], []>} : vector<2x32xf32>, vector<32x128xf32>, vector<2x128xf32> -> vector<2x128xf32>
    %326 = arith.addf %301, %325 : vector<2x128xf32>
    %327 = vector.extract_strided_slice %326 {offsets = [0, 0], sizes = [2, 32], strides = [1, 1]} : vector<2x128xf32> to vector<2x32xf32>
    %cst_136 = arith.constant 0.000000e+00 : f32
    %328 = vector.broadcast %cst_136 : f32 to vector<2x32xf32>
    %329 = arith.subf %328, %327 : vector<2x32xf32>
    %330 = math.exp %329 : vector<2x32xf32>
    %cst_137 = arith.constant 1.000000e+00 : f32
    %331 = vector.broadcast %cst_137 : f32 to vector<2x32xf32>
    %332 = arith.addf %331, %330 : vector<2x32xf32>
    %cst_138 = arith.constant 1.000000e+00 : f32
    %333 = vector.broadcast %cst_138 : f32 to vector<2x32xf32>
    %334 = arith.divf %333, %332 : vector<2x32xf32>
    %335 = vector.extract_strided_slice %326 {offsets = [0, 32], sizes = [2, 32], strides = [1, 1]} : vector<2x128xf32> to vector<2x32xf32>
    %cst_139 = arith.constant 0.000000e+00 : f32
    %336 = vector.broadcast %cst_139 : f32 to vector<2x32xf32>
    %337 = arith.subf %336, %335 : vector<2x32xf32>
    %338 = math.exp %337 : vector<2x32xf32>
    %cst_140 = arith.constant 1.000000e+00 : f32
    %339 = vector.broadcast %cst_140 : f32 to vector<2x32xf32>
    %340 = arith.addf %339, %338 : vector<2x32xf32>
    %cst_141 = arith.constant 1.000000e+00 : f32
    %341 = vector.broadcast %cst_141 : f32 to vector<2x32xf32>
    %342 = arith.divf %341, %340 : vector<2x32xf32>
    %343 = vector.extract_strided_slice %326 {offsets = [0, 64], sizes = [2, 32], strides = [1, 1]} : vector<2x128xf32> to vector<2x32xf32>
    %344 = math.tanh %343 : vector<2x32xf32>
    %345 = vector.extract_strided_slice %326 {offsets = [0, 96], sizes = [2, 32], strides = [1, 1]} : vector<2x128xf32> to vector<2x32xf32>
    %cst_142 = arith.constant 0.000000e+00 : f32
    %346 = vector.broadcast %cst_142 : f32 to vector<2x32xf32>
    %347 = arith.subf %346, %345 : vector<2x32xf32>
    %348 = math.exp %347 : vector<2x32xf32>
    %cst_143 = arith.constant 1.000000e+00 : f32
    %349 = vector.broadcast %cst_143 : f32 to vector<2x32xf32>
    %350 = arith.addf %349, %348 : vector<2x32xf32>
    %cst_144 = arith.constant 1.000000e+00 : f32
    %351 = vector.broadcast %cst_144 : f32 to vector<2x32xf32>
    %352 = arith.divf %351, %350 : vector<2x32xf32>
    %353 = arith.mulf %342, %324 : vector<2x32xf32>
    %354 = arith.mulf %334, %344 : vector<2x32xf32>
    %355 = arith.addf %353, %354 : vector<2x32xf32>
    %356 = math.tanh %355 : vector<2x32xf32>
    %357 = arith.mulf %352, %356 : vector<2x32xf32>
    %cst_145 = arith.constant dense<0.000000e+00> : vector<2x128xf32>
    %358 = tpu.matmul %357, %5, %cst_145 {dimension_numbers = #tpu.dot_dimension_numbers<[1], [0], [0], [1], [0, 0, 1, 1], [], []>} : vector<2x32xf32>, vector<32x128xf32>, vector<2x128xf32> -> vector<2x128xf32>
    %359 = arith.addf %304, %358 : vector<2x128xf32>
    %360 = vector.extract_strided_slice %359 {offsets = [0, 0], sizes = [2, 32], strides = [1, 1]} : vector<2x128xf32> to vector<2x32xf32>
    %cst_146 = arith.constant 0.000000e+00 : f32
    %361 = vector.broadcast %cst_146 : f32 to vector<2x32xf32>
    %362 = arith.subf %361, %360 : vector<2x32xf32>
    %363 = math.exp %362 : vector<2x32xf32>
    %cst_147 = arith.constant 1.000000e+00 : f32
    %364 = vector.broadcast %cst_147 : f32 to vector<2x32xf32>
    %365 = arith.addf %364, %363 : vector<2x32xf32>
    %cst_148 = arith.constant 1.000000e+00 : f32
    %366 = vector.broadcast %cst_148 : f32 to vector<2x32xf32>
    %367 = arith.divf %366, %365 : vector<2x32xf32>
    %368 = vector.extract_strided_slice %359 {offsets = [0, 32], sizes = [2, 32], strides = [1, 1]} : vector<2x128xf32> to vector<2x32xf32>
    %cst_149 = arith.constant 0.000000e+00 : f32
    %369 = vector.broadcast %cst_149 : f32 to vector<2x32xf32>
    %370 = arith.subf %369, %368 : vector<2x32xf32>
    %371 = math.exp %370 : vector<2x32xf32>
    %cst_150 = arith.constant 1.000000e+00 : f32
    %372 = vector.broadcast %cst_150 : f32 to vector<2x32xf32>
    %373 = arith.addf %372, %371 : vector<2x32xf32>
    %cst_151 = arith.constant 1.000000e+00 : f32
    %374 = vector.broadcast %cst_151 : f32 to vector<2x32xf32>
    %375 = arith.divf %374, %373 : vector<2x32xf32>
    %376 = vector.extract_strided_slice %359 {offsets = [0, 64], sizes = [2, 32], strides = [1, 1]} : vector<2x128xf32> to vector<2x32xf32>
    %377 = math.tanh %376 : vector<2x32xf32>
    %378 = vector.extract_strided_slice %359 {offsets = [0, 96], sizes = [2, 32], strides = [1, 1]} : vector<2x128xf32> to vector<2x32xf32>
    %cst_152 = arith.constant 0.000000e+00 : f32
    %379 = vector.broadcast %cst_152 : f32 to vector<2x32xf32>
    %380 = arith.subf %379, %378 : vector<2x32xf32>
    %381 = math.exp %380 : vector<2x32xf32>
    %cst_153 = arith.constant 1.000000e+00 : f32
    %382 = vector.broadcast %cst_153 : f32 to vector<2x32xf32>
    %383 = arith.addf %382, %381 : vector<2x32xf32>
    %cst_154 = arith.constant 1.000000e+00 : f32
    %384 = vector.broadcast %cst_154 : f32 to vector<2x32xf32>
    %385 = arith.divf %384, %383 : vector<2x32xf32>
    %386 = arith.mulf %375, %355 : vector<2x32xf32>
    %387 = arith.mulf %367, %377 : vector<2x32xf32>
    %388 = arith.addf %386, %387 : vector<2x32xf32>
    %389 = math.tanh %388 : vector<2x32xf32>
    %390 = arith.mulf %385, %389 : vector<2x32xf32>
    %cst_155 = arith.constant dense<0.000000e+00> : vector<2x128xf32>
    %391 = tpu.matmul %390, %5, %cst_155 {dimension_numbers = #tpu.dot_dimension_numbers<[1], [0], [0], [1], [0, 0, 1, 1], [], []>} : vector<2x32xf32>, vector<32x128xf32>, vector<2x128xf32> -> vector<2x128xf32>
    %392 = arith.addf %307, %391 : vector<2x128xf32>
    %393 = vector.extract_strided_slice %392 {offsets = [0, 0], sizes = [2, 32], strides = [1, 1]} : vector<2x128xf32> to vector<2x32xf32>
    %cst_156 = arith.constant 0.000000e+00 : f32
    %394 = vector.broadcast %cst_156 : f32 to vector<2x32xf32>
    %395 = arith.subf %394, %393 : vector<2x32xf32>
    %396 = math.exp %395 : vector<2x32xf32>
    %cst_157 = arith.constant 1.000000e+00 : f32
    %397 = vector.broadcast %cst_157 : f32 to vector<2x32xf32>
    %398 = arith.addf %397, %396 : vector<2x32xf32>
    %cst_158 = arith.constant 1.000000e+00 : f32
    %399 = vector.broadcast %cst_158 : f32 to vector<2x32xf32>
    %400 = arith.divf %399, %398 : vector<2x32xf32>
    %401 = vector.extract_strided_slice %392 {offsets = [0, 32], sizes = [2, 32], strides = [1, 1]} : vector<2x128xf32> to vector<2x32xf32>
    %cst_159 = arith.constant 0.000000e+00 : f32
    %402 = vector.broadcast %cst_159 : f32 to vector<2x32xf32>
    %403 = arith.subf %402, %401 : vector<2x32xf32>
    %404 = math.exp %403 : vector<2x32xf32>
    %cst_160 = arith.constant 1.000000e+00 : f32
    %405 = vector.broadcast %cst_160 : f32 to vector<2x32xf32>
    %406 = arith.addf %405, %404 : vector<2x32xf32>
    %cst_161 = arith.constant 1.000000e+00 : f32
    %407 = vector.broadcast %cst_161 : f32 to vector<2x32xf32>
    %408 = arith.divf %407, %406 : vector<2x32xf32>
    %409 = vector.extract_strided_slice %392 {offsets = [0, 64], sizes = [2, 32], strides = [1, 1]} : vector<2x128xf32> to vector<2x32xf32>
    %410 = math.tanh %409 : vector<2x32xf32>
    %411 = vector.extract_strided_slice %392 {offsets = [0, 96], sizes = [2, 32], strides = [1, 1]} : vector<2x128xf32> to vector<2x32xf32>
    %cst_162 = arith.constant 0.000000e+00 : f32
    %412 = vector.broadcast %cst_162 : f32 to vector<2x32xf32>
    %413 = arith.subf %412, %411 : vector<2x32xf32>
    %414 = math.exp %413 : vector<2x32xf32>
    %cst_163 = arith.constant 1.000000e+00 : f32
    %415 = vector.broadcast %cst_163 : f32 to vector<2x32xf32>
    %416 = arith.addf %415, %414 : vector<2x32xf32>
    %cst_164 = arith.constant 1.000000e+00 : f32
    %417 = vector.broadcast %cst_164 : f32 to vector<2x32xf32>
    %418 = arith.divf %417, %416 : vector<2x32xf32>
    %419 = arith.mulf %408, %388 : vector<2x32xf32>
    %420 = arith.mulf %400, %410 : vector<2x32xf32>
    %421 = arith.addf %419, %420 : vector<2x32xf32>
    %422 = math.tanh %421 : vector<2x32xf32>
    %423 = arith.mulf %418, %422 : vector<2x32xf32>
    %cst_165 = arith.constant dense<0.000000e+00> : vector<2x128xf32>
    %424 = tpu.matmul %423, %5, %cst_165 {dimension_numbers = #tpu.dot_dimension_numbers<[1], [0], [0], [1], [0, 0, 1, 1], [], []>} : vector<2x32xf32>, vector<32x128xf32>, vector<2x128xf32> -> vector<2x128xf32>
    %425 = arith.addf %310, %424 : vector<2x128xf32>
    %426 = vector.extract_strided_slice %425 {offsets = [0, 0], sizes = [2, 32], strides = [1, 1]} : vector<2x128xf32> to vector<2x32xf32>
    %cst_166 = arith.constant 0.000000e+00 : f32
    %427 = vector.broadcast %cst_166 : f32 to vector<2x32xf32>
    %428 = arith.subf %427, %426 : vector<2x32xf32>
    %429 = math.exp %428 : vector<2x32xf32>
    %cst_167 = arith.constant 1.000000e+00 : f32
    %430 = vector.broadcast %cst_167 : f32 to vector<2x32xf32>
    %431 = arith.addf %430, %429 : vector<2x32xf32>
    %cst_168 = arith.constant 1.000000e+00 : f32
    %432 = vector.broadcast %cst_168 : f32 to vector<2x32xf32>
    %433 = arith.divf %432, %431 : vector<2x32xf32>
    %434 = vector.extract_strided_slice %425 {offsets = [0, 32], sizes = [2, 32], strides = [1, 1]} : vector<2x128xf32> to vector<2x32xf32>
    %cst_169 = arith.constant 0.000000e+00 : f32
    %435 = vector.broadcast %cst_169 : f32 to vector<2x32xf32>
    %436 = arith.subf %435, %434 : vector<2x32xf32>
    %437 = math.exp %436 : vector<2x32xf32>
    %cst_170 = arith.constant 1.000000e+00 : f32
    %438 = vector.broadcast %cst_170 : f32 to vector<2x32xf32>
    %439 = arith.addf %438, %437 : vector<2x32xf32>
    %cst_171 = arith.constant 1.000000e+00 : f32
    %440 = vector.broadcast %cst_171 : f32 to vector<2x32xf32>
    %441 = arith.divf %440, %439 : vector<2x32xf32>
    %442 = vector.extract_strided_slice %425 {offsets = [0, 64], sizes = [2, 32], strides = [1, 1]} : vector<2x128xf32> to vector<2x32xf32>
    %443 = math.tanh %442 : vector<2x32xf32>
    %444 = vector.extract_strided_slice %425 {offsets = [0, 96], sizes = [2, 32], strides = [1, 1]} : vector<2x128xf32> to vector<2x32xf32>
    %cst_172 = arith.constant 0.000000e+00 : f32
    %445 = vector.broadcast %cst_172 : f32 to vector<2x32xf32>
    %446 = arith.subf %445, %444 : vector<2x32xf32>
    %447 = math.exp %446 : vector<2x32xf32>
    %cst_173 = arith.constant 1.000000e+00 : f32
    %448 = vector.broadcast %cst_173 : f32 to vector<2x32xf32>
    %449 = arith.addf %448, %447 : vector<2x32xf32>
    %cst_174 = arith.constant 1.000000e+00 : f32
    %450 = vector.broadcast %cst_174 : f32 to vector<2x32xf32>
    %451 = arith.divf %450, %449 : vector<2x32xf32>
    %452 = arith.mulf %441, %421 : vector<2x32xf32>
    %453 = arith.mulf %433, %443 : vector<2x32xf32>
    %454 = arith.addf %452, %453 : vector<2x32xf32>
    %455 = math.tanh %454 : vector<2x32xf32>
    %456 = arith.mulf %451, %455 : vector<2x32xf32>
    %cst_175 = arith.constant dense<0.000000e+00> : vector<2x128xf32>
    %457 = tpu.matmul %456, %5, %cst_175 {dimension_numbers = #tpu.dot_dimension_numbers<[1], [0], [0], [1], [0, 0, 1, 1], [], []>} : vector<2x32xf32>, vector<32x128xf32>, vector<2x128xf32> -> vector<2x128xf32>
    %458 = arith.addf %313, %457 : vector<2x128xf32>
    %459 = vector.extract_strided_slice %458 {offsets = [0, 0], sizes = [2, 32], strides = [1, 1]} : vector<2x128xf32> to vector<2x32xf32>
    %cst_176 = arith.constant 0.000000e+00 : f32
    %460 = vector.broadcast %cst_176 : f32 to vector<2x32xf32>
    %461 = arith.subf %460, %459 : vector<2x32xf32>
    %462 = math.exp %461 : vector<2x32xf32>
    %cst_177 = arith.constant 1.000000e+00 : f32
    %463 = vector.broadcast %cst_177 : f32 to vector<2x32xf32>
    %464 = arith.addf %463, %462 : vector<2x32xf32>
    %cst_178 = arith.constant 1.000000e+00 : f32
    %465 = vector.broadcast %cst_178 : f32 to vector<2x32xf32>
    %466 = arith.divf %465, %464 : vector<2x32xf32>
    %467 = vector.extract_strided_slice %458 {offsets = [0, 32], sizes = [2, 32], strides = [1, 1]} : vector<2x128xf32> to vector<2x32xf32>
    %cst_179 = arith.constant 0.000000e+00 : f32
    %468 = vector.broadcast %cst_179 : f32 to vector<2x32xf32>
    %469 = arith.subf %468, %467 : vector<2x32xf32>
    %470 = math.exp %469 : vector<2x32xf32>
    %cst_180 = arith.constant 1.000000e+00 : f32
    %471 = vector.broadcast %cst_180 : f32 to vector<2x32xf32>
    %472 = arith.addf %471, %470 : vector<2x32xf32>
    %cst_181 = arith.constant 1.000000e+00 : f32
    %473 = vector.broadcast %cst_181 : f32 to vector<2x32xf32>
    %474 = arith.divf %473, %472 : vector<2x32xf32>
    %475 = vector.extract_strided_slice %458 {offsets = [0, 64], sizes = [2, 32], strides = [1, 1]} : vector<2x128xf32> to vector<2x32xf32>
    %476 = math.tanh %475 : vector<2x32xf32>
    %477 = vector.extract_strided_slice %458 {offsets = [0, 96], sizes = [2, 32], strides = [1, 1]} : vector<2x128xf32> to vector<2x32xf32>
    %cst_182 = arith.constant 0.000000e+00 : f32
    %478 = vector.broadcast %cst_182 : f32 to vector<2x32xf32>
    %479 = arith.subf %478, %477 : vector<2x32xf32>
    %480 = math.exp %479 : vector<2x32xf32>
    %cst_183 = arith.constant 1.000000e+00 : f32
    %481 = vector.broadcast %cst_183 : f32 to vector<2x32xf32>
    %482 = arith.addf %481, %480 : vector<2x32xf32>
    %cst_184 = arith.constant 1.000000e+00 : f32
    %483 = vector.broadcast %cst_184 : f32 to vector<2x32xf32>
    %484 = arith.divf %483, %482 : vector<2x32xf32>
    %485 = arith.mulf %474, %454 : vector<2x32xf32>
    %486 = arith.mulf %466, %476 : vector<2x32xf32>
    %487 = arith.addf %485, %486 : vector<2x32xf32>
    %488 = math.tanh %487 : vector<2x32xf32>
    %489 = arith.mulf %484, %488 : vector<2x32xf32>
    %cst_185 = arith.constant dense<0.000000e+00> : vector<2x128xf32>
    %490 = tpu.matmul %489, %5, %cst_185 {dimension_numbers = #tpu.dot_dimension_numbers<[1], [0], [0], [1], [0, 0, 1, 1], [], []>} : vector<2x32xf32>, vector<32x128xf32>, vector<2x128xf32> -> vector<2x128xf32>
    %491 = arith.addf %316, %490 : vector<2x128xf32>
    %492 = vector.extract_strided_slice %491 {offsets = [0, 0], sizes = [2, 32], strides = [1, 1]} : vector<2x128xf32> to vector<2x32xf32>
    %cst_186 = arith.constant 0.000000e+00 : f32
    %493 = vector.broadcast %cst_186 : f32 to vector<2x32xf32>
    %494 = arith.subf %493, %492 : vector<2x32xf32>
    %495 = math.exp %494 : vector<2x32xf32>
    %cst_187 = arith.constant 1.000000e+00 : f32
    %496 = vector.broadcast %cst_187 : f32 to vector<2x32xf32>
    %497 = arith.addf %496, %495 : vector<2x32xf32>
    %cst_188 = arith.constant 1.000000e+00 : f32
    %498 = vector.broadcast %cst_188 : f32 to vector<2x32xf32>
    %499 = arith.divf %498, %497 : vector<2x32xf32>
    %500 = vector.extract_strided_slice %491 {offsets = [0, 32], sizes = [2, 32], strides = [1, 1]} : vector<2x128xf32> to vector<2x32xf32>
    %cst_189 = arith.constant 0.000000e+00 : f32
    %501 = vector.broadcast %cst_189 : f32 to vector<2x32xf32>
    %502 = arith.subf %501, %500 : vector<2x32xf32>
    %503 = math.exp %502 : vector<2x32xf32>
    %cst_190 = arith.constant 1.000000e+00 : f32
    %504 = vector.broadcast %cst_190 : f32 to vector<2x32xf32>
    %505 = arith.addf %504, %503 : vector<2x32xf32>
    %cst_191 = arith.constant 1.000000e+00 : f32
    %506 = vector.broadcast %cst_191 : f32 to vector<2x32xf32>
    %507 = arith.divf %506, %505 : vector<2x32xf32>
    %508 = vector.extract_strided_slice %491 {offsets = [0, 64], sizes = [2, 32], strides = [1, 1]} : vector<2x128xf32> to vector<2x32xf32>
    %509 = math.tanh %508 : vector<2x32xf32>
    %510 = vector.extract_strided_slice %491 {offsets = [0, 96], sizes = [2, 32], strides = [1, 1]} : vector<2x128xf32> to vector<2x32xf32>
    %cst_192 = arith.constant 0.000000e+00 : f32
    %511 = vector.broadcast %cst_192 : f32 to vector<2x32xf32>
    %512 = arith.subf %511, %510 : vector<2x32xf32>
    %513 = math.exp %512 : vector<2x32xf32>
    %cst_193 = arith.constant 1.000000e+00 : f32
    %514 = vector.broadcast %cst_193 : f32 to vector<2x32xf32>
    %515 = arith.addf %514, %513 : vector<2x32xf32>
    %cst_194 = arith.constant 1.000000e+00 : f32
    %516 = vector.broadcast %cst_194 : f32 to vector<2x32xf32>
    %517 = arith.divf %516, %515 : vector<2x32xf32>
    %518 = arith.mulf %507, %487 : vector<2x32xf32>
    %519 = arith.mulf %499, %509 : vector<2x32xf32>
    %520 = arith.addf %518, %519 : vector<2x32xf32>
    %521 = math.tanh %520 : vector<2x32xf32>
    %522 = arith.mulf %517, %521 : vector<2x32xf32>
    %cst_195 = arith.constant dense<0.000000e+00> : vector<2x128xf32>
    %523 = tpu.matmul %522, %5, %cst_195 {dimension_numbers = #tpu.dot_dimension_numbers<[1], [0], [0], [1], [0, 0, 1, 1], [], []>} : vector<2x32xf32>, vector<32x128xf32>, vector<2x128xf32> -> vector<2x128xf32>
    %524 = arith.addf %319, %523 : vector<2x128xf32>
    %525 = vector.extract_strided_slice %524 {offsets = [0, 0], sizes = [2, 32], strides = [1, 1]} : vector<2x128xf32> to vector<2x32xf32>
    %cst_196 = arith.constant 0.000000e+00 : f32
    %526 = vector.broadcast %cst_196 : f32 to vector<2x32xf32>
    %527 = arith.subf %526, %525 : vector<2x32xf32>
    %528 = math.exp %527 : vector<2x32xf32>
    %cst_197 = arith.constant 1.000000e+00 : f32
    %529 = vector.broadcast %cst_197 : f32 to vector<2x32xf32>
    %530 = arith.addf %529, %528 : vector<2x32xf32>
    %cst_198 = arith.constant 1.000000e+00 : f32
    %531 = vector.broadcast %cst_198 : f32 to vector<2x32xf32>
    %532 = arith.divf %531, %530 : vector<2x32xf32>
    %533 = vector.extract_strided_slice %524 {offsets = [0, 32], sizes = [2, 32], strides = [1, 1]} : vector<2x128xf32> to vector<2x32xf32>
    %cst_199 = arith.constant 0.000000e+00 : f32
    %534 = vector.broadcast %cst_199 : f32 to vector<2x32xf32>
    %535 = arith.subf %534, %533 : vector<2x32xf32>
    %536 = math.exp %535 : vector<2x32xf32>
    %cst_200 = arith.constant 1.000000e+00 : f32
    %537 = vector.broadcast %cst_200 : f32 to vector<2x32xf32>
    %538 = arith.addf %537, %536 : vector<2x32xf32>
    %cst_201 = arith.constant 1.000000e+00 : f32
    %539 = vector.broadcast %cst_201 : f32 to vector<2x32xf32>
    %540 = arith.divf %539, %538 : vector<2x32xf32>
    %541 = vector.extract_strided_slice %524 {offsets = [0, 64], sizes = [2, 32], strides = [1, 1]} : vector<2x128xf32> to vector<2x32xf32>
    %542 = math.tanh %541 : vector<2x32xf32>
    %543 = vector.extract_strided_slice %524 {offsets = [0, 96], sizes = [2, 32], strides = [1, 1]} : vector<2x128xf32> to vector<2x32xf32>
    %cst_202 = arith.constant 0.000000e+00 : f32
    %544 = vector.broadcast %cst_202 : f32 to vector<2x32xf32>
    %545 = arith.subf %544, %543 : vector<2x32xf32>
    %546 = math.exp %545 : vector<2x32xf32>
    %cst_203 = arith.constant 1.000000e+00 : f32
    %547 = vector.broadcast %cst_203 : f32 to vector<2x32xf32>
    %548 = arith.addf %547, %546 : vector<2x32xf32>
    %cst_204 = arith.constant 1.000000e+00 : f32
    %549 = vector.broadcast %cst_204 : f32 to vector<2x32xf32>
    %550 = arith.divf %549, %548 : vector<2x32xf32>
    %551 = arith.mulf %540, %520 : vector<2x32xf32>
    %552 = arith.mulf %532, %542 : vector<2x32xf32>
    %553 = arith.addf %551, %552 : vector<2x32xf32>
    %554 = math.tanh %553 : vector<2x32xf32>
    %555 = arith.mulf %550, %554 : vector<2x32xf32>
    %cst_205 = arith.constant dense<0.000000e+00> : vector<2x128xf32>
    %556 = tpu.matmul %555, %5, %cst_205 {dimension_numbers = #tpu.dot_dimension_numbers<[1], [0], [0], [1], [0, 0, 1, 1], [], []>} : vector<2x32xf32>, vector<32x128xf32>, vector<2x128xf32> -> vector<2x128xf32>
    %557 = arith.addf %322, %556 : vector<2x128xf32>
    %558 = vector.extract_strided_slice %557 {offsets = [0, 0], sizes = [2, 32], strides = [1, 1]} : vector<2x128xf32> to vector<2x32xf32>
    %cst_206 = arith.constant 0.000000e+00 : f32
    %559 = vector.broadcast %cst_206 : f32 to vector<2x32xf32>
    %560 = arith.subf %559, %558 : vector<2x32xf32>
    %561 = math.exp %560 : vector<2x32xf32>
    %cst_207 = arith.constant 1.000000e+00 : f32
    %562 = vector.broadcast %cst_207 : f32 to vector<2x32xf32>
    %563 = arith.addf %562, %561 : vector<2x32xf32>
    %cst_208 = arith.constant 1.000000e+00 : f32
    %564 = vector.broadcast %cst_208 : f32 to vector<2x32xf32>
    %565 = arith.divf %564, %563 : vector<2x32xf32>
    %566 = vector.extract_strided_slice %557 {offsets = [0, 32], sizes = [2, 32], strides = [1, 1]} : vector<2x128xf32> to vector<2x32xf32>
    %cst_209 = arith.constant 0.000000e+00 : f32
    %567 = vector.broadcast %cst_209 : f32 to vector<2x32xf32>
    %568 = arith.subf %567, %566 : vector<2x32xf32>
    %569 = math.exp %568 : vector<2x32xf32>
    %cst_210 = arith.constant 1.000000e+00 : f32
    %570 = vector.broadcast %cst_210 : f32 to vector<2x32xf32>
    %571 = arith.addf %570, %569 : vector<2x32xf32>
    %cst_211 = arith.constant 1.000000e+00 : f32
    %572 = vector.broadcast %cst_211 : f32 to vector<2x32xf32>
    %573 = arith.divf %572, %571 : vector<2x32xf32>
    %574 = vector.extract_strided_slice %557 {offsets = [0, 64], sizes = [2, 32], strides = [1, 1]} : vector<2x128xf32> to vector<2x32xf32>
    %575 = math.tanh %574 : vector<2x32xf32>
    %576 = vector.extract_strided_slice %557 {offsets = [0, 96], sizes = [2, 32], strides = [1, 1]} : vector<2x128xf32> to vector<2x32xf32>
    %cst_212 = arith.constant 0.000000e+00 : f32
    %577 = vector.broadcast %cst_212 : f32 to vector<2x32xf32>
    %578 = arith.subf %577, %576 : vector<2x32xf32>
    %579 = math.exp %578 : vector<2x32xf32>
    %cst_213 = arith.constant 1.000000e+00 : f32
    %580 = vector.broadcast %cst_213 : f32 to vector<2x32xf32>
    %581 = arith.addf %580, %579 : vector<2x32xf32>
    %cst_214 = arith.constant 1.000000e+00 : f32
    %582 = vector.broadcast %cst_214 : f32 to vector<2x32xf32>
    %583 = arith.divf %582, %581 : vector<2x32xf32>
    %584 = arith.mulf %573, %553 : vector<2x32xf32>
    %585 = arith.mulf %565, %575 : vector<2x32xf32>
    %586 = arith.addf %584, %585 : vector<2x32xf32>
    %587 = math.tanh %586 : vector<2x32xf32>
    %588 = arith.mulf %583, %587 : vector<2x32xf32>
    %cst_215 = arith.constant dense<0.000000e+00> : vector<16x128xf32>
    %589 = tpu.matmul %0, %7, %cst_215 {dimension_numbers = #tpu.dot_dimension_numbers<[1], [0], [0], [1], [0, 0, 1, 1], [], []>} : vector<16x16xf32>, vector<16x128xf32>, vector<16x128xf32> -> vector<16x128xf32>
    %590 = vector.broadcast %9 : vector<1x128xf32> to vector<16x128xf32>
    %591 = arith.addf %589, %590 : vector<16x128xf32>
    %592 = vector.extract_strided_slice %591 {offsets = [0, 0], sizes = [2, 128], strides = [1, 1]} : vector<16x128xf32> to vector<2x128xf32>
    %593 = vector.extract_strided_slice %591 {offsets = [2, 0], sizes = [2, 128], strides = [1, 1]} : vector<16x128xf32> to vector<2x128xf32>
    %594 = vector.extract_strided_slice %591 {offsets = [4, 0], sizes = [2, 128], strides = [1, 1]} : vector<16x128xf32> to vector<2x128xf32>
    %595 = vector.extract_strided_slice %591 {offsets = [6, 0], sizes = [2, 128], strides = [1, 1]} : vector<16x128xf32> to vector<2x128xf32>
    %596 = vector.extract_strided_slice %591 {offsets = [8, 0], sizes = [2, 128], strides = [1, 1]} : vector<16x128xf32> to vector<2x128xf32>
    %597 = vector.extract_strided_slice %591 {offsets = [10, 0], sizes = [2, 128], strides = [1, 1]} : vector<16x128xf32> to vector<2x128xf32>
    %598 = vector.extract_strided_slice %591 {offsets = [12, 0], sizes = [2, 128], strides = [1, 1]} : vector<16x128xf32> to vector<2x128xf32>
    %599 = vector.extract_strided_slice %591 {offsets = [14, 0], sizes = [2, 128], strides = [1, 1]} : vector<16x128xf32> to vector<2x128xf32>
    %cst_216 = arith.constant 0.000000e+00 : f32
    %600 = vector.broadcast %cst_216 : f32 to vector<2x32xf32>
    %cst_217 = arith.constant 0.000000e+00 : f32
    %601 = vector.broadcast %cst_217 : f32 to vector<2x32xf32>
    %cst_218 = arith.constant dense<0.000000e+00> : vector<2x128xf32>
    %602 = tpu.matmul %600, %8, %cst_218 {dimension_numbers = #tpu.dot_dimension_numbers<[1], [0], [0], [1], [0, 0, 1, 1], [], []>} : vector<2x32xf32>, vector<32x128xf32>, vector<2x128xf32> -> vector<2x128xf32>
    %603 = arith.addf %592, %602 : vector<2x128xf32>
    %604 = vector.extract_strided_slice %603 {offsets = [0, 0], sizes = [2, 32], strides = [1, 1]} : vector<2x128xf32> to vector<2x32xf32>
    %cst_219 = arith.constant 0.000000e+00 : f32
    %605 = vector.broadcast %cst_219 : f32 to vector<2x32xf32>
    %606 = arith.subf %605, %604 : vector<2x32xf32>
    %607 = math.exp %606 : vector<2x32xf32>
    %cst_220 = arith.constant 1.000000e+00 : f32
    %608 = vector.broadcast %cst_220 : f32 to vector<2x32xf32>
    %609 = arith.addf %608, %607 : vector<2x32xf32>
    %cst_221 = arith.constant 1.000000e+00 : f32
    %610 = vector.broadcast %cst_221 : f32 to vector<2x32xf32>
    %611 = arith.divf %610, %609 : vector<2x32xf32>
    %612 = vector.extract_strided_slice %603 {offsets = [0, 32], sizes = [2, 32], strides = [1, 1]} : vector<2x128xf32> to vector<2x32xf32>
    %cst_222 = arith.constant 0.000000e+00 : f32
    %613 = vector.broadcast %cst_222 : f32 to vector<2x32xf32>
    %614 = arith.subf %613, %612 : vector<2x32xf32>
    %615 = math.exp %614 : vector<2x32xf32>
    %cst_223 = arith.constant 1.000000e+00 : f32
    %616 = vector.broadcast %cst_223 : f32 to vector<2x32xf32>
    %617 = arith.addf %616, %615 : vector<2x32xf32>
    %cst_224 = arith.constant 1.000000e+00 : f32
    %618 = vector.broadcast %cst_224 : f32 to vector<2x32xf32>
    %619 = arith.divf %618, %617 : vector<2x32xf32>
    %620 = vector.extract_strided_slice %603 {offsets = [0, 64], sizes = [2, 32], strides = [1, 1]} : vector<2x128xf32> to vector<2x32xf32>
    %621 = math.tanh %620 : vector<2x32xf32>
    %622 = vector.extract_strided_slice %603 {offsets = [0, 96], sizes = [2, 32], strides = [1, 1]} : vector<2x128xf32> to vector<2x32xf32>
    %cst_225 = arith.constant 0.000000e+00 : f32
    %623 = vector.broadcast %cst_225 : f32 to vector<2x32xf32>
    %624 = arith.subf %623, %622 : vector<2x32xf32>
    %625 = math.exp %624 : vector<2x32xf32>
    %cst_226 = arith.constant 1.000000e+00 : f32
    %626 = vector.broadcast %cst_226 : f32 to vector<2x32xf32>
    %627 = arith.addf %626, %625 : vector<2x32xf32>
    %cst_227 = arith.constant 1.000000e+00 : f32
    %628 = vector.broadcast %cst_227 : f32 to vector<2x32xf32>
    %629 = arith.divf %628, %627 : vector<2x32xf32>
    %630 = arith.mulf %619, %601 : vector<2x32xf32>
    %631 = arith.mulf %611, %621 : vector<2x32xf32>
    %632 = arith.addf %630, %631 : vector<2x32xf32>
    %633 = math.tanh %632 : vector<2x32xf32>
    %634 = arith.mulf %629, %633 : vector<2x32xf32>
    %cst_228 = arith.constant dense<0.000000e+00> : vector<2x128xf32>
    %635 = tpu.matmul %634, %8, %cst_228 {dimension_numbers = #tpu.dot_dimension_numbers<[1], [0], [0], [1], [0, 0, 1, 1], [], []>} : vector<2x32xf32>, vector<32x128xf32>, vector<2x128xf32> -> vector<2x128xf32>
    %636 = arith.addf %593, %635 : vector<2x128xf32>
    %637 = vector.extract_strided_slice %636 {offsets = [0, 0], sizes = [2, 32], strides = [1, 1]} : vector<2x128xf32> to vector<2x32xf32>
    %cst_229 = arith.constant 0.000000e+00 : f32
    %638 = vector.broadcast %cst_229 : f32 to vector<2x32xf32>
    %639 = arith.subf %638, %637 : vector<2x32xf32>
    %640 = math.exp %639 : vector<2x32xf32>
    %cst_230 = arith.constant 1.000000e+00 : f32
    %641 = vector.broadcast %cst_230 : f32 to vector<2x32xf32>
    %642 = arith.addf %641, %640 : vector<2x32xf32>
    %cst_231 = arith.constant 1.000000e+00 : f32
    %643 = vector.broadcast %cst_231 : f32 to vector<2x32xf32>
    %644 = arith.divf %643, %642 : vector<2x32xf32>
    %645 = vector.extract_strided_slice %636 {offsets = [0, 32], sizes = [2, 32], strides = [1, 1]} : vector<2x128xf32> to vector<2x32xf32>
    %cst_232 = arith.constant 0.000000e+00 : f32
    %646 = vector.broadcast %cst_232 : f32 to vector<2x32xf32>
    %647 = arith.subf %646, %645 : vector<2x32xf32>
    %648 = math.exp %647 : vector<2x32xf32>
    %cst_233 = arith.constant 1.000000e+00 : f32
    %649 = vector.broadcast %cst_233 : f32 to vector<2x32xf32>
    %650 = arith.addf %649, %648 : vector<2x32xf32>
    %cst_234 = arith.constant 1.000000e+00 : f32
    %651 = vector.broadcast %cst_234 : f32 to vector<2x32xf32>
    %652 = arith.divf %651, %650 : vector<2x32xf32>
    %653 = vector.extract_strided_slice %636 {offsets = [0, 64], sizes = [2, 32], strides = [1, 1]} : vector<2x128xf32> to vector<2x32xf32>
    %654 = math.tanh %653 : vector<2x32xf32>
    %655 = vector.extract_strided_slice %636 {offsets = [0, 96], sizes = [2, 32], strides = [1, 1]} : vector<2x128xf32> to vector<2x32xf32>
    %cst_235 = arith.constant 0.000000e+00 : f32
    %656 = vector.broadcast %cst_235 : f32 to vector<2x32xf32>
    %657 = arith.subf %656, %655 : vector<2x32xf32>
    %658 = math.exp %657 : vector<2x32xf32>
    %cst_236 = arith.constant 1.000000e+00 : f32
    %659 = vector.broadcast %cst_236 : f32 to vector<2x32xf32>
    %660 = arith.addf %659, %658 : vector<2x32xf32>
    %cst_237 = arith.constant 1.000000e+00 : f32
    %661 = vector.broadcast %cst_237 : f32 to vector<2x32xf32>
    %662 = arith.divf %661, %660 : vector<2x32xf32>
    %663 = arith.mulf %652, %632 : vector<2x32xf32>
    %664 = arith.mulf %644, %654 : vector<2x32xf32>
    %665 = arith.addf %663, %664 : vector<2x32xf32>
    %666 = math.tanh %665 : vector<2x32xf32>
    %667 = arith.mulf %662, %666 : vector<2x32xf32>
    %cst_238 = arith.constant dense<0.000000e+00> : vector<2x128xf32>
    %668 = tpu.matmul %667, %8, %cst_238 {dimension_numbers = #tpu.dot_dimension_numbers<[1], [0], [0], [1], [0, 0, 1, 1], [], []>} : vector<2x32xf32>, vector<32x128xf32>, vector<2x128xf32> -> vector<2x128xf32>
    %669 = arith.addf %594, %668 : vector<2x128xf32>
    %670 = vector.extract_strided_slice %669 {offsets = [0, 0], sizes = [2, 32], strides = [1, 1]} : vector<2x128xf32> to vector<2x32xf32>
    %cst_239 = arith.constant 0.000000e+00 : f32
    %671 = vector.broadcast %cst_239 : f32 to vector<2x32xf32>
    %672 = arith.subf %671, %670 : vector<2x32xf32>
    %673 = math.exp %672 : vector<2x32xf32>
    %cst_240 = arith.constant 1.000000e+00 : f32
    %674 = vector.broadcast %cst_240 : f32 to vector<2x32xf32>
    %675 = arith.addf %674, %673 : vector<2x32xf32>
    %cst_241 = arith.constant 1.000000e+00 : f32
    %676 = vector.broadcast %cst_241 : f32 to vector<2x32xf32>
    %677 = arith.divf %676, %675 : vector<2x32xf32>
    %678 = vector.extract_strided_slice %669 {offsets = [0, 32], sizes = [2, 32], strides = [1, 1]} : vector<2x128xf32> to vector<2x32xf32>
    %cst_242 = arith.constant 0.000000e+00 : f32
    %679 = vector.broadcast %cst_242 : f32 to vector<2x32xf32>
    %680 = arith.subf %679, %678 : vector<2x32xf32>
    %681 = math.exp %680 : vector<2x32xf32>
    %cst_243 = arith.constant 1.000000e+00 : f32
    %682 = vector.broadcast %cst_243 : f32 to vector<2x32xf32>
    %683 = arith.addf %682, %681 : vector<2x32xf32>
    %cst_244 = arith.constant 1.000000e+00 : f32
    %684 = vector.broadcast %cst_244 : f32 to vector<2x32xf32>
    %685 = arith.divf %684, %683 : vector<2x32xf32>
    %686 = vector.extract_strided_slice %669 {offsets = [0, 64], sizes = [2, 32], strides = [1, 1]} : vector<2x128xf32> to vector<2x32xf32>
    %687 = math.tanh %686 : vector<2x32xf32>
    %688 = vector.extract_strided_slice %669 {offsets = [0, 96], sizes = [2, 32], strides = [1, 1]} : vector<2x128xf32> to vector<2x32xf32>
    %cst_245 = arith.constant 0.000000e+00 : f32
    %689 = vector.broadcast %cst_245 : f32 to vector<2x32xf32>
    %690 = arith.subf %689, %688 : vector<2x32xf32>
    %691 = math.exp %690 : vector<2x32xf32>
    %cst_246 = arith.constant 1.000000e+00 : f32
    %692 = vector.broadcast %cst_246 : f32 to vector<2x32xf32>
    %693 = arith.addf %692, %691 : vector<2x32xf32>
    %cst_247 = arith.constant 1.000000e+00 : f32
    %694 = vector.broadcast %cst_247 : f32 to vector<2x32xf32>
    %695 = arith.divf %694, %693 : vector<2x32xf32>
    %696 = arith.mulf %685, %665 : vector<2x32xf32>
    %697 = arith.mulf %677, %687 : vector<2x32xf32>
    %698 = arith.addf %696, %697 : vector<2x32xf32>
    %699 = math.tanh %698 : vector<2x32xf32>
    %700 = arith.mulf %695, %699 : vector<2x32xf32>
    %cst_248 = arith.constant dense<0.000000e+00> : vector<2x128xf32>
    %701 = tpu.matmul %700, %8, %cst_248 {dimension_numbers = #tpu.dot_dimension_numbers<[1], [0], [0], [1], [0, 0, 1, 1], [], []>} : vector<2x32xf32>, vector<32x128xf32>, vector<2x128xf32> -> vector<2x128xf32>
    %702 = arith.addf %595, %701 : vector<2x128xf32>
    %703 = vector.extract_strided_slice %702 {offsets = [0, 0], sizes = [2, 32], strides = [1, 1]} : vector<2x128xf32> to vector<2x32xf32>
    %cst_249 = arith.constant 0.000000e+00 : f32
    %704 = vector.broadcast %cst_249 : f32 to vector<2x32xf32>
    %705 = arith.subf %704, %703 : vector<2x32xf32>
    %706 = math.exp %705 : vector<2x32xf32>
    %cst_250 = arith.constant 1.000000e+00 : f32
    %707 = vector.broadcast %cst_250 : f32 to vector<2x32xf32>
    %708 = arith.addf %707, %706 : vector<2x32xf32>
    %cst_251 = arith.constant 1.000000e+00 : f32
    %709 = vector.broadcast %cst_251 : f32 to vector<2x32xf32>
    %710 = arith.divf %709, %708 : vector<2x32xf32>
    %711 = vector.extract_strided_slice %702 {offsets = [0, 32], sizes = [2, 32], strides = [1, 1]} : vector<2x128xf32> to vector<2x32xf32>
    %cst_252 = arith.constant 0.000000e+00 : f32
    %712 = vector.broadcast %cst_252 : f32 to vector<2x32xf32>
    %713 = arith.subf %712, %711 : vector<2x32xf32>
    %714 = math.exp %713 : vector<2x32xf32>
    %cst_253 = arith.constant 1.000000e+00 : f32
    %715 = vector.broadcast %cst_253 : f32 to vector<2x32xf32>
    %716 = arith.addf %715, %714 : vector<2x32xf32>
    %cst_254 = arith.constant 1.000000e+00 : f32
    %717 = vector.broadcast %cst_254 : f32 to vector<2x32xf32>
    %718 = arith.divf %717, %716 : vector<2x32xf32>
    %719 = vector.extract_strided_slice %702 {offsets = [0, 64], sizes = [2, 32], strides = [1, 1]} : vector<2x128xf32> to vector<2x32xf32>
    %720 = math.tanh %719 : vector<2x32xf32>
    %721 = vector.extract_strided_slice %702 {offsets = [0, 96], sizes = [2, 32], strides = [1, 1]} : vector<2x128xf32> to vector<2x32xf32>
    %cst_255 = arith.constant 0.000000e+00 : f32
    %722 = vector.broadcast %cst_255 : f32 to vector<2x32xf32>
    %723 = arith.subf %722, %721 : vector<2x32xf32>
    %724 = math.exp %723 : vector<2x32xf32>
    %cst_256 = arith.constant 1.000000e+00 : f32
    %725 = vector.broadcast %cst_256 : f32 to vector<2x32xf32>
    %726 = arith.addf %725, %724 : vector<2x32xf32>
    %cst_257 = arith.constant 1.000000e+00 : f32
    %727 = vector.broadcast %cst_257 : f32 to vector<2x32xf32>
    %728 = arith.divf %727, %726 : vector<2x32xf32>
    %729 = arith.mulf %718, %698 : vector<2x32xf32>
    %730 = arith.mulf %710, %720 : vector<2x32xf32>
    %731 = arith.addf %729, %730 : vector<2x32xf32>
    %732 = math.tanh %731 : vector<2x32xf32>
    %733 = arith.mulf %728, %732 : vector<2x32xf32>
    %cst_258 = arith.constant dense<0.000000e+00> : vector<2x128xf32>
    %734 = tpu.matmul %733, %8, %cst_258 {dimension_numbers = #tpu.dot_dimension_numbers<[1], [0], [0], [1], [0, 0, 1, 1], [], []>} : vector<2x32xf32>, vector<32x128xf32>, vector<2x128xf32> -> vector<2x128xf32>
    %735 = arith.addf %596, %734 : vector<2x128xf32>
    %736 = vector.extract_strided_slice %735 {offsets = [0, 0], sizes = [2, 32], strides = [1, 1]} : vector<2x128xf32> to vector<2x32xf32>
    %cst_259 = arith.constant 0.000000e+00 : f32
    %737 = vector.broadcast %cst_259 : f32 to vector<2x32xf32>
    %738 = arith.subf %737, %736 : vector<2x32xf32>
    %739 = math.exp %738 : vector<2x32xf32>
    %cst_260 = arith.constant 1.000000e+00 : f32
    %740 = vector.broadcast %cst_260 : f32 to vector<2x32xf32>
    %741 = arith.addf %740, %739 : vector<2x32xf32>
    %cst_261 = arith.constant 1.000000e+00 : f32
    %742 = vector.broadcast %cst_261 : f32 to vector<2x32xf32>
    %743 = arith.divf %742, %741 : vector<2x32xf32>
    %744 = vector.extract_strided_slice %735 {offsets = [0, 32], sizes = [2, 32], strides = [1, 1]} : vector<2x128xf32> to vector<2x32xf32>
    %cst_262 = arith.constant 0.000000e+00 : f32
    %745 = vector.broadcast %cst_262 : f32 to vector<2x32xf32>
    %746 = arith.subf %745, %744 : vector<2x32xf32>
    %747 = math.exp %746 : vector<2x32xf32>
    %cst_263 = arith.constant 1.000000e+00 : f32
    %748 = vector.broadcast %cst_263 : f32 to vector<2x32xf32>
    %749 = arith.addf %748, %747 : vector<2x32xf32>
    %cst_264 = arith.constant 1.000000e+00 : f32
    %750 = vector.broadcast %cst_264 : f32 to vector<2x32xf32>
    %751 = arith.divf %750, %749 : vector<2x32xf32>
    %752 = vector.extract_strided_slice %735 {offsets = [0, 64], sizes = [2, 32], strides = [1, 1]} : vector<2x128xf32> to vector<2x32xf32>
    %753 = math.tanh %752 : vector<2x32xf32>
    %754 = vector.extract_strided_slice %735 {offsets = [0, 96], sizes = [2, 32], strides = [1, 1]} : vector<2x128xf32> to vector<2x32xf32>
    %cst_265 = arith.constant 0.000000e+00 : f32
    %755 = vector.broadcast %cst_265 : f32 to vector<2x32xf32>
    %756 = arith.subf %755, %754 : vector<2x32xf32>
    %757 = math.exp %756 : vector<2x32xf32>
    %cst_266 = arith.constant 1.000000e+00 : f32
    %758 = vector.broadcast %cst_266 : f32 to vector<2x32xf32>
    %759 = arith.addf %758, %757 : vector<2x32xf32>
    %cst_267 = arith.constant 1.000000e+00 : f32
    %760 = vector.broadcast %cst_267 : f32 to vector<2x32xf32>
    %761 = arith.divf %760, %759 : vector<2x32xf32>
    %762 = arith.mulf %751, %731 : vector<2x32xf32>
    %763 = arith.mulf %743, %753 : vector<2x32xf32>
    %764 = arith.addf %762, %763 : vector<2x32xf32>
    %765 = math.tanh %764 : vector<2x32xf32>
    %766 = arith.mulf %761, %765 : vector<2x32xf32>
    %cst_268 = arith.constant dense<0.000000e+00> : vector<2x128xf32>
    %767 = tpu.matmul %766, %8, %cst_268 {dimension_numbers = #tpu.dot_dimension_numbers<[1], [0], [0], [1], [0, 0, 1, 1], [], []>} : vector<2x32xf32>, vector<32x128xf32>, vector<2x128xf32> -> vector<2x128xf32>
    %768 = arith.addf %597, %767 : vector<2x128xf32>
    %769 = vector.extract_strided_slice %768 {offsets = [0, 0], sizes = [2, 32], strides = [1, 1]} : vector<2x128xf32> to vector<2x32xf32>
    %cst_269 = arith.constant 0.000000e+00 : f32
    %770 = vector.broadcast %cst_269 : f32 to vector<2x32xf32>
    %771 = arith.subf %770, %769 : vector<2x32xf32>
    %772 = math.exp %771 : vector<2x32xf32>
    %cst_270 = arith.constant 1.000000e+00 : f32
    %773 = vector.broadcast %cst_270 : f32 to vector<2x32xf32>
    %774 = arith.addf %773, %772 : vector<2x32xf32>
    %cst_271 = arith.constant 1.000000e+00 : f32
    %775 = vector.broadcast %cst_271 : f32 to vector<2x32xf32>
    %776 = arith.divf %775, %774 : vector<2x32xf32>
    %777 = vector.extract_strided_slice %768 {offsets = [0, 32], sizes = [2, 32], strides = [1, 1]} : vector<2x128xf32> to vector<2x32xf32>
    %cst_272 = arith.constant 0.000000e+00 : f32
    %778 = vector.broadcast %cst_272 : f32 to vector<2x32xf32>
    %779 = arith.subf %778, %777 : vector<2x32xf32>
    %780 = math.exp %779 : vector<2x32xf32>
    %cst_273 = arith.constant 1.000000e+00 : f32
    %781 = vector.broadcast %cst_273 : f32 to vector<2x32xf32>
    %782 = arith.addf %781, %780 : vector<2x32xf32>
    %cst_274 = arith.constant 1.000000e+00 : f32
    %783 = vector.broadcast %cst_274 : f32 to vector<2x32xf32>
    %784 = arith.divf %783, %782 : vector<2x32xf32>
    %785 = vector.extract_strided_slice %768 {offsets = [0, 64], sizes = [2, 32], strides = [1, 1]} : vector<2x128xf32> to vector<2x32xf32>
    %786 = math.tanh %785 : vector<2x32xf32>
    %787 = vector.extract_strided_slice %768 {offsets = [0, 96], sizes = [2, 32], strides = [1, 1]} : vector<2x128xf32> to vector<2x32xf32>
    %cst_275 = arith.constant 0.000000e+00 : f32
    %788 = vector.broadcast %cst_275 : f32 to vector<2x32xf32>
    %789 = arith.subf %788, %787 : vector<2x32xf32>
    %790 = math.exp %789 : vector<2x32xf32>
    %cst_276 = arith.constant 1.000000e+00 : f32
    %791 = vector.broadcast %cst_276 : f32 to vector<2x32xf32>
    %792 = arith.addf %791, %790 : vector<2x32xf32>
    %cst_277 = arith.constant 1.000000e+00 : f32
    %793 = vector.broadcast %cst_277 : f32 to vector<2x32xf32>
    %794 = arith.divf %793, %792 : vector<2x32xf32>
    %795 = arith.mulf %784, %764 : vector<2x32xf32>
    %796 = arith.mulf %776, %786 : vector<2x32xf32>
    %797 = arith.addf %795, %796 : vector<2x32xf32>
    %798 = math.tanh %797 : vector<2x32xf32>
    %799 = arith.mulf %794, %798 : vector<2x32xf32>
    %cst_278 = arith.constant dense<0.000000e+00> : vector<2x128xf32>
    %800 = tpu.matmul %799, %8, %cst_278 {dimension_numbers = #tpu.dot_dimension_numbers<[1], [0], [0], [1], [0, 0, 1, 1], [], []>} : vector<2x32xf32>, vector<32x128xf32>, vector<2x128xf32> -> vector<2x128xf32>
    %801 = arith.addf %598, %800 : vector<2x128xf32>
    %802 = vector.extract_strided_slice %801 {offsets = [0, 0], sizes = [2, 32], strides = [1, 1]} : vector<2x128xf32> to vector<2x32xf32>
    %cst_279 = arith.constant 0.000000e+00 : f32
    %803 = vector.broadcast %cst_279 : f32 to vector<2x32xf32>
    %804 = arith.subf %803, %802 : vector<2x32xf32>
    %805 = math.exp %804 : vector<2x32xf32>
    %cst_280 = arith.constant 1.000000e+00 : f32
    %806 = vector.broadcast %cst_280 : f32 to vector<2x32xf32>
    %807 = arith.addf %806, %805 : vector<2x32xf32>
    %cst_281 = arith.constant 1.000000e+00 : f32
    %808 = vector.broadcast %cst_281 : f32 to vector<2x32xf32>
    %809 = arith.divf %808, %807 : vector<2x32xf32>
    %810 = vector.extract_strided_slice %801 {offsets = [0, 32], sizes = [2, 32], strides = [1, 1]} : vector<2x128xf32> to vector<2x32xf32>
    %cst_282 = arith.constant 0.000000e+00 : f32
    %811 = vector.broadcast %cst_282 : f32 to vector<2x32xf32>
    %812 = arith.subf %811, %810 : vector<2x32xf32>
    %813 = math.exp %812 : vector<2x32xf32>
    %cst_283 = arith.constant 1.000000e+00 : f32
    %814 = vector.broadcast %cst_283 : f32 to vector<2x32xf32>
    %815 = arith.addf %814, %813 : vector<2x32xf32>
    %cst_284 = arith.constant 1.000000e+00 : f32
    %816 = vector.broadcast %cst_284 : f32 to vector<2x32xf32>
    %817 = arith.divf %816, %815 : vector<2x32xf32>
    %818 = vector.extract_strided_slice %801 {offsets = [0, 64], sizes = [2, 32], strides = [1, 1]} : vector<2x128xf32> to vector<2x32xf32>
    %819 = math.tanh %818 : vector<2x32xf32>
    %820 = vector.extract_strided_slice %801 {offsets = [0, 96], sizes = [2, 32], strides = [1, 1]} : vector<2x128xf32> to vector<2x32xf32>
    %cst_285 = arith.constant 0.000000e+00 : f32
    %821 = vector.broadcast %cst_285 : f32 to vector<2x32xf32>
    %822 = arith.subf %821, %820 : vector<2x32xf32>
    %823 = math.exp %822 : vector<2x32xf32>
    %cst_286 = arith.constant 1.000000e+00 : f32
    %824 = vector.broadcast %cst_286 : f32 to vector<2x32xf32>
    %825 = arith.addf %824, %823 : vector<2x32xf32>
    %cst_287 = arith.constant 1.000000e+00 : f32
    %826 = vector.broadcast %cst_287 : f32 to vector<2x32xf32>
    %827 = arith.divf %826, %825 : vector<2x32xf32>
    %828 = arith.mulf %817, %797 : vector<2x32xf32>
    %829 = arith.mulf %809, %819 : vector<2x32xf32>
    %830 = arith.addf %828, %829 : vector<2x32xf32>
    %831 = math.tanh %830 : vector<2x32xf32>
    %832 = arith.mulf %827, %831 : vector<2x32xf32>
    %cst_288 = arith.constant dense<0.000000e+00> : vector<2x128xf32>
    %833 = tpu.matmul %832, %8, %cst_288 {dimension_numbers = #tpu.dot_dimension_numbers<[1], [0], [0], [1], [0, 0, 1, 1], [], []>} : vector<2x32xf32>, vector<32x128xf32>, vector<2x128xf32> -> vector<2x128xf32>
    %834 = arith.addf %599, %833 : vector<2x128xf32>
    %835 = vector.extract_strided_slice %834 {offsets = [0, 0], sizes = [2, 32], strides = [1, 1]} : vector<2x128xf32> to vector<2x32xf32>
    %cst_289 = arith.constant 0.000000e+00 : f32
    %836 = vector.broadcast %cst_289 : f32 to vector<2x32xf32>
    %837 = arith.subf %836, %835 : vector<2x32xf32>
    %838 = math.exp %837 : vector<2x32xf32>
    %cst_290 = arith.constant 1.000000e+00 : f32
    %839 = vector.broadcast %cst_290 : f32 to vector<2x32xf32>
    %840 = arith.addf %839, %838 : vector<2x32xf32>
    %cst_291 = arith.constant 1.000000e+00 : f32
    %841 = vector.broadcast %cst_291 : f32 to vector<2x32xf32>
    %842 = arith.divf %841, %840 : vector<2x32xf32>
    %843 = vector.extract_strided_slice %834 {offsets = [0, 32], sizes = [2, 32], strides = [1, 1]} : vector<2x128xf32> to vector<2x32xf32>
    %cst_292 = arith.constant 0.000000e+00 : f32
    %844 = vector.broadcast %cst_292 : f32 to vector<2x32xf32>
    %845 = arith.subf %844, %843 : vector<2x32xf32>
    %846 = math.exp %845 : vector<2x32xf32>
    %cst_293 = arith.constant 1.000000e+00 : f32
    %847 = vector.broadcast %cst_293 : f32 to vector<2x32xf32>
    %848 = arith.addf %847, %846 : vector<2x32xf32>
    %cst_294 = arith.constant 1.000000e+00 : f32
    %849 = vector.broadcast %cst_294 : f32 to vector<2x32xf32>
    %850 = arith.divf %849, %848 : vector<2x32xf32>
    %851 = vector.extract_strided_slice %834 {offsets = [0, 64], sizes = [2, 32], strides = [1, 1]} : vector<2x128xf32> to vector<2x32xf32>
    %852 = math.tanh %851 : vector<2x32xf32>
    %853 = vector.extract_strided_slice %834 {offsets = [0, 96], sizes = [2, 32], strides = [1, 1]} : vector<2x128xf32> to vector<2x32xf32>
    %cst_295 = arith.constant 0.000000e+00 : f32
    %854 = vector.broadcast %cst_295 : f32 to vector<2x32xf32>
    %855 = arith.subf %854, %853 : vector<2x32xf32>
    %856 = math.exp %855 : vector<2x32xf32>
    %cst_296 = arith.constant 1.000000e+00 : f32
    %857 = vector.broadcast %cst_296 : f32 to vector<2x32xf32>
    %858 = arith.addf %857, %856 : vector<2x32xf32>
    %cst_297 = arith.constant 1.000000e+00 : f32
    %859 = vector.broadcast %cst_297 : f32 to vector<2x32xf32>
    %860 = arith.divf %859, %858 : vector<2x32xf32>
    %861 = arith.mulf %850, %830 : vector<2x32xf32>
    %862 = arith.mulf %842, %852 : vector<2x32xf32>
    %863 = arith.addf %861, %862 : vector<2x32xf32>
    %864 = math.tanh %863 : vector<2x32xf32>
    %865 = arith.mulf %860, %864 : vector<2x32xf32>
    %cst_298 = arith.constant dense<0.000000e+00> : vector<2x128xf32>
    %866 = tpu.matmul %634, %10, %cst_298 {dimension_numbers = #tpu.dot_dimension_numbers<[1], [0], [0], [1], [0, 0, 1, 1], [], []>} : vector<2x32xf32>, vector<32x128xf32>, vector<2x128xf32> -> vector<2x128xf32>
    %867 = vector.broadcast %12 : vector<1x128xf32> to vector<2x128xf32>
    %868 = arith.addf %866, %867 : vector<2x128xf32>
    %cst_299 = arith.constant dense<0.000000e+00> : vector<2x128xf32>
    %869 = tpu.matmul %667, %10, %cst_299 {dimension_numbers = #tpu.dot_dimension_numbers<[1], [0], [0], [1], [0, 0, 1, 1], [], []>} : vector<2x32xf32>, vector<32x128xf32>, vector<2x128xf32> -> vector<2x128xf32>
    %870 = vector.broadcast %12 : vector<1x128xf32> to vector<2x128xf32>
    %871 = arith.addf %869, %870 : vector<2x128xf32>
    %cst_300 = arith.constant dense<0.000000e+00> : vector<2x128xf32>
    %872 = tpu.matmul %700, %10, %cst_300 {dimension_numbers = #tpu.dot_dimension_numbers<[1], [0], [0], [1], [0, 0, 1, 1], [], []>} : vector<2x32xf32>, vector<32x128xf32>, vector<2x128xf32> -> vector<2x128xf32>
    %873 = vector.broadcast %12 : vector<1x128xf32> to vector<2x128xf32>
    %874 = arith.addf %872, %873 : vector<2x128xf32>
    %cst_301 = arith.constant dense<0.000000e+00> : vector<2x128xf32>
    %875 = tpu.matmul %733, %10, %cst_301 {dimension_numbers = #tpu.dot_dimension_numbers<[1], [0], [0], [1], [0, 0, 1, 1], [], []>} : vector<2x32xf32>, vector<32x128xf32>, vector<2x128xf32> -> vector<2x128xf32>
    %876 = vector.broadcast %12 : vector<1x128xf32> to vector<2x128xf32>
    %877 = arith.addf %875, %876 : vector<2x128xf32>
    %cst_302 = arith.constant dense<0.000000e+00> : vector<2x128xf32>
    %878 = tpu.matmul %766, %10, %cst_302 {dimension_numbers = #tpu.dot_dimension_numbers<[1], [0], [0], [1], [0, 0, 1, 1], [], []>} : vector<2x32xf32>, vector<32x128xf32>, vector<2x128xf32> -> vector<2x128xf32>
    %879 = vector.broadcast %12 : vector<1x128xf32> to vector<2x128xf32>
    %880 = arith.addf %878, %879 : vector<2x128xf32>
    %cst_303 = arith.constant dense<0.000000e+00> : vector<2x128xf32>
    %881 = tpu.matmul %799, %10, %cst_303 {dimension_numbers = #tpu.dot_dimension_numbers<[1], [0], [0], [1], [0, 0, 1, 1], [], []>} : vector<2x32xf32>, vector<32x128xf32>, vector<2x128xf32> -> vector<2x128xf32>
    %882 = vector.broadcast %12 : vector<1x128xf32> to vector<2x128xf32>
    %883 = arith.addf %881, %882 : vector<2x128xf32>
    %cst_304 = arith.constant dense<0.000000e+00> : vector<2x128xf32>
    %884 = tpu.matmul %832, %10, %cst_304 {dimension_numbers = #tpu.dot_dimension_numbers<[1], [0], [0], [1], [0, 0, 1, 1], [], []>} : vector<2x32xf32>, vector<32x128xf32>, vector<2x128xf32> -> vector<2x128xf32>
    %885 = vector.broadcast %12 : vector<1x128xf32> to vector<2x128xf32>
    %886 = arith.addf %884, %885 : vector<2x128xf32>
    %cst_305 = arith.constant dense<0.000000e+00> : vector<2x128xf32>
    %887 = tpu.matmul %865, %10, %cst_305 {dimension_numbers = #tpu.dot_dimension_numbers<[1], [0], [0], [1], [0, 0, 1, 1], [], []>} : vector<2x32xf32>, vector<32x128xf32>, vector<2x128xf32> -> vector<2x128xf32>
    %888 = vector.broadcast %12 : vector<1x128xf32> to vector<2x128xf32>
    %889 = arith.addf %887, %888 : vector<2x128xf32>
    %cst_306 = arith.constant 0.000000e+00 : f32
    %890 = vector.broadcast %cst_306 : f32 to vector<2x32xf32>
    %cst_307 = arith.constant 0.000000e+00 : f32
    %891 = vector.broadcast %cst_307 : f32 to vector<2x32xf32>
    %cst_308 = arith.constant dense<0.000000e+00> : vector<2x128xf32>
    %892 = tpu.matmul %890, %11, %cst_308 {dimension_numbers = #tpu.dot_dimension_numbers<[1], [0], [0], [1], [0, 0, 1, 1], [], []>} : vector<2x32xf32>, vector<32x128xf32>, vector<2x128xf32> -> vector<2x128xf32>
    %893 = arith.addf %868, %892 : vector<2x128xf32>
    %894 = vector.extract_strided_slice %893 {offsets = [0, 0], sizes = [2, 32], strides = [1, 1]} : vector<2x128xf32> to vector<2x32xf32>
    %cst_309 = arith.constant 0.000000e+00 : f32
    %895 = vector.broadcast %cst_309 : f32 to vector<2x32xf32>
    %896 = arith.subf %895, %894 : vector<2x32xf32>
    %897 = math.exp %896 : vector<2x32xf32>
    %cst_310 = arith.constant 1.000000e+00 : f32
    %898 = vector.broadcast %cst_310 : f32 to vector<2x32xf32>
    %899 = arith.addf %898, %897 : vector<2x32xf32>
    %cst_311 = arith.constant 1.000000e+00 : f32
    %900 = vector.broadcast %cst_311 : f32 to vector<2x32xf32>
    %901 = arith.divf %900, %899 : vector<2x32xf32>
    %902 = vector.extract_strided_slice %893 {offsets = [0, 32], sizes = [2, 32], strides = [1, 1]} : vector<2x128xf32> to vector<2x32xf32>
    %cst_312 = arith.constant 0.000000e+00 : f32
    %903 = vector.broadcast %cst_312 : f32 to vector<2x32xf32>
    %904 = arith.subf %903, %902 : vector<2x32xf32>
    %905 = math.exp %904 : vector<2x32xf32>
    %cst_313 = arith.constant 1.000000e+00 : f32
    %906 = vector.broadcast %cst_313 : f32 to vector<2x32xf32>
    %907 = arith.addf %906, %905 : vector<2x32xf32>
    %cst_314 = arith.constant 1.000000e+00 : f32
    %908 = vector.broadcast %cst_314 : f32 to vector<2x32xf32>
    %909 = arith.divf %908, %907 : vector<2x32xf32>
    %910 = vector.extract_strided_slice %893 {offsets = [0, 64], sizes = [2, 32], strides = [1, 1]} : vector<2x128xf32> to vector<2x32xf32>
    %911 = math.tanh %910 : vector<2x32xf32>
    %912 = vector.extract_strided_slice %893 {offsets = [0, 96], sizes = [2, 32], strides = [1, 1]} : vector<2x128xf32> to vector<2x32xf32>
    %cst_315 = arith.constant 0.000000e+00 : f32
    %913 = vector.broadcast %cst_315 : f32 to vector<2x32xf32>
    %914 = arith.subf %913, %912 : vector<2x32xf32>
    %915 = math.exp %914 : vector<2x32xf32>
    %cst_316 = arith.constant 1.000000e+00 : f32
    %916 = vector.broadcast %cst_316 : f32 to vector<2x32xf32>
    %917 = arith.addf %916, %915 : vector<2x32xf32>
    %cst_317 = arith.constant 1.000000e+00 : f32
    %918 = vector.broadcast %cst_317 : f32 to vector<2x32xf32>
    %919 = arith.divf %918, %917 : vector<2x32xf32>
    %920 = arith.mulf %909, %891 : vector<2x32xf32>
    %921 = arith.mulf %901, %911 : vector<2x32xf32>
    %922 = arith.addf %920, %921 : vector<2x32xf32>
    %923 = math.tanh %922 : vector<2x32xf32>
    %924 = arith.mulf %919, %923 : vector<2x32xf32>
    %cst_318 = arith.constant dense<0.000000e+00> : vector<2x128xf32>
    %925 = tpu.matmul %924, %11, %cst_318 {dimension_numbers = #tpu.dot_dimension_numbers<[1], [0], [0], [1], [0, 0, 1, 1], [], []>} : vector<2x32xf32>, vector<32x128xf32>, vector<2x128xf32> -> vector<2x128xf32>
    %926 = arith.addf %871, %925 : vector<2x128xf32>
    %927 = vector.extract_strided_slice %926 {offsets = [0, 0], sizes = [2, 32], strides = [1, 1]} : vector<2x128xf32> to vector<2x32xf32>
    %cst_319 = arith.constant 0.000000e+00 : f32
    %928 = vector.broadcast %cst_319 : f32 to vector<2x32xf32>
    %929 = arith.subf %928, %927 : vector<2x32xf32>
    %930 = math.exp %929 : vector<2x32xf32>
    %cst_320 = arith.constant 1.000000e+00 : f32
    %931 = vector.broadcast %cst_320 : f32 to vector<2x32xf32>
    %932 = arith.addf %931, %930 : vector<2x32xf32>
    %cst_321 = arith.constant 1.000000e+00 : f32
    %933 = vector.broadcast %cst_321 : f32 to vector<2x32xf32>
    %934 = arith.divf %933, %932 : vector<2x32xf32>
    %935 = vector.extract_strided_slice %926 {offsets = [0, 32], sizes = [2, 32], strides = [1, 1]} : vector<2x128xf32> to vector<2x32xf32>
    %cst_322 = arith.constant 0.000000e+00 : f32
    %936 = vector.broadcast %cst_322 : f32 to vector<2x32xf32>
    %937 = arith.subf %936, %935 : vector<2x32xf32>
    %938 = math.exp %937 : vector<2x32xf32>
    %cst_323 = arith.constant 1.000000e+00 : f32
    %939 = vector.broadcast %cst_323 : f32 to vector<2x32xf32>
    %940 = arith.addf %939, %938 : vector<2x32xf32>
    %cst_324 = arith.constant 1.000000e+00 : f32
    %941 = vector.broadcast %cst_324 : f32 to vector<2x32xf32>
    %942 = arith.divf %941, %940 : vector<2x32xf32>
    %943 = vector.extract_strided_slice %926 {offsets = [0, 64], sizes = [2, 32], strides = [1, 1]} : vector<2x128xf32> to vector<2x32xf32>
    %944 = math.tanh %943 : vector<2x32xf32>
    %945 = vector.extract_strided_slice %926 {offsets = [0, 96], sizes = [2, 32], strides = [1, 1]} : vector<2x128xf32> to vector<2x32xf32>
    %cst_325 = arith.constant 0.000000e+00 : f32
    %946 = vector.broadcast %cst_325 : f32 to vector<2x32xf32>
    %947 = arith.subf %946, %945 : vector<2x32xf32>
    %948 = math.exp %947 : vector<2x32xf32>
    %cst_326 = arith.constant 1.000000e+00 : f32
    %949 = vector.broadcast %cst_326 : f32 to vector<2x32xf32>
    %950 = arith.addf %949, %948 : vector<2x32xf32>
    %cst_327 = arith.constant 1.000000e+00 : f32
    %951 = vector.broadcast %cst_327 : f32 to vector<2x32xf32>
    %952 = arith.divf %951, %950 : vector<2x32xf32>
    %953 = arith.mulf %942, %922 : vector<2x32xf32>
    %954 = arith.mulf %934, %944 : vector<2x32xf32>
    %955 = arith.addf %953, %954 : vector<2x32xf32>
    %956 = math.tanh %955 : vector<2x32xf32>
    %957 = arith.mulf %952, %956 : vector<2x32xf32>
    %cst_328 = arith.constant dense<0.000000e+00> : vector<2x128xf32>
    %958 = tpu.matmul %957, %11, %cst_328 {dimension_numbers = #tpu.dot_dimension_numbers<[1], [0], [0], [1], [0, 0, 1, 1], [], []>} : vector<2x32xf32>, vector<32x128xf32>, vector<2x128xf32> -> vector<2x128xf32>
    %959 = arith.addf %874, %958 : vector<2x128xf32>
    %960 = vector.extract_strided_slice %959 {offsets = [0, 0], sizes = [2, 32], strides = [1, 1]} : vector<2x128xf32> to vector<2x32xf32>
    %cst_329 = arith.constant 0.000000e+00 : f32
    %961 = vector.broadcast %cst_329 : f32 to vector<2x32xf32>
    %962 = arith.subf %961, %960 : vector<2x32xf32>
    %963 = math.exp %962 : vector<2x32xf32>
    %cst_330 = arith.constant 1.000000e+00 : f32
    %964 = vector.broadcast %cst_330 : f32 to vector<2x32xf32>
    %965 = arith.addf %964, %963 : vector<2x32xf32>
    %cst_331 = arith.constant 1.000000e+00 : f32
    %966 = vector.broadcast %cst_331 : f32 to vector<2x32xf32>
    %967 = arith.divf %966, %965 : vector<2x32xf32>
    %968 = vector.extract_strided_slice %959 {offsets = [0, 32], sizes = [2, 32], strides = [1, 1]} : vector<2x128xf32> to vector<2x32xf32>
    %cst_332 = arith.constant 0.000000e+00 : f32
    %969 = vector.broadcast %cst_332 : f32 to vector<2x32xf32>
    %970 = arith.subf %969, %968 : vector<2x32xf32>
    %971 = math.exp %970 : vector<2x32xf32>
    %cst_333 = arith.constant 1.000000e+00 : f32
    %972 = vector.broadcast %cst_333 : f32 to vector<2x32xf32>
    %973 = arith.addf %972, %971 : vector<2x32xf32>
    %cst_334 = arith.constant 1.000000e+00 : f32
    %974 = vector.broadcast %cst_334 : f32 to vector<2x32xf32>
    %975 = arith.divf %974, %973 : vector<2x32xf32>
    %976 = vector.extract_strided_slice %959 {offsets = [0, 64], sizes = [2, 32], strides = [1, 1]} : vector<2x128xf32> to vector<2x32xf32>
    %977 = math.tanh %976 : vector<2x32xf32>
    %978 = vector.extract_strided_slice %959 {offsets = [0, 96], sizes = [2, 32], strides = [1, 1]} : vector<2x128xf32> to vector<2x32xf32>
    %cst_335 = arith.constant 0.000000e+00 : f32
    %979 = vector.broadcast %cst_335 : f32 to vector<2x32xf32>
    %980 = arith.subf %979, %978 : vector<2x32xf32>
    %981 = math.exp %980 : vector<2x32xf32>
    %cst_336 = arith.constant 1.000000e+00 : f32
    %982 = vector.broadcast %cst_336 : f32 to vector<2x32xf32>
    %983 = arith.addf %982, %981 : vector<2x32xf32>
    %cst_337 = arith.constant 1.000000e+00 : f32
    %984 = vector.broadcast %cst_337 : f32 to vector<2x32xf32>
    %985 = arith.divf %984, %983 : vector<2x32xf32>
    %986 = arith.mulf %975, %955 : vector<2x32xf32>
    %987 = arith.mulf %967, %977 : vector<2x32xf32>
    %988 = arith.addf %986, %987 : vector<2x32xf32>
    %989 = math.tanh %988 : vector<2x32xf32>
    %990 = arith.mulf %985, %989 : vector<2x32xf32>
    %cst_338 = arith.constant dense<0.000000e+00> : vector<2x128xf32>
    %991 = tpu.matmul %990, %11, %cst_338 {dimension_numbers = #tpu.dot_dimension_numbers<[1], [0], [0], [1], [0, 0, 1, 1], [], []>} : vector<2x32xf32>, vector<32x128xf32>, vector<2x128xf32> -> vector<2x128xf32>
    %992 = arith.addf %877, %991 : vector<2x128xf32>
    %993 = vector.extract_strided_slice %992 {offsets = [0, 0], sizes = [2, 32], strides = [1, 1]} : vector<2x128xf32> to vector<2x32xf32>
    %cst_339 = arith.constant 0.000000e+00 : f32
    %994 = vector.broadcast %cst_339 : f32 to vector<2x32xf32>
    %995 = arith.subf %994, %993 : vector<2x32xf32>
    %996 = math.exp %995 : vector<2x32xf32>
    %cst_340 = arith.constant 1.000000e+00 : f32
    %997 = vector.broadcast %cst_340 : f32 to vector<2x32xf32>
    %998 = arith.addf %997, %996 : vector<2x32xf32>
    %cst_341 = arith.constant 1.000000e+00 : f32
    %999 = vector.broadcast %cst_341 : f32 to vector<2x32xf32>
    %1000 = arith.divf %999, %998 : vector<2x32xf32>
    %1001 = vector.extract_strided_slice %992 {offsets = [0, 32], sizes = [2, 32], strides = [1, 1]} : vector<2x128xf32> to vector<2x32xf32>
    %cst_342 = arith.constant 0.000000e+00 : f32
    %1002 = vector.broadcast %cst_342 : f32 to vector<2x32xf32>
    %1003 = arith.subf %1002, %1001 : vector<2x32xf32>
    %1004 = math.exp %1003 : vector<2x32xf32>
    %cst_343 = arith.constant 1.000000e+00 : f32
    %1005 = vector.broadcast %cst_343 : f32 to vector<2x32xf32>
    %1006 = arith.addf %1005, %1004 : vector<2x32xf32>
    %cst_344 = arith.constant 1.000000e+00 : f32
    %1007 = vector.broadcast %cst_344 : f32 to vector<2x32xf32>
    %1008 = arith.divf %1007, %1006 : vector<2x32xf32>
    %1009 = vector.extract_strided_slice %992 {offsets = [0, 64], sizes = [2, 32], strides = [1, 1]} : vector<2x128xf32> to vector<2x32xf32>
    %1010 = math.tanh %1009 : vector<2x32xf32>
    %1011 = vector.extract_strided_slice %992 {offsets = [0, 96], sizes = [2, 32], strides = [1, 1]} : vector<2x128xf32> to vector<2x32xf32>
    %cst_345 = arith.constant 0.000000e+00 : f32
    %1012 = vector.broadcast %cst_345 : f32 to vector<2x32xf32>
    %1013 = arith.subf %1012, %1011 : vector<2x32xf32>
    %1014 = math.exp %1013 : vector<2x32xf32>
    %cst_346 = arith.constant 1.000000e+00 : f32
    %1015 = vector.broadcast %cst_346 : f32 to vector<2x32xf32>
    %1016 = arith.addf %1015, %1014 : vector<2x32xf32>
    %cst_347 = arith.constant 1.000000e+00 : f32
    %1017 = vector.broadcast %cst_347 : f32 to vector<2x32xf32>
    %1018 = arith.divf %1017, %1016 : vector<2x32xf32>
    %1019 = arith.mulf %1008, %988 : vector<2x32xf32>
    %1020 = arith.mulf %1000, %1010 : vector<2x32xf32>
    %1021 = arith.addf %1019, %1020 : vector<2x32xf32>
    %1022 = math.tanh %1021 : vector<2x32xf32>
    %1023 = arith.mulf %1018, %1022 : vector<2x32xf32>
    %cst_348 = arith.constant dense<0.000000e+00> : vector<2x128xf32>
    %1024 = tpu.matmul %1023, %11, %cst_348 {dimension_numbers = #tpu.dot_dimension_numbers<[1], [0], [0], [1], [0, 0, 1, 1], [], []>} : vector<2x32xf32>, vector<32x128xf32>, vector<2x128xf32> -> vector<2x128xf32>
    %1025 = arith.addf %880, %1024 : vector<2x128xf32>
    %1026 = vector.extract_strided_slice %1025 {offsets = [0, 0], sizes = [2, 32], strides = [1, 1]} : vector<2x128xf32> to vector<2x32xf32>
    %cst_349 = arith.constant 0.000000e+00 : f32
    %1027 = vector.broadcast %cst_349 : f32 to vector<2x32xf32>
    %1028 = arith.subf %1027, %1026 : vector<2x32xf32>
    %1029 = math.exp %1028 : vector<2x32xf32>
    %cst_350 = arith.constant 1.000000e+00 : f32
    %1030 = vector.broadcast %cst_350 : f32 to vector<2x32xf32>
    %1031 = arith.addf %1030, %1029 : vector<2x32xf32>
    %cst_351 = arith.constant 1.000000e+00 : f32
    %1032 = vector.broadcast %cst_351 : f32 to vector<2x32xf32>
    %1033 = arith.divf %1032, %1031 : vector<2x32xf32>
    %1034 = vector.extract_strided_slice %1025 {offsets = [0, 32], sizes = [2, 32], strides = [1, 1]} : vector<2x128xf32> to vector<2x32xf32>
    %cst_352 = arith.constant 0.000000e+00 : f32
    %1035 = vector.broadcast %cst_352 : f32 to vector<2x32xf32>
    %1036 = arith.subf %1035, %1034 : vector<2x32xf32>
    %1037 = math.exp %1036 : vector<2x32xf32>
    %cst_353 = arith.constant 1.000000e+00 : f32
    %1038 = vector.broadcast %cst_353 : f32 to vector<2x32xf32>
    %1039 = arith.addf %1038, %1037 : vector<2x32xf32>
    %cst_354 = arith.constant 1.000000e+00 : f32
    %1040 = vector.broadcast %cst_354 : f32 to vector<2x32xf32>
    %1041 = arith.divf %1040, %1039 : vector<2x32xf32>
    %1042 = vector.extract_strided_slice %1025 {offsets = [0, 64], sizes = [2, 32], strides = [1, 1]} : vector<2x128xf32> to vector<2x32xf32>
    %1043 = math.tanh %1042 : vector<2x32xf32>
    %1044 = vector.extract_strided_slice %1025 {offsets = [0, 96], sizes = [2, 32], strides = [1, 1]} : vector<2x128xf32> to vector<2x32xf32>
    %cst_355 = arith.constant 0.000000e+00 : f32
    %1045 = vector.broadcast %cst_355 : f32 to vector<2x32xf32>
    %1046 = arith.subf %1045, %1044 : vector<2x32xf32>
    %1047 = math.exp %1046 : vector<2x32xf32>
    %cst_356 = arith.constant 1.000000e+00 : f32
    %1048 = vector.broadcast %cst_356 : f32 to vector<2x32xf32>
    %1049 = arith.addf %1048, %1047 : vector<2x32xf32>
    %cst_357 = arith.constant 1.000000e+00 : f32
    %1050 = vector.broadcast %cst_357 : f32 to vector<2x32xf32>
    %1051 = arith.divf %1050, %1049 : vector<2x32xf32>
    %1052 = arith.mulf %1041, %1021 : vector<2x32xf32>
    %1053 = arith.mulf %1033, %1043 : vector<2x32xf32>
    %1054 = arith.addf %1052, %1053 : vector<2x32xf32>
    %1055 = math.tanh %1054 : vector<2x32xf32>
    %1056 = arith.mulf %1051, %1055 : vector<2x32xf32>
    %cst_358 = arith.constant dense<0.000000e+00> : vector<2x128xf32>
    %1057 = tpu.matmul %1056, %11, %cst_358 {dimension_numbers = #tpu.dot_dimension_numbers<[1], [0], [0], [1], [0, 0, 1, 1], [], []>} : vector<2x32xf32>, vector<32x128xf32>, vector<2x128xf32> -> vector<2x128xf32>
    %1058 = arith.addf %883, %1057 : vector<2x128xf32>
    %1059 = vector.extract_strided_slice %1058 {offsets = [0, 0], sizes = [2, 32], strides = [1, 1]} : vector<2x128xf32> to vector<2x32xf32>
    %cst_359 = arith.constant 0.000000e+00 : f32
    %1060 = vector.broadcast %cst_359 : f32 to vector<2x32xf32>
    %1061 = arith.subf %1060, %1059 : vector<2x32xf32>
    %1062 = math.exp %1061 : vector<2x32xf32>
    %cst_360 = arith.constant 1.000000e+00 : f32
    %1063 = vector.broadcast %cst_360 : f32 to vector<2x32xf32>
    %1064 = arith.addf %1063, %1062 : vector<2x32xf32>
    %cst_361 = arith.constant 1.000000e+00 : f32
    %1065 = vector.broadcast %cst_361 : f32 to vector<2x32xf32>
    %1066 = arith.divf %1065, %1064 : vector<2x32xf32>
    %1067 = vector.extract_strided_slice %1058 {offsets = [0, 32], sizes = [2, 32], strides = [1, 1]} : vector<2x128xf32> to vector<2x32xf32>
    %cst_362 = arith.constant 0.000000e+00 : f32
    %1068 = vector.broadcast %cst_362 : f32 to vector<2x32xf32>
    %1069 = arith.subf %1068, %1067 : vector<2x32xf32>
    %1070 = math.exp %1069 : vector<2x32xf32>
    %cst_363 = arith.constant 1.000000e+00 : f32
    %1071 = vector.broadcast %cst_363 : f32 to vector<2x32xf32>
    %1072 = arith.addf %1071, %1070 : vector<2x32xf32>
    %cst_364 = arith.constant 1.000000e+00 : f32
    %1073 = vector.broadcast %cst_364 : f32 to vector<2x32xf32>
    %1074 = arith.divf %1073, %1072 : vector<2x32xf32>
    %1075 = vector.extract_strided_slice %1058 {offsets = [0, 64], sizes = [2, 32], strides = [1, 1]} : vector<2x128xf32> to vector<2x32xf32>
    %1076 = math.tanh %1075 : vector<2x32xf32>
    %1077 = vector.extract_strided_slice %1058 {offsets = [0, 96], sizes = [2, 32], strides = [1, 1]} : vector<2x128xf32> to vector<2x32xf32>
    %cst_365 = arith.constant 0.000000e+00 : f32
    %1078 = vector.broadcast %cst_365 : f32 to vector<2x32xf32>
    %1079 = arith.subf %1078, %1077 : vector<2x32xf32>
    %1080 = math.exp %1079 : vector<2x32xf32>
    %cst_366 = arith.constant 1.000000e+00 : f32
    %1081 = vector.broadcast %cst_366 : f32 to vector<2x32xf32>
    %1082 = arith.addf %1081, %1080 : vector<2x32xf32>
    %cst_367 = arith.constant 1.000000e+00 : f32
    %1083 = vector.broadcast %cst_367 : f32 to vector<2x32xf32>
    %1084 = arith.divf %1083, %1082 : vector<2x32xf32>
    %1085 = arith.mulf %1074, %1054 : vector<2x32xf32>
    %1086 = arith.mulf %1066, %1076 : vector<2x32xf32>
    %1087 = arith.addf %1085, %1086 : vector<2x32xf32>
    %1088 = math.tanh %1087 : vector<2x32xf32>
    %1089 = arith.mulf %1084, %1088 : vector<2x32xf32>
    %cst_368 = arith.constant dense<0.000000e+00> : vector<2x128xf32>
    %1090 = tpu.matmul %1089, %11, %cst_368 {dimension_numbers = #tpu.dot_dimension_numbers<[1], [0], [0], [1], [0, 0, 1, 1], [], []>} : vector<2x32xf32>, vector<32x128xf32>, vector<2x128xf32> -> vector<2x128xf32>
    %1091 = arith.addf %886, %1090 : vector<2x128xf32>
    %1092 = vector.extract_strided_slice %1091 {offsets = [0, 0], sizes = [2, 32], strides = [1, 1]} : vector<2x128xf32> to vector<2x32xf32>
    %cst_369 = arith.constant 0.000000e+00 : f32
    %1093 = vector.broadcast %cst_369 : f32 to vector<2x32xf32>
    %1094 = arith.subf %1093, %1092 : vector<2x32xf32>
    %1095 = math.exp %1094 : vector<2x32xf32>
    %cst_370 = arith.constant 1.000000e+00 : f32
    %1096 = vector.broadcast %cst_370 : f32 to vector<2x32xf32>
    %1097 = arith.addf %1096, %1095 : vector<2x32xf32>
    %cst_371 = arith.constant 1.000000e+00 : f32
    %1098 = vector.broadcast %cst_371 : f32 to vector<2x32xf32>
    %1099 = arith.divf %1098, %1097 : vector<2x32xf32>
    %1100 = vector.extract_strided_slice %1091 {offsets = [0, 32], sizes = [2, 32], strides = [1, 1]} : vector<2x128xf32> to vector<2x32xf32>
    %cst_372 = arith.constant 0.000000e+00 : f32
    %1101 = vector.broadcast %cst_372 : f32 to vector<2x32xf32>
    %1102 = arith.subf %1101, %1100 : vector<2x32xf32>
    %1103 = math.exp %1102 : vector<2x32xf32>
    %cst_373 = arith.constant 1.000000e+00 : f32
    %1104 = vector.broadcast %cst_373 : f32 to vector<2x32xf32>
    %1105 = arith.addf %1104, %1103 : vector<2x32xf32>
    %cst_374 = arith.constant 1.000000e+00 : f32
    %1106 = vector.broadcast %cst_374 : f32 to vector<2x32xf32>
    %1107 = arith.divf %1106, %1105 : vector<2x32xf32>
    %1108 = vector.extract_strided_slice %1091 {offsets = [0, 64], sizes = [2, 32], strides = [1, 1]} : vector<2x128xf32> to vector<2x32xf32>
    %1109 = math.tanh %1108 : vector<2x32xf32>
    %1110 = vector.extract_strided_slice %1091 {offsets = [0, 96], sizes = [2, 32], strides = [1, 1]} : vector<2x128xf32> to vector<2x32xf32>
    %cst_375 = arith.constant 0.000000e+00 : f32
    %1111 = vector.broadcast %cst_375 : f32 to vector<2x32xf32>
    %1112 = arith.subf %1111, %1110 : vector<2x32xf32>
    %1113 = math.exp %1112 : vector<2x32xf32>
    %cst_376 = arith.constant 1.000000e+00 : f32
    %1114 = vector.broadcast %cst_376 : f32 to vector<2x32xf32>
    %1115 = arith.addf %1114, %1113 : vector<2x32xf32>
    %cst_377 = arith.constant 1.000000e+00 : f32
    %1116 = vector.broadcast %cst_377 : f32 to vector<2x32xf32>
    %1117 = arith.divf %1116, %1115 : vector<2x32xf32>
    %1118 = arith.mulf %1107, %1087 : vector<2x32xf32>
    %1119 = arith.mulf %1099, %1109 : vector<2x32xf32>
    %1120 = arith.addf %1118, %1119 : vector<2x32xf32>
    %1121 = math.tanh %1120 : vector<2x32xf32>
    %1122 = arith.mulf %1117, %1121 : vector<2x32xf32>
    %cst_378 = arith.constant dense<0.000000e+00> : vector<2x128xf32>
    %1123 = tpu.matmul %1122, %11, %cst_378 {dimension_numbers = #tpu.dot_dimension_numbers<[1], [0], [0], [1], [0, 0, 1, 1], [], []>} : vector<2x32xf32>, vector<32x128xf32>, vector<2x128xf32> -> vector<2x128xf32>
    %1124 = arith.addf %889, %1123 : vector<2x128xf32>
    %1125 = vector.extract_strided_slice %1124 {offsets = [0, 0], sizes = [2, 32], strides = [1, 1]} : vector<2x128xf32> to vector<2x32xf32>
    %cst_379 = arith.constant 0.000000e+00 : f32
    %1126 = vector.broadcast %cst_379 : f32 to vector<2x32xf32>
    %1127 = arith.subf %1126, %1125 : vector<2x32xf32>
    %1128 = math.exp %1127 : vector<2x32xf32>
    %cst_380 = arith.constant 1.000000e+00 : f32
    %1129 = vector.broadcast %cst_380 : f32 to vector<2x32xf32>
    %1130 = arith.addf %1129, %1128 : vector<2x32xf32>
    %cst_381 = arith.constant 1.000000e+00 : f32
    %1131 = vector.broadcast %cst_381 : f32 to vector<2x32xf32>
    %1132 = arith.divf %1131, %1130 : vector<2x32xf32>
    %1133 = vector.extract_strided_slice %1124 {offsets = [0, 32], sizes = [2, 32], strides = [1, 1]} : vector<2x128xf32> to vector<2x32xf32>
    %cst_382 = arith.constant 0.000000e+00 : f32
    %1134 = vector.broadcast %cst_382 : f32 to vector<2x32xf32>
    %1135 = arith.subf %1134, %1133 : vector<2x32xf32>
    %1136 = math.exp %1135 : vector<2x32xf32>
    %cst_383 = arith.constant 1.000000e+00 : f32
    %1137 = vector.broadcast %cst_383 : f32 to vector<2x32xf32>
    %1138 = arith.addf %1137, %1136 : vector<2x32xf32>
    %cst_384 = arith.constant 1.000000e+00 : f32
    %1139 = vector.broadcast %cst_384 : f32 to vector<2x32xf32>
    %1140 = arith.divf %1139, %1138 : vector<2x32xf32>
    %1141 = vector.extract_strided_slice %1124 {offsets = [0, 64], sizes = [2, 32], strides = [1, 1]} : vector<2x128xf32> to vector<2x32xf32>
    %1142 = math.tanh %1141 : vector<2x32xf32>
    %1143 = vector.extract_strided_slice %1124 {offsets = [0, 96], sizes = [2, 32], strides = [1, 1]} : vector<2x128xf32> to vector<2x32xf32>
    %cst_385 = arith.constant 0.000000e+00 : f32
    %1144 = vector.broadcast %cst_385 : f32 to vector<2x32xf32>
    %1145 = arith.subf %1144, %1143 : vector<2x32xf32>
    %1146 = math.exp %1145 : vector<2x32xf32>
    %cst_386 = arith.constant 1.000000e+00 : f32
    %1147 = vector.broadcast %cst_386 : f32 to vector<2x32xf32>
    %1148 = arith.addf %1147, %1146 : vector<2x32xf32>
    %cst_387 = arith.constant 1.000000e+00 : f32
    %1149 = vector.broadcast %cst_387 : f32 to vector<2x32xf32>
    %1150 = arith.divf %1149, %1148 : vector<2x32xf32>
    %1151 = arith.mulf %1140, %1120 : vector<2x32xf32>
    %1152 = arith.mulf %1132, %1142 : vector<2x32xf32>
    %1153 = arith.addf %1151, %1152 : vector<2x32xf32>
    %1154 = math.tanh %1153 : vector<2x32xf32>
    %1155 = arith.mulf %1150, %1154 : vector<2x32xf32>
    %1156 = vector.extract_strided_slice %13 {offsets = [0, 0], sizes = [32, 64], strides = [1, 1]} : vector<64x64xf32> to vector<32x64xf32>
    %cst_388 = arith.constant dense<0.000000e+00> : vector<2x64xf32>
    %1157 = tpu.matmul %298, %1156, %cst_388 {dimension_numbers = #tpu.dot_dimension_numbers<[1], [0], [0], [1], [0, 0, 1, 1], [], []>} : vector<2x32xf32>, vector<32x64xf32>, vector<2x64xf32> -> vector<2x64xf32>
    %1158 = vector.extract_strided_slice %13 {offsets = [32, 0], sizes = [32, 64], strides = [1, 1]} : vector<64x64xf32> to vector<32x64xf32>
    %cst_389 = arith.constant dense<0.000000e+00> : vector<2x64xf32>
    %1159 = tpu.matmul %588, %1158, %cst_389 {dimension_numbers = #tpu.dot_dimension_numbers<[1], [0], [0], [1], [0, 0, 1, 1], [], []>} : vector<2x32xf32>, vector<32x64xf32>, vector<2x64xf32> -> vector<2x64xf32>
    %1160 = arith.addf %1157, %1159 : vector<2x64xf32>
    %1161 = vector.broadcast %14 : vector<1x64xf32> to vector<2x64xf32>
    %1162 = arith.addf %1160, %1161 : vector<2x64xf32>
    %cst_390 = arith.constant 0.000000e+00 : f32
    %1163 = vector.broadcast %cst_390 : f32 to vector<2x64xf32>
    %1164 = arith.cmpf ogt, %1162, %1163 : vector<2x64xf32>
    %cst_391 = arith.constant 0.000000e+00 : f32
    %1165 = vector.broadcast %cst_391 : f32 to vector<2x64xf32>
    %1166 = arith.minimumf %1162, %1165 : vector<2x64xf32>
    %1167 = math.exp %1166 : vector<2x64xf32>
    %cst_392 = arith.constant 1.000000e+00 : f32
    %1168 = vector.broadcast %cst_392 : f32 to vector<2x64xf32>
    %1169 = arith.subf %1167, %1168 : vector<2x64xf32>
    %1170 = arith.select %1164, %1162, %1169 : vector<2x64xi1>, vector<2x64xf32>
    %cst_393 = arith.constant dense<0.000000e+00> : vector<2x1xf32>
    %1171 = tpu.matmul %1170, %15, %cst_393 {dimension_numbers = #tpu.dot_dimension_numbers<[1], [0], [0], [1], [0, 0, 1, 1], [], []>} : vector<2x64xf32>, vector<64x1xf32>, vector<2x1xf32> -> vector<2x1xf32>
    %1172 = vector.broadcast %16 : vector<1x1xf32> to vector<2x1xf32>
    %1173 = arith.addf %1171, %1172 : vector<2x1xf32>
    %1174 = vector.extract_strided_slice %17 {offsets = [0, 0], sizes = [32, 64], strides = [1, 1]} : vector<64x64xf32> to vector<32x64xf32>
    %cst_394 = arith.constant dense<0.000000e+00> : vector<2x64xf32>
    %1175 = tpu.matmul %865, %1174, %cst_394 {dimension_numbers = #tpu.dot_dimension_numbers<[1], [0], [0], [1], [0, 0, 1, 1], [], []>} : vector<2x32xf32>, vector<32x64xf32>, vector<2x64xf32> -> vector<2x64xf32>
    %1176 = vector.extract_strided_slice %17 {offsets = [32, 0], sizes = [32, 64], strides = [1, 1]} : vector<64x64xf32> to vector<32x64xf32>
    %cst_395 = arith.constant dense<0.000000e+00> : vector<2x64xf32>
    %1177 = tpu.matmul %1155, %1176, %cst_395 {dimension_numbers = #tpu.dot_dimension_numbers<[1], [0], [0], [1], [0, 0, 1, 1], [], []>} : vector<2x32xf32>, vector<32x64xf32>, vector<2x64xf32> -> vector<2x64xf32>
    %1178 = arith.addf %1175, %1177 : vector<2x64xf32>
    %1179 = vector.broadcast %18 : vector<1x64xf32> to vector<2x64xf32>
    %1180 = arith.addf %1178, %1179 : vector<2x64xf32>
    %cst_396 = arith.constant 0.000000e+00 : f32
    %1181 = vector.broadcast %cst_396 : f32 to vector<2x64xf32>
    %1182 = arith.cmpf ogt, %1180, %1181 : vector<2x64xf32>
    %cst_397 = arith.constant 0.000000e+00 : f32
    %1183 = vector.broadcast %cst_397 : f32 to vector<2x64xf32>
    %1184 = arith.minimumf %1180, %1183 : vector<2x64xf32>
    %1185 = math.exp %1184 : vector<2x64xf32>
    %cst_398 = arith.constant 1.000000e+00 : f32
    %1186 = vector.broadcast %cst_398 : f32 to vector<2x64xf32>
    %1187 = arith.subf %1185, %1186 : vector<2x64xf32>
    %1188 = arith.select %1182, %1180, %1187 : vector<2x64xi1>, vector<2x64xf32>
    %cst_399 = arith.constant dense<0.000000e+00> : vector<2x1xf32>
    %1189 = tpu.matmul %1188, %19, %cst_399 {dimension_numbers = #tpu.dot_dimension_numbers<[1], [0], [0], [1], [0, 0, 1, 1], [], []>} : vector<2x64xf32>, vector<64x1xf32>, vector<2x1xf32> -> vector<2x1xf32>
    %1190 = vector.broadcast %20 : vector<1x1xf32> to vector<2x1xf32>
    %1191 = arith.addf %1189, %1190 : vector<2x1xf32>
    %cst_400 = arith.constant 0.000000e+00 : f32
    %1192 = vector.broadcast %cst_400 : f32 to vector<1x1xf32>
    %1193 = arith.subf %1192, %21 : vector<1x1xf32>
    %1194 = math.exp %1193 : vector<1x1xf32>
    %cst_401 = arith.constant 1.000000e+00 : f32
    %1195 = vector.broadcast %cst_401 : f32 to vector<1x1xf32>
    %1196 = arith.addf %1195, %1194 : vector<1x1xf32>
    %cst_402 = arith.constant 1.000000e+00 : f32
    %1197 = vector.broadcast %cst_402 : f32 to vector<1x1xf32>
    %1198 = arith.divf %1197, %1196 : vector<1x1xf32>
    %1199 = vector.broadcast %1198 : vector<1x1xf32> to vector<2x1xf32>
    %1200 = arith.mulf %1199, %1173 : vector<2x1xf32>
    %cst_403 = arith.constant 1.000000e+00 : f32
    %1201 = vector.broadcast %cst_403 : f32 to vector<1x1xf32>
    %1202 = arith.subf %1201, %1198 : vector<1x1xf32>
    %1203 = vector.broadcast %1202 : vector<1x1xf32> to vector<2x1xf32>
    %1204 = arith.mulf %1203, %1191 : vector<2x1xf32>
    %1205 = arith.addf %1200, %1204 : vector<2x1xf32>
    %c0_404 = arith.constant 0 : index
    %c0_405 = arith.constant 0 : index
    %1206 = vector.load %arg22[%c0_404, %c0_405] : memref<2x1xf32, #tpu.memory_space<vmem>>, vector<2x1xf32>
    tpu.vector_store %arg22[%c0_404, %c0_405], %1205 {strides = array<i32>} : memref<2x1xf32, #tpu.memory_space<vmem>>, vector<2x1xf32>,
    return
  }
}

</mosaic_0001>

<bundles_post_ra>
// kernel: boost_rnn_forward.1
= control target key start
LH: loop header
LB: loop body
LE: loop exit
PB: predicated region body
PF: predicated region fallthrough
CT: control target
= control target key end

     0   :  { %s4358_s0 = inlined_call_operand.vmem [shape: f32[16,16], index: 0, kind: input, shape index: {}]   ;;  %s4359_s1 = inlined_call_operand.hbm [shape: f32[16,128], index: 1, kind: input, shape index: {}]   ;;  %s4360_s2 = inlined_call_operand.vmem [shape: f32[32,128], index: 2, kind: input, shape index: {}]   ;;  %s4361_s3 = inlined_call_operand.vmem [shape: f32[1,128], index: 3, kind: input, shape index: {}]   ;;  %s4362_s4 = inlined_call_operand.hbm [shape: f32[32,128], index: 4, kind: input, shape index: {}]   ;;  %s4363_s5 = inlined_call_operand.hbm [shape: f32[32,128], index: 5, kind: input, shape index: {}]   ;;  %s4364_s6 = inlined_call_operand.vmem [shape: f32[1,128], index: 6, kind: input, shape index: {}]   ;;  %s4365_s7 = inlined_call_operand.hbm [shape: f32[16,128], index: 7, kind: input, shape index: {}]   ;;  %s4366_s8 = inlined_call_operand.hbm [shape: f32[32,128], index: 8, kind: input, shape index: {}]   ;;  %s4367_s9 = inlined_call_operand.vmem [shape: f32[1,128], index: 9, kind: input, shape index: {}]   ;;  %s4368_s10 = inlined_call_operand.hbm [shape: f32[32,128], index: 10, kind: input, shape index: {}]   ;;  %s4369_s11 = inlined_call_operand.hbm [shape: f32[32,128], index: 11, kind: input, shape index: {}]   ;;  %s4370_s12 = inlined_call_operand.vmem [shape: f32[1,128], index: 12, kind: input, shape index: {}]   ;;  %s4371_s13 = inlined_call_operand.vmem [shape: f32[64,64], index: 13, kind: input, shape index: {}]   ;;  %s4372_s14 = inlined_call_operand.vmem [shape: f32[1,64], index: 14, kind: input, shape index: {}]   ;;  %s4373_s15 = inlined_call_operand.vmem [shape: f32[64,1], index: 15, kind: input, shape index: {}]   ;;  %s4374_s16 = inlined_call_operand.<no memory space> [shape: f32[1,1], index: 16, kind: input, shape index: {}]   ;;  %s4375_s17 = inlined_call_operand.vmem [shape: f32[64,64], index: 17, kind: input, shape index: {}]   ;;  %s4376_s18 = inlined_call_operand.vmem [shape: f32[1,64], index: 18, kind: input, shape index: {}]   ;;  %s4377_s19 = inlined_call_operand.vmem [shape: f32[64,1], index: 19, kind: input, shape index: {}]   ;;  %s4378_s22 = inlined_call_operand.vmem [shape: f32[2,1], index: 22, kind: output, shape index: {}]   ;;  %s4379_s20 = inlined_call_operand.<no memory space> [shape: f32[1,1], index: 20, kind: input, shape index: {}]   ;;  %s4380_s21 = inlined_call_operand.<no memory space> [shape: f32[1,1], index: 21, kind: input, shape index: {}]  }
   0x1   :  { %4384 = sst [smem:[#allocation20_spill]] %s4358_s0  ;;  %v27_v0 = vstv %s4374_s16  ;;  %v29_v1 = vstv %s4379_s20  ;;  %v31_v2 = vstv %s4380_s21 }
   0x2   :  { %4385 = sst [smem:[#allocation21_spill]] %s4359_s1  ;;  %28 = vst [vmem:[#allocation2] sm:$0x1] %v27_v0 }
   0x3   :  { %4386 = sst [smem:[#allocation22_spill]] %s4360_s2  ;;  %30 = vst [vmem:[#allocation3] sm:$0x1] %v29_v1 }
   0x4   :  { %4387 = sst [smem:[#allocation23_spill]] %s4361_s3  ;;  %32 = vst [vmem:[#allocation4] sm:$0x1] %v31_v2 }
   0x5   :  { %4388 = sst [smem:[#allocation24_spill]] %s4362_s4 }
   0x6   :  { %4389 = sst [smem:[#allocation25_spill]] %s4363_s5 }
   0x7   :  { %4390 = sst [smem:[#allocation26_spill]] %s4364_s6 }
   0x8   :  { %33 = vsyncpa [#allocation6], 0 }
   0x9   :  { %34 = vsyncpa [#allocation8], 0 }
   0xa   :  { %35 = vsyncpa [#allocation11], 0 }
   0xb   :  { %36 = vsyncpa [#allocation14], 0  ;;  %s4391_s5 = sld [smem:[#allocation24_spill]]  ;;  %s3462_s16 = smov [#allocation7]  }
   0xc   :  { %s62_s6 = sshll.u32 %s3462_s16, 4  ;;  %s88_s26 = sshll.u32 %s4365_s7, 4  ;;  %s63_s6 = int_to_ptr.vmem [resolvable:$true] %s62_s6  ;;  %s89_s26 = int_to_ptr.hbm [resolvable:$true] %s88_s26 }
   0xd   :  { %s3463_s21 = smov 128   ;;  %s3464_s2 = smov 8  }
   0xe   :  { %s3465_s27 = smov [#allocation10]   ;;  %s116_s30 = sshll.u32 %s4368_s10, 4  ;;  %s117_s30 = int_to_ptr.hbm [resolvable:$true] %s116_s30 }
   0xf   :  { %s90_s3 = sshll.u32 %s3465_s27, 4  ;;  %s4392_s0 = sld [smem:[#allocation21_spill]]  ;;  %s91_s3 = int_to_ptr.vmem [resolvable:$true] %s90_s3 }
  0x10   :  { %96 = dma.hbm_to_vmem [thread:$0]  %s89_s26, 256, %s91_s3, [#allocation11], %s3463_s21, %s3463_s21, %s3464_s2  }
  0x11   :  { %s60_s24 = sshll.u32 %s4391_s5, 4  ;;  %s3466_s1 = smov [#allocation13]   ;;  %s61_s24 = int_to_ptr.hbm [resolvable:$true] %s60_s24 }
  0x12   :  { %68 = dma.hbm_to_vmem [thread:$0]  %s61_s24, 512, %s63_s6, [#allocation8], %s3463_s21, %s3463_s21, %s3464_s2  }
  0x13   :  { %s118_s5 = sshll.u32 %s3466_s1, 4  ;;  %s3467_s24 = smov [#allocation5]   ;;  %s119_s5 = int_to_ptr.vmem [resolvable:$true] %s118_s5 }
  0x14   :  { %124 = dma.hbm_to_vmem [thread:$0]  %s117_s30, 512, %s119_s5, [#allocation14], %s3463_s21, %s3463_s21, %s3464_s2  }
  0x15   :  { %s43_s23 = sshll.u32 %s4392_s0, 4  ;;  %s45_s10 = sshll.u32 %s3467_s24, 4  ;;  %s44_s23 = int_to_ptr.hbm [resolvable:$true] %s43_s23  ;;  %s46_s10 = int_to_ptr.vmem [resolvable:$true] %s45_s10 }
  0x16   :  { %s4393_s20 = sld [smem:[#allocation25_spill]]  ;;  %s101_s3 = sshll.u32 %s4366_s8, 4  ;;  %s102_s3 = int_to_ptr.hbm [resolvable:$true] %s101_s3 }
  0x17   :  { %51 = dma.hbm_to_vmem [thread:$0]  %s44_s23, 256, %s46_s10, [#allocation6], %s3463_s21, %s3463_s21, %s3464_s2  }
  0x18   :  { %s3468_s28 = smov [#allocation9]   ;;  %s3469_s30 = smov [#allocation12]  }
  0x19   :  { %s75_s29 = sshll.u32 %s3468_s28, 4  ;;  %s103_s7 = sshll.u32 %s3469_s30, 4  ;;  %s76_s29 = int_to_ptr.vmem [resolvable:$true] %s75_s29  ;;  %s104_s7 = int_to_ptr.vmem [resolvable:$true] %s103_s7 }
  0x1a   :  { %s129_s1 = sshll.u32 %s4369_s11, 4  ;;  %s3470_s8 = smov [#allocation15]   ;;  %s130_s1 = int_to_ptr.hbm [resolvable:$true] %s129_s1 }
  0x1b   :  { %109 = dma.hbm_to_vmem [thread:$0]  %s102_s3, 512, %s104_s7, [#allocation11], %s3463_s21, %s3463_s21, %s3464_s2  }
  0x1c   :  { %s73_s25 = sshll.u32 %s4393_s20, 4  ;;  %s131_s23 = sshll.u32 %s3470_s8, 4  ;;  %s74_s25 = int_to_ptr.hbm [resolvable:$true] %s73_s25  ;;  %s132_s23 = int_to_ptr.vmem [resolvable:$true] %s131_s23 }
  0x1d   :  { %81 = dma.hbm_to_vmem [thread:$0]  %s74_s25, 512, %s76_s29, [#allocation8], %s3463_s21, %s3463_s21, %s3464_s2  }
  0x1e   :  { %137 = dma.hbm_to_vmem [thread:$0]  %s130_s1, 512, %s132_s23, [#allocation14], %s3463_s21, %s3463_s21, %s3464_s2  }
  0x1f   :  { %3454 = dma.done.wait [#allocation6], 256  }
  0x20   :  { %3455 = vsyncadd [#allocation6], 4294967040 }
  0x21   :  { %3456 = dma.done.wait [#allocation8], 1024  }
  0x22   :  { %3457 = vsyncadd [#allocation8], 4294966272 }
  0x23   :  { %3458 = dma.done.wait [#allocation11], 768  }
  0x24   :  { %3459 = vsyncadd [#allocation11], 4294966528 }
  0x25   :  { %3460 = dma.done.wait [#allocation14], 1024  }
  0x26   :  { %3461 = vsyncadd [#allocation14], 4294966272  ;;  %s4394_s24 = sld [smem:[#allocation22_spill]]  ;;  %v189_v6 = vld [vmem:[#allocation5 + $0x8] sm:$0xff]  ;;  %v188_v7 = vld [vmem:[#allocation5] sm:$0xff]  ;;  %vm260_vm0 = vcmask 130048  }
  0x27   :  { %281 = vmatpush.msra.mxu0 %v189_v6  ;;  %s4395_s27 = sld [smem:[#allocation20_spill]]  ;;  %v3471_v10 = vmov 0.0   ;;  %s3472_s30 = smov 64   ;;  %vm290_vm5 = vcmask 261120  }
  0x28   :  { %s4396_s29 = sld [smem:[#allocation23_spill]]  ;;  %s3473_s7 = smov 32  }
  0x29   :  { %282 = vmatpush.msra.mxu0 %v188_v7  ;;  %s4397_s23 = sld [smem:[#allocation26_spill]] }
  0x2c   :  { %v193_v3 = vld [vmem:[%s4394_s24 + $0x18] sm:$0xff]  ;;  %v192_v4 = vld [vmem:[%s4394_s24 + $0x10] sm:$0xff]  ;;  %v191_v5 = vld [vmem:[%s4394_s24 + $0x8] sm:$0xff] }
  0x2d   :  { %306 = vmatpush.msra.mxu3 %v193_v3  ;;  %369 = vmatpush.msra.mxu2 %v193_v3  ;;  %v190_v8 = vld [vmem:[%s4394_s24] sm:$0xff] }
  0x2e   :  { %v186_v9 = vld [vmem:[%s4395_s27] sm:$0xff]  ;;  %509 = vmatpush.msra.mxu1 %v193_v3  ;;  %715 = vmatpush.msrb.mxu0 %v193_v3 }
  0x2f   :  { %307 = vmatpush.msra.mxu3 %v192_v4  ;;  %370 = vmatpush.msra.mxu2 %v192_v4  ;;  %v3660_v11 = vld [vmem:[%s4396_s29] ss:$0 sm:$0xff] }
  0x30   :  { %510 = vmatpush.msra.mxu1 %v192_v4  ;;  %2944 = vmatmul.msk.f32.vlgmr.msra.gmra.mxu0 %vm260_vm0, %v186_v9 }
  0x31   :  { %308 = vmatpush.msra.mxu3 %v191_v5  ;;  %371 = vmatpush.msra.mxu2 %v191_v5 }
  0x32   :  { %511 = vmatpush.msra.mxu1 %v191_v5  ;;  %716 = vmatpush.msrb.mxu0 %v192_v4 }
  0x33   :  { %309 = vmatpush.msra.mxu3 %v190_v8  ;;  %372 = vmatpush.msra.mxu2 %v190_v8 }
  0x34   :  { %310 = vmatmul.f32.vlgmr.msra.gmra.mxu3 %v3471_v10  ;;  %512 = vmatpush.msra.mxu1 %v190_v8 }
  0x35   :  { %439 = vmatpush.msrb.mxu3 %v193_v3  ;;  %579 = vmatpush.msrb.mxu2 %v193_v3 }
  0x36   :  { %785 = vmatpush.msrb.mxu1 %v193_v3  ;;  %717 = vmatpush.msrb.mxu0 %v191_v5 }
  0x37   :  { %440 = vmatpush.msrb.mxu3 %v192_v4  ;;  %580 = vmatpush.msrb.mxu2 %v192_v4 }
  0x38   :  { %786 = vmatpush.msrb.mxu1 %v192_v4  ;;  %718 = vmatpush.msrb.mxu0 %v190_v8 }
  0x39   :  { %441 = vmatpush.msrb.mxu3 %v191_v5  ;;  %581 = vmatpush.msrb.mxu2 %v191_v5 }
  0x3a   :  { %787 = vmatpush.msrb.mxu1 %v191_v5 }
  0x3b   :  { %442 = vmatpush.msrb.mxu3 %v190_v8  ;;  %582 = vmatpush.msrb.mxu2 %v190_v8 }
  0x3c   :  { %788 = vmatpush.msrb.mxu1 %v190_v8 }
  0x3d   :  { %645 = vmatpush.msra.mxu3 %v193_v3 }
  0x3f   :  { %646 = vmatpush.msra.mxu3 %v192_v4 }
  0x41   :  { %647 = vmatpush.msra.mxu3 %v191_v5 }
  0x43   :  { %648 = vmatpush.msra.mxu3 %v190_v8 }
  0xad   :  { %v284_v12 = vpop.f32.mrf.mxu0 }
  0xae   :  { %v3663_v13 = vadd.f32 %v3660_v11, %v284_v12 }
  0xb7   :  { %v311_v14 = vpop.f32.mrf.mxu3 }
  0xb8   :  { %v314_v15 = vadd.f32 %v311_v14, %v3663_v13 }
  0xba   :  { %3020 = vtanh.f32 %v314_v15  ;;  %v315_v17 = vsub.f32 0.0, %v314_v15 }
  0xbc   :  { %v316_v18 = vmul.f32 1.442695, %v315_v17 }
  0xbe   :  { %3022 = vpow2.f32 %v316_v18 }
  0xc0   :  { %v3021_v16 = vpop.eup %3020 }
  0xc1   :  { %337 = vrot.lane.b32.xlu0 %v3021_v16, %s3472_s30 }
  0xc4   :  { %v3023_v19 = vpop.eup %3022 }
  0xc5   :  { %v318_v20 = vadd.f32 1.0, %v3023_v19 }
  0xc7   :  { %3024 = vrcp.f32 %v318_v20  ;;  %v330_v26 = vand.u32 2147483648, %v318_v20  ;;  %vm324_vm2 = vweird.f32 %v318_v20  ;;  %v328_v27 = vand.u32 2147483647, %v318_v20 }
  0xc9   :  { %v331_v29 = vor.u32 1.1754944e-38, %v330_v26  ;;  %vm329_vm4 = vcmp.eq.f32.partialorder %v328_v27, 8.507059e+37 }
  0xcd   :  { %v3025_v21 = vpop.eup %3024 }
  0xce   :  { %v320_v22 = vmul.f32 %v3025_v21, %v318_v20  ;;  %vm325_vm1 = vweird.f32 %v3025_v21 }
  0xcf   :  { %vm326_vm3 = vmor %vm324_vm2, %vm325_vm1 }
  0xd0   :  { %v321_v23 = vsub.f32 1.0, %v320_v22 }
  0xd2   :  { %v322_v24 = vmul.f32 %v3025_v21, %v321_v23 }
  0xd4   :  { %v323_v25 = vadd.f32 %v3025_v21, %v322_v24 }
  0xd6   :  { %v327_v28 = vsel %vm326_vm3, %v3025_v21, %v323_v25 }
  0xd7   :  { %v332_v31 = vsel %vm329_vm4, %v331_v29, %v327_v28 }
  0xd8   :  { %v335_v33 = vmul.f32 0.0, %v332_v31 }
 0x133   :  { %v338_v30 = vpop.permute.xlu0 %337 }
 0x134   :  { %v340_v32 = vmul.f32 %v338_v30, %v332_v31 }
 0x136   :  { %342 = vrot.lane.b32.xlu0 %v340_v32, %s3473_s7 }
 0x1a8   :  { %v343_v34 = vpop.permute.xlu0 %342 }
 0x1a9   :  { %v345_v35 = vadd.f32 %v343_v34, %v335_v33 }
 0x1ab   :  { %3026 = vtanh.f32 %v345_v35  ;;  %v402_v60 = vrot.slane %v345_v35, 6 }
 0x1b1   :  { %v3027_v36 = vpop.eup %3026 }
 0x1b2   :  { %348 = vrot.lane.b32.xlu1 %v3027_v36, %s3472_s30 }
 0x224   :  { %v349_v37 = vpop.permute.xlu1 %348 }
 0x225   :  { %v351_v38 = vmul.f32 %v349_v37, %v332_v31 }
 0x227   :  { %353 = vrot.lane.b32.xlu1 %v351_v38, %s3473_s7 }
 0x299   :  { %v3670_v39 = vpop.permute.xlu1 %353 }
 0x29a   :  { %2946 = vmatmul.msk.f32.vlgmr.msra.gmra.mxu2 %vm290_vm5, %v3670_v39 }
 0x31d   :  { %v374_v40 = vpop.f32.mrf.mxu2 }
 0x31e   :  { %v378_v41 = vrot.slane %v374_v40, 6 }
 0x320   :  { %v380_v42 = vadd.f32 %v378_v41, %v3663_v13 }
 0x322   :  { %3028 = vtanh.f32 %v380_v42  ;;  %v381_v44 = vsub.f32 0.0, %v380_v42 }
 0x324   :  { %v382_v45 = vmul.f32 1.442695, %v381_v44 }
 0x326   :  { %3030 = vpow2.f32 %v382_v45 }
 0x328   :  { %v3029_v43 = vpop.eup %3028 }
 0x329   :  { %406 = vrot.lane.b32.xlu2 %v3029_v43, %s3472_s30 }
 0x32c   :  { %v3031_v46 = vpop.eup %3030 }
 0x32d   :  { %v384_v47 = vadd.f32 1.0, %v3031_v46 }
 0x32f   :  { %3032 = vrcp.f32 %v384_v47  ;;  %v396_v53 = vand.u32 2147483648, %v384_v47  ;;  %vm390_vm7 = vweird.f32 %v384_v47  ;;  %v394_v54 = vand.u32 2147483647, %v384_v47 }
 0x331   :  { %v397_v56 = vor.u32 1.1754944e-38, %v396_v53  ;;  %vm395_vm9 = vcmp.eq.f32.partialorder %v394_v54, 8.507059e+37 }
 0x335   :  { %v3033_v48 = vpop.eup %3032 }
 0x336   :  { %v386_v49 = vmul.f32 %v3033_v48, %v384_v47  ;;  %vm391_vm6 = vweird.f32 %v3033_v48 }
 0x337   :  { %vm392_vm8 = vmor %vm390_vm7, %vm391_vm6 }
 0x338   :  { %v387_v50 = vsub.f32 1.0, %v386_v49 }
 0x33a   :  { %v388_v51 = vmul.f32 %v3033_v48, %v387_v50 }
 0x33c   :  { %v389_v52 = vadd.f32 %v3033_v48, %v388_v51 }
 0x33e   :  { %v393_v55 = vsel %vm392_vm8, %v3033_v48, %v389_v52 }
 0x33f   :  { %v398_v58 = vsel %vm395_vm9, %v397_v56, %v393_v55 }
 0x340   :  { %v404_v61 = vmul.f32 %v402_v60, %v398_v58 }
 0x383   :  { %v407_v57 = vpop.permute.xlu2 %406 }
 0x384   :  { %v409_v59 = vmul.f32 %v407_v57, %v398_v58 }
 0x386   :  { %411 = vrot.lane.b32.xlu2 %v409_v59, %s3473_s7 }
 0x3e0   :  { %v412_v62 = vpop.permute.xlu2 %411 }
 0x3e1   :  { %v414_v63 = vadd.f32 %v412_v62, %v404_v61 }
 0x3e3   :  { %3034 = vtanh.f32 %v414_v63  ;;  %v472_v28 = vrot.slane %v414_v63, 6 }
 0x3e9   :  { %v3035_v0 = vpop.eup %3034 }
 0x3ea   :  { %417 = vrot.lane.b32.xlu0 %v3035_v0, %s3472_s30 }
 0x45c   :  { %v418_v1 = vpop.permute.xlu0 %417 }
 0x45d   :  { %v420_v2 = vmul.f32 %v418_v1, %v398_v58  ;;  %v3700_v1 = vld [vmem:[#allocation7 + $0x18] sm:$0xff] }
 0x45e   :  { %852 = vmatpush.msra.mxu2 %v3700_v1  ;;  %892 = vmatpush.msra.mxu0 %v3700_v1 }
 0x45f   :  { %v422_v3 = vrot.slane %v420_v2, 2  ;;  %v3702_v2 = vld [vmem:[#allocation7 + $0x10] sm:$0xff] }
 0x460   :  { %853 = vmatpush.msra.mxu2 %v3702_v2  ;;  %893 = vmatpush.msra.mxu0 %v3702_v2 }
 0x461   :  { %423 = vrot.lane.b32.xlu1 %v422_v3, %s3473_s7  ;;  %v3707_v3 = vld [vmem:[%s4395_s27 + $0x8] sm:$0xff] }
 0x462   :  { %2945 = vmatmul.msk.f32.gmra.mxu0 %vm260_vm0, %v3707_v3 }
 0x4d3   :  { %v3679_v4 = vpop.permute.xlu1 %423 }
 0x4d4   :  { %2947 = vmatmul.msk.f32.vlgmr.msrb.gmra.mxu3 %vm290_vm5, %v3679_v4 }
 0x4d5   :  { %872 = vmatpush.msrb.mxu3 %v3700_v1 }
 0x4d7   :  { %873 = vmatpush.msrb.mxu3 %v3702_v2 }
 0x557   :  { %v444_v5 = vpop.f32.mrf.mxu3 }
 0x558   :  { %v448_v6 = vrot.slane %v444_v5, 4  ;;  %v3712_v5 = vld [vmem:[#allocation7 + $0x8] sm:$0xff] }
 0x559   :  { %854 = vmatpush.msra.mxu2 %v3712_v5  ;;  %874 = vmatpush.msrb.mxu3 %v3712_v5 }
 0x55a   :  { %v450_v7 = vadd.f32 %v448_v6, %v3663_v13  ;;  %v3718_v6 = vld [vmem:[#allocation7] sm:$0xff]  ;;  %894 = vmatpush.msra.mxu0 %v3712_v5 }
 0x55b   :  { %855 = vmatpush.msra.mxu2 %v3718_v6  ;;  %875 = vmatpush.msrb.mxu3 %v3718_v6 }
 0x55c   :  { %3036 = vtanh.f32 %v450_v7  ;;  %v451_v9 = vsub.f32 0.0, %v450_v7  ;;  %895 = vmatpush.msra.mxu0 %v3718_v6 }
 0x55e   :  { %v452_v12 = vmul.f32 1.442695, %v451_v9 }
 0x560   :  { %3038 = vpow2.f32 %v452_v12 }
 0x562   :  { %v3037_v8 = vpop.eup %3036 }
 0x563   :  { %476 = vrot.lane.b32.xlu2 %v3037_v8, %s3472_s30  ;;  %v287_v8 = vpop.f32.mrf.mxu0 }
 0x564   :  { %v3742_v9 = vadd.f32 %v3660_v11, %v287_v8 }
 0x566   :  { %v3039_v14 = vpop.eup %3038 }
 0x567   :  { %v454_v15 = vadd.f32 1.0, %v3039_v14 }
 0x569   :  { %3040 = vrcp.f32 %v454_v15  ;;  %v466_v21 = vand.u32 2147483648, %v454_v15  ;;  %vm460_vm11 = vweird.f32 %v454_v15  ;;  %v464_v22 = vand.u32 2147483647, %v454_v15 }
 0x56b   :  { %v467_v24 = vor.u32 1.1754944e-38, %v466_v21  ;;  %vm465_vm13 = vcmp.eq.f32.partialorder %v464_v22, 8.507059e+37 }
 0x56f   :  { %v3041_v16 = vpop.eup %3040 }
 0x570   :  { %v456_v17 = vmul.f32 %v3041_v16, %v454_v15  ;;  %vm461_vm10 = vweird.f32 %v3041_v16 }
 0x571   :  { %vm462_vm12 = vmor %vm460_vm11, %vm461_vm10 }
 0x572   :  { %v457_v18 = vsub.f32 1.0, %v456_v17 }
 0x574   :  { %v458_v19 = vmul.f32 %v3041_v16, %v457_v18 }
 0x576   :  { %v459_v20 = vadd.f32 %v3041_v16, %v458_v19 }
 0x578   :  { %v463_v23 = vsel %vm462_vm12, %v3041_v16, %v459_v20 }
 0x579   :  { %v468_v26 = vsel %vm465_vm13, %v467_v24, %v463_v23 }
 0x57a   :  { %v474_v29 = vmul.f32 %v472_v28, %v468_v26 }
 0x5bd   :  { %v477_v25 = vpop.permute.xlu2 %476 }
 0x5be   :  { %v479_v27 = vmul.f32 %v477_v25, %v468_v26 }
 0x5c0   :  { %481 = vrot.lane.b32.xlu0 %v479_v27, %s3473_s7 }
 0x632   :  { %v482_v30 = vpop.permute.xlu0 %481 }
 0x633   :  { %v484_v31 = vadd.f32 %v482_v30, %v474_v29 }
 0x635   :  { %3042 = vtanh.f32 %v484_v31  ;;  %v542_v57 = vrot.slane %v484_v31, 6 }
 0x63b   :  { %v3043_v32 = vpop.eup %3042 }
 0x63c   :  { %487 = vrot.lane.b32.xlu1 %v3043_v32, %s3472_s30 }
 0x6ae   :  { %v488_v33 = vpop.permute.xlu1 %487 }
 0x6af   :  { %v490_v34 = vmul.f32 %v488_v33, %v468_v26 }
 0x6b1   :  { %v492_v35 = vrot.slane %v490_v34, 4 }
 0x6b3   :  { %493 = vrot.lane.b32.xlu2 %v492_v35, %s3473_s7 }
 0x70d   :  { %v3688_v36 = vpop.permute.xlu2 %493 }
 0x70e   :  { %2948 = vmatmul.msk.f32.vlgmr.msra.gmra.mxu1 %vm290_vm5, %v3688_v36 }
 0x70f   :  { %912 = vmatpush.msra.mxu1 %v3700_v1 }
 0x711   :  { %913 = vmatpush.msra.mxu1 %v3702_v2 }
 0x713   :  { %914 = vmatpush.msra.mxu1 %v3712_v5 }
 0x715   :  { %915 = vmatpush.msra.mxu1 %v3718_v6 }
 0x78b   :  { %v514_v37 = vpop.f32.mrf.mxu1 }
 0x78c   :  { %v518_v38 = vrot.slane %v514_v37, 2 }
 0x78e   :  { %v520_v40 = vadd.f32 %v518_v38, %v3663_v13  ;;  %v3753_v38 = vld [vmem:[#allocation9 + $0x18] sm:$0xff] }
 0x790   :  { %3044 = vtanh.f32 %v520_v40  ;;  %v521_v42 = vsub.f32 0.0, %v520_v40  ;;  %v3755_v40 = vld [vmem:[#allocation9 + $0x10] sm:$0xff] }
 0x792   :  { %v522_v43 = vmul.f32 1.442695, %v521_v42  ;;  %v3761_v42 = vld [vmem:[#allocation9] sm:$0xff] }
 0x794   :  { %3046 = vpow2.f32 %v522_v43 }
 0x796   :  { %v3045_v41 = vpop.eup %3044 }
 0x797   :  { %546 = vrot.lane.b32.xlu0 %v3045_v41, %s3472_s30  ;;  %v3758_v41 = vld [vmem:[#allocation9 + $0x8] sm:$0xff] }
 0x79a   :  { %v3047_v44 = vpop.eup %3046 }
 0x79b   :  { %v524_v45 = vadd.f32 1.0, %v3047_v44 }
 0x79d   :  { %3048 = vrcp.f32 %v524_v45  ;;  %v536_v51 = vand.u32 2147483648, %v524_v45  ;;  %vm530_vm15 = vweird.f32 %v524_v45  ;;  %v534_v52 = vand.u32 2147483647, %v524_v45 }
 0x79f   :  { %v537_v53 = vor.u32 1.1754944e-38, %v536_v51  ;;  %vm535_vm2 = vcmp.eq.f32.partialorder %v534_v52, 8.507059e+37 }
 0x7a3   :  { %v3049_v46 = vpop.eup %3048 }
 0x7a4   :  { %v526_v47 = vmul.f32 %v3049_v46, %v524_v45  ;;  %vm531_vm14 = vweird.f32 %v3049_v46 }
 0x7a5   :  { %vm532_vm1 = vmor %vm530_vm15, %vm531_vm14 }
 0x7a6   :  { %v527_v48 = vsub.f32 1.0, %v526_v47 }
 0x7a8   :  { %v528_v49 = vmul.f32 %v3049_v46, %v527_v48  ;;  %v3787_v48 = vld [vmem:[%s4397_s23] ss:$0 sm:$0xff] }
 0x7aa   :  { %v529_v50 = vadd.f32 %v3049_v46, %v528_v49 }
 0x7ac   :  { %v533_v13 = vsel %vm532_vm1, %v3049_v46, %v529_v50 }
 0x7ad   :  { %v538_v55 = vsel %vm535_vm2, %v537_v53, %v533_v13 }
 0x7ae   :  { %v544_v58 = vmul.f32 %v542_v57, %v538_v55 }
 0x809   :  { %v547_v54 = vpop.permute.xlu0 %546 }
 0x80a   :  { %v549_v56 = vmul.f32 %v547_v54, %v538_v55 }
 0x80c   :  { %551 = vrot.lane.b32.xlu1 %v549_v56, %s3473_s7 }
 0x87e   :  { %v552_v59 = vpop.permute.xlu1 %551 }
 0x87f   :  { %v3695_v60 = vadd.f32 %v552_v59, %v544_v58 }
 0x881   :  { %3050 = vtanh.f32 %v3695_v60  ;;  %v609_v30 = vrot.slane %v3695_v60, 6 }
 0x887   :  { %v3051_v61 = vpop.eup %3050 }
 0x888   :  { %557 = vrot.lane.b32.xlu2 %v3051_v61, %s3472_s30 }
 0x8e2   :  { %v558_v62 = vpop.permute.xlu2 %557 }
 0x8e3   :  { %v560_v63 = vmul.f32 %v558_v62, %v538_v55 }
 0x8e5   :  { %v562_v0 = vrot.slane %v560_v63, 6 }
 0x8e7   :  { %563 = vrot.lane.b32.xlu0 %v562_v0, %s3473_s7 }
 0x959   :  { %v3731_v7 = vpop.permute.xlu0 %563 }
 0x95a   :  { %2949 = vmatmul.msk.f32.vlgmr.msrb.gmra.mxu2 %vm290_vm5, %v3731_v7 }
 0x95b   :  { %932 = vmatpush.msrb.mxu2 %v3700_v1 }
 0x95d   :  { %933 = vmatpush.msrb.mxu2 %v3702_v2 }
 0x95f   :  { %934 = vmatpush.msrb.mxu2 %v3712_v5 }
 0x961   :  { %935 = vmatpush.msrb.mxu2 %v3718_v6 }
 0x962   :  { %2953 = vmatmul.msk.f32.vlgmr.msra.gmra.mxu2 %vm290_vm5, %v3670_v39 }
 0x963   :  { %1018 = vmatpush.msra.mxu2 %v3753_v38 }
 0x965   :  { %1019 = vmatpush.msra.mxu2 %v3755_v40 }
 0x967   :  { %1020 = vmatpush.msra.mxu2 %v3758_v41 }
 0x969   :  { %1021 = vmatpush.msra.mxu2 %v3761_v42 }
 0x9dd   :  { %v584_v12 = vpop.f32.mrf.mxu2 }
 0x9de   :  { %v587_v14 = vadd.f32 %v584_v12, %v3742_v9 }
 0x9e0   :  { %3052 = vtanh.f32 %v587_v14  ;;  %v588_v16 = vsub.f32 0.0, %v587_v14 }
 0x9e2   :  { %v589_v17 = vmul.f32 1.442695, %v588_v16 }
 0x9e4   :  { %3054 = vpow2.f32 %v589_v17 }
 0x9e5   :  { %v857_v44 = vpop.f32.mrf.mxu2 }
 0x9e6   :  { %v3053_v15 = vpop.eup %3052  ;;  %v858_v49 = vadd.f32 %v3787_v48, %v857_v44 }
 0x9e7   :  { %613 = vrot.lane.b32.xlu1 %v3053_v15, %s3472_s30 }
 0x9ea   :  { %v3055_v18 = vpop.eup %3054 }
 0x9eb   :  { %v591_v19 = vadd.f32 1.0, %v3055_v18 }
 0x9ed   :  { %3056 = vrcp.f32 %v591_v19  ;;  %v603_v11 = vand.u32 2147483648, %v591_v19  ;;  %vm597_vm4 = vweird.f32 %v591_v19  ;;  %v601_v24 = vand.u32 2147483647, %v591_v19 }
 0x9ef   :  { %v604_v26 = vor.u32 1.1754944e-38, %v603_v11  ;;  %vm602_vm7 = vcmp.eq.f32.partialorder %v601_v24, 8.507059e+37 }
 0x9f3   :  { %v3057_v20 = vpop.eup %3056 }
 0x9f4   :  { %v593_v21 = vmul.f32 %v3057_v20, %v591_v19  ;;  %vm598_vm3 = vweird.f32 %v3057_v20 }
 0x9f5   :  { %vm599_vm6 = vmor %vm597_vm4, %vm598_vm3 }
 0x9f6   :  { %v594_v39 = vsub.f32 1.0, %v593_v21 }
 0x9f8   :  { %v595_v22 = vmul.f32 %v3057_v20, %v594_v39 }
 0x9fa   :  { %v596_v23 = vadd.f32 %v3057_v20, %v595_v22 }
 0x9fc   :  { %v600_v25 = vsel %vm599_vm6, %v3057_v20, %v596_v23 }
 0x9fd   :  { %v605_v28 = vsel %vm602_vm7, %v604_v26, %v600_v25 }
 0x9fe   :  { %v611_v31 = vmul.f32 %v609_v30, %v605_v28 }
 0xa59   :  { %v614_v27 = vpop.permute.xlu1 %613 }
 0xa5a   :  { %v616_v29 = vmul.f32 %v614_v27, %v605_v28 }
 0xa5c   :  { %618 = vrot.lane.b32.xlu2 %v616_v29, %s3473_s7 }
 0xab6   :  { %v619_v32 = vpop.permute.xlu2 %618 }
 0xab7   :  { %v3748_v33 = vadd.f32 %v619_v32, %v611_v31 }
 0xab9   :  { %3058 = vtanh.f32 %v3748_v33  ;;  %v678_v30 = vrot.slane %v3748_v33, 6 }
 0xabf   :  { %v3059_v34 = vpop.eup %3058 }
 0xac0   :  { %624 = vrot.lane.b32.xlu0 %v3059_v34, %s3472_s30 }
 0xb32   :  { %v625_v35 = vpop.permute.xlu0 %624 }
 0xb33   :  { %v627_v37 = vmul.f32 %v625_v35, %v605_v28 }
 0xb35   :  { %629 = vrot.lane.b32.xlu1 %v627_v37, %s3473_s7 }
 0xba7   :  { %v630_v43 = vpop.permute.xlu1 %629 }
 0xba8   :  { %2950 = vmatmul.msk.f32.vlgmr.msra.gmra.mxu3 %vm290_vm5, %v630_v43  ;;  %2957 = vmatmul.msk.f32.vlgmr.msrb.gmra.mxu2 %vm290_vm5, %v630_v43 }
 0xba9   :  { %952 = vmatpush.msra.mxu3 %v3700_v1  ;;  %1270 = vmatpush.msrb.mxu2 %v3753_v38 }
 0xbab   :  { %953 = vmatpush.msra.mxu3 %v3702_v2  ;;  %1271 = vmatpush.msrb.mxu2 %v3755_v40 }
 0xbad   :  { %954 = vmatpush.msra.mxu3 %v3712_v5  ;;  %1272 = vmatpush.msrb.mxu2 %v3758_v41 }
 0xbaf   :  { %955 = vmatpush.msra.mxu3 %v3718_v6  ;;  %1273 = vmatpush.msrb.mxu2 %v3761_v42 }
 0xbb0   :  { %2954 = vmatmul.msk.f32.vlgmr.msrb.gmra.mxu3 %vm290_vm5, %v3679_v4  ;;  %1022 = vmatmul.f32.vlgmr.msra.gmra.mxu2 %v3471_v10 }
 0xbb1   :  { %1081 = vmatpush.msrb.mxu3 %v3753_v38 }
 0xbb3   :  { %1082 = vmatpush.msrb.mxu3 %v3755_v40 }
 0xbb5   :  { %1083 = vmatpush.msrb.mxu3 %v3758_v41 }
 0xbb7   :  { %1084 = vmatpush.msrb.mxu3 %v3761_v42 }
 0xc2b   :  { %v650_v45 = vpop.f32.mrf.mxu3  ;;  %v3782_v46 = vpop.f32.mrf.mxu2 }
 0xc2c   :  { %v654_v47 = vrot.slane %v650_v45, 6 }
 0xc2e   :  { %v656_v4 = vadd.f32 %v654_v47, %v3742_v9 }
 0xc30   :  { %3060 = vtanh.f32 %v656_v4  ;;  %v657_v53 = vsub.f32 0.0, %v656_v4 }
 0xc32   :  { %v658_v54 = vmul.f32 1.442695, %v657_v53 }
 0xc33   :  { %v1023_v50 = vpop.f32.mrf.mxu2 }
 0xc34   :  { %v1026_v51 = vadd.f32 %v1023_v50, %v858_v49 }
 0xc36   :  { %v3061_v52 = vpop.eup %3060  ;;  %3062 = vtanh.f32 %v1026_v51  ;;  %v1027_v58 = vsub.f32 0.0, %v1026_v51 }
 0xc37   :  { %682 = vrot.lane.b32.xlu2 %v3061_v52, %s3472_s30  ;;  %3064 = vpow2.f32 %v658_v54 }
 0xc38   :  { %v1028_v60 = vmul.f32 1.442695, %v1027_v58 }
 0xc3c   :  { %v3063_v13 = vpop.eup %3062 }
 0xc3d   :  { %1049 = vrot.lane.b32.xlu0 %v3063_v13, %s3472_s30  ;;  %v3065_v55 = vpop.eup %3064 }
 0xc3e   :  { %v660_v56 = vadd.f32 1.0, %v3065_v55 }
 0xc40   :  { %3066 = vrcp.f32 %v660_v56  ;;  %v672_v0 = vand.u32 2147483648, %v660_v56  ;;  %vm666_vm9 = vweird.f32 %v660_v56  ;;  %v670_v12 = vand.u32 2147483647, %v660_v56 }
 0xc41   :  { %3068 = vpow2.f32 %v1028_v60 }
 0xc42   :  { %v673_v16 = vor.u32 1.1754944e-38, %v672_v0  ;;  %vm671_vm11 = vcmp.eq.f32.partialorder %v670_v12, 8.507059e+37 }
 0xc46   :  { %v3067_v57 = vpop.eup %3066 }
 0xc47   :  { %v662_v59 = vmul.f32 %v3067_v57, %v660_v56  ;;  %vm667_vm8 = vweird.f32 %v3067_v57  ;;  %v3069_v8 = vpop.eup %3068 }
 0xc48   :  { %vm668_vm10 = vmor %vm666_vm9, %vm667_vm8  ;;  %v1030_v15 = vadd.f32 1.0, %v3069_v8 }
 0xc49   :  { %v663_v61 = vsub.f32 1.0, %v662_v59 }
 0xc4a   :  { %3070 = vrcp.f32 %v1030_v15  ;;  %v1042_v11 = vand.u32 2147483648, %v1030_v15  ;;  %vm1036_vm13 = vweird.f32 %v1030_v15  ;;  %v1040_v24 = vand.u32 2147483647, %v1030_v15 }
 0xc4b   :  { %v664_v62 = vmul.f32 %v3067_v57, %v663_v61 }
 0xc4c   :  { %v1043_v26 = vor.u32 1.1754944e-38, %v1042_v11  ;;  %vm1041_vm15 = vcmp.eq.f32.partialorder %v1040_v24, 8.507059e+37 }
 0xc4d   :  { %v665_v63 = vadd.f32 %v3067_v57, %v664_v62 }
 0xc4f   :  { %v669_v14 = vsel %vm668_vm10, %v3067_v57, %v665_v63 }
 0xc50   :  { %v674_v18 = vsel %vm671_vm11, %v673_v16, %v669_v14  ;;  %v3071_v20 = vpop.eup %3070 }
 0xc51   :  { %v1032_v21 = vmul.f32 %v3071_v20, %v1030_v15  ;;  %vm1037_vm12 = vweird.f32 %v3071_v20  ;;  %v680_v31 = vmul.f32 %v678_v30, %v674_v18 }
 0xc52   :  { %vm1038_vm14 = vmor %vm1036_vm13, %vm1037_vm12 }
 0xc53   :  { %v1033_v39 = vsub.f32 1.0, %v1032_v21 }
 0xc55   :  { %v1034_v22 = vmul.f32 %v3071_v20, %v1033_v39 }
 0xc57   :  { %v1035_v23 = vadd.f32 %v3071_v20, %v1034_v22 }
 0xc59   :  { %v1039_v25 = vsel %vm1038_vm14, %v3071_v20, %v1035_v23 }
 0xc5a   :  { %v1044_v28 = vsel %vm1041_vm15, %v1043_v26, %v1039_v25 }
 0xc5b   :  { %v1047_v35 = vmul.f32 0.0, %v1044_v28 }
 0xc91   :  { %v683_v17 = vpop.permute.xlu2 %682 }
 0xc92   :  { %v685_v19 = vmul.f32 %v683_v17, %v674_v18 }
 0xc94   :  { %687 = vrot.lane.b32.xlu1 %v685_v19, %s3473_s7 }
 0xcaf   :  { %v1050_v27 = vpop.permute.xlu0 %1049 }
 0xcb0   :  { %v1052_v29 = vmul.f32 %v1050_v27, %v1044_v28 }
 0xcb2   :  { %1054 = vrot.lane.b32.xlu2 %v1052_v29, %s3473_s7 }
 0xd06   :  { %v688_v32 = vpop.permute.xlu1 %687 }
 0xd07   :  { %v3796_v34 = vadd.f32 %v688_v32, %v680_v31 }
 0xd09   :  { %3072 = vtanh.f32 %v3796_v34 }
 0xd0c   :  { %v1055_v37 = vpop.permute.xlu2 %1054 }
 0xd0d   :  { %v3799_v43 = vadd.f32 %v1055_v37, %v1047_v35 }
 0xd0f   :  { %v3073_v44 = vpop.eup %3072  ;;  %3074 = vtanh.f32 %v3799_v43 }
 0xd10   :  { %693 = vrot.lane.b32.xlu0 %v3073_v44, %s3472_s30 }
 0xd15   :  { %v3075_v45 = vpop.eup %3074 }
 0xd16   :  { %1060 = vrot.lane.b32.xlu1 %v3075_v45, %s3472_s30 }
 0xd82   :  { %v694_v47 = vpop.permute.xlu0 %693 }
 0xd83   :  { %v696_v33 = vmul.f32 %v694_v47, %v674_v18 }
 0xd85   :  { %v698_v4 = vrot.slane %v696_v33, 2  ;;  %v748_v33 = vrot.slane %v3796_v34, 6 }
 0xd87   :  { %699 = vrot.lane.b32.xlu2 %v698_v4, %s3473_s7 }
 0xd88   :  { %v1061_v49 = vpop.permute.xlu1 %1060 }
 0xd89   :  { %v1063_v50 = vmul.f32 %v1061_v49, %v1044_v28 }
 0xd8b   :  { %1065 = vrot.lane.b32.xlu0 %v1063_v50, %s3473_s7 }
 0xde1   :  { %v700_v51 = vpop.permute.xlu2 %699 }
 0xde2   :  { %2951 = vmatmul.msk.f32.vlgmr.msrb.gmra.mxu0 %vm290_vm5, %v700_v51  ;;  %2958 = vmatmul.msk.f32.vlgmr.msra.gmra.mxu3 %vm290_vm5, %v700_v51 }
 0xde3   :  { %972 = vmatpush.msrb.mxu0 %v3700_v1  ;;  %1333 = vmatpush.msra.mxu3 %v3753_v38 }
 0xde5   :  { %973 = vmatpush.msrb.mxu0 %v3702_v2  ;;  %1334 = vmatpush.msra.mxu3 %v3755_v40 }
 0xde7   :  { %974 = vmatpush.msrb.mxu0 %v3712_v5  ;;  %1335 = vmatpush.msra.mxu3 %v3758_v41 }
 0xde9   :  { %975 = vmatpush.msrb.mxu0 %v3718_v6  ;;  %1336 = vmatpush.msra.mxu3 %v3761_v42 }
 0xdea   :  { %2955 = vmatmul.msk.f32.vlgmr.msra.gmra.mxu0 %vm290_vm5, %v3688_v36  ;;  %v877_v36 = vpop.f32.mrf.mxu3 }
 0xdeb   :  { %1144 = vmatpush.msra.mxu0 %v3753_v38  ;;  %v878_v57 = vadd.f32 %v3787_v48, %v877_v36 }
 0xded   :  { %1145 = vmatpush.msra.mxu0 %v3755_v40 }
 0xdef   :  { %1146 = vmatpush.msra.mxu0 %v3758_v41 }
 0xdf1   :  { %1147 = vmatpush.msra.mxu0 %v3761_v42 }
 0xdfd   :  { %v1066_v52 = vpop.permute.xlu0 %1065 }
 0xdfe   :  { %2961 = vmatmul.msk.f32.vlgmr.msrb.gmra.mxu3 %vm290_vm5, %v1066_v52 }
 0xe5f   :  { %v720_v13 = vpop.f32.mrf.mxu0 }
 0xe60   :  { %v724_v53 = vrot.slane %v720_v13, 4 }
 0xe62   :  { %v726_v54 = vadd.f32 %v724_v53, %v3742_v9 }
 0xe64   :  { %3076 = vtanh.f32 %v726_v54  ;;  %v727_v61 = vsub.f32 0.0, %v726_v54 }
 0xe65   :  { %v3825_v56 = vpop.f32.mrf.mxu3 }
 0xe66   :  { %v728_v62 = vmul.f32 1.442695, %v727_v61 }
 0xe6a   :  { %v3077_v55 = vpop.eup %3076 }
 0xe6b   :  { %752 = vrot.lane.b32.xlu1 %v3077_v55, %s3472_s30 }
 0xe81   :  { %v1086_v58 = vpop.f32.mrf.mxu3 }
 0xe82   :  { %v1089_v59 = vadd.f32 %v1086_v58, %v878_v57 }
 0xe84   :  { %3078 = vtanh.f32 %v1089_v59  ;;  %v1090_v63 = vsub.f32 0.0, %v1089_v59 }
 0xe85   :  { %3080 = vpow2.f32 %v728_v62 }
 0xe86   :  { %v1091_v0 = vmul.f32 1.442695, %v1090_v63 }
 0xe88   :  { %3082 = vpow2.f32 %v1091_v0 }
 0xe8a   :  { %v3079_v60 = vpop.eup %3078 }
 0xe8b   :  { %1112 = vrot.lane.b32.xlu2 %v3079_v60, %s3472_s30  ;;  %v3081_v8 = vpop.eup %3080 }
 0xe8c   :  { %v730_v12 = vadd.f32 1.0, %v3081_v8 }
 0xe8e   :  { %3084 = vrcp.f32 %v730_v12  ;;  %v3083_v14 = vpop.eup %3082  ;;  %v742_v23 = vand.u32 2147483648, %v730_v12  ;;  %vm736_vm2 = vweird.f32 %v730_v12  ;;  %v740_v11 = vand.u32 2147483647, %v730_v12 }
 0xe8f   :  { %v1093_v15 = vadd.f32 1.0, %v3083_v14 }
 0xe90   :  { %v743_v26 = vor.u32 1.1754944e-38, %v742_v23  ;;  %vm741_vm4 = vcmp.eq.f32.partialorder %v740_v11, 8.507059e+37 }
 0xe91   :  { %3086 = vrcp.f32 %v1093_v15  ;;  %v1105_v31 = vand.u32 2147483648, %v1093_v15  ;;  %vm1099_vm7 = vweird.f32 %v1093_v15  ;;  %v1103_v32 = vand.u32 2147483647, %v1093_v15 }
 0xe93   :  { %v1106_v37 = vor.u32 1.1754944e-38, %v1105_v31  ;;  %vm1104_vm9 = vcmp.eq.f32.partialorder %v1103_v32, 8.507059e+37 }
 0xe94   :  { %v3085_v16 = vpop.eup %3084 }
 0xe95   :  { %v732_v17 = vmul.f32 %v3085_v16, %v730_v12  ;;  %vm737_vm1 = vweird.f32 %v3085_v16 }
 0xe96   :  { %vm738_vm3 = vmor %vm736_vm2, %vm737_vm1 }
 0xe97   :  { %v733_v18 = vsub.f32 1.0, %v732_v17  ;;  %v3087_v19 = vpop.eup %3086 }
 0xe98   :  { %v1095_v21 = vmul.f32 %v3087_v19, %v1093_v15  ;;  %vm1100_vm6 = vweird.f32 %v3087_v19 }
 0xe99   :  { %v734_v20 = vmul.f32 %v3085_v16, %v733_v18  ;;  %vm1101_vm8 = vmor %vm1099_vm7, %vm1100_vm6 }
 0xe9a   :  { %v1096_v22 = vsub.f32 1.0, %v1095_v21 }
 0xe9b   :  { %v735_v39 = vadd.f32 %v3085_v16, %v734_v20 }
 0xe9c   :  { %v1097_v25 = vmul.f32 %v3087_v19, %v1096_v22 }
 0xe9d   :  { %v739_v24 = vsel %vm738_vm3, %v3085_v16, %v735_v39 }
 0xe9e   :  { %v744_v28 = vsel %vm741_vm4, %v743_v26, %v739_v24  ;;  %v1098_v30 = vadd.f32 %v3087_v19, %v1097_v25 }
 0xe9f   :  { %v750_v4 = vmul.f32 %v748_v33, %v744_v28 }
 0xea0   :  { %v1102_v35 = vsel %vm1101_vm8, %v3087_v19, %v1098_v30 }
 0xea1   :  { %v1107_v45 = vsel %vm1104_vm9, %v1106_v37, %v1102_v35 }
 0xea2   :  { %v1110_v51 = vmul.f32 %v1107_v45, %v3799_v43 }
 0xedd   :  { %v753_v27 = vpop.permute.xlu1 %752 }
 0xede   :  { %v755_v29 = vmul.f32 %v753_v27, %v744_v28 }
 0xee0   :  { %757 = vrot.lane.b32.xlu0 %v755_v29, %s3473_s7 }
 0xee5   :  { %v1113_v44 = vpop.permute.xlu2 %1112 }
 0xee6   :  { %v1115_v47 = vmul.f32 %v1113_v44, %v1107_v45 }
 0xee8   :  { %1117 = vrot.lane.b32.xlu1 %v1115_v47, %s3473_s7 }
 0xf52   :  { %v758_v49 = vpop.permute.xlu0 %757 }
 0xf53   :  { %v3832_v50 = vadd.f32 %v758_v49, %v750_v4 }
 0xf55   :  { %3088 = vtanh.f32 %v3832_v50 }
 0xf5a   :  { %v1118_v52 = vpop.permute.xlu1 %1117 }
 0xf5b   :  { %v3089_v13 = vpop.eup %3088  ;;  %v3836_v53 = vadd.f32 %v1118_v52, %v1110_v51  ;;  %v818_v51 = vrot.slane %v3832_v50, 6 }
 0xf5c   :  { %763 = vrot.lane.b32.xlu2 %v3089_v13, %s3472_s30 }
 0xf5d   :  { %3090 = vtanh.f32 %v3836_v53 }
 0xf63   :  { %v3091_v54 = vpop.eup %3090 }
 0xf64   :  { %1123 = vrot.lane.b32.xlu0 %v3091_v54, %s3472_s30 }
 0xfb6   :  { %v764_v34 = vpop.permute.xlu2 %763 }
 0xfb7   :  { %v766_v55 = vmul.f32 %v764_v34, %v744_v28 }
 0xfb9   :  { %v768_v36 = vrot.slane %v766_v55, 4 }
 0xfbb   :  { %769 = vrot.lane.b32.xlu1 %v768_v36, %s3473_s7 }
 0xfd6   :  { %v1124_v57 = vpop.permute.xlu0 %1123 }
 0xfd7   :  { %v1126_v58 = vmul.f32 %v1124_v57, %v1107_v45 }
 0xfd9   :  { %1128 = vrot.lane.b32.xlu2 %v1126_v58, %s3473_s7 }
0x102d   :  { %v770_v43 = vpop.permute.xlu1 %769 }
0x102e   :  { %2952 = vmatmul.msk.f32.vlgmr.msrb.gmra.mxu1 %vm290_vm5, %v770_v43  ;;  %2959 = vmatmul.msk.f32.vlgmr.msrb.gmra.mxu0 %vm290_vm5, %v770_v43 }
0x102f   :  { %998 = vmatpush.msrb.mxu1 %v3700_v1  ;;  %1396 = vmatpush.msrb.mxu0 %v3753_v38  ;;  %v897_v1 = vpop.f32.mrf.mxu0 }
0x1031   :  { %999 = vmatpush.msrb.mxu1 %v3702_v2  ;;  %1397 = vmatpush.msrb.mxu0 %v3755_v40 }
0x1033   :  { %1000 = vmatpush.msrb.mxu1 %v3712_v5  ;;  %1398 = vmatpush.msrb.mxu0 %v3758_v41  ;;  %v1129_v59 = vpop.permute.xlu2 %1128 }
0x1035   :  { %1001 = vmatpush.msrb.mxu1 %v3718_v6  ;;  %1399 = vmatpush.msrb.mxu0 %v3761_v42 }
0x1036   :  { %2956 = vmatmul.msk.f32.vlgmr.msra.gmra.mxu1 %vm290_vm5, %v3731_v7  ;;  %2962 = vmatmul.msk.f32.vlgmr.msra.gmra.mxu0 %vm290_vm5, %v1129_v59  ;;  %v898_v7 = vadd.f32 %v3787_v48, %v897_v1 }
0x1037   :  { %1207 = vmatpush.msra.mxu1 %v3753_v38 }
0x1039   :  { %1208 = vmatpush.msra.mxu1 %v3755_v40 }
0x103b   :  { %1209 = vmatpush.msra.mxu1 %v3758_v41 }
0x103d   :  { %1210 = vmatpush.msra.mxu1 %v3761_v42 }
0x10ab   :  { %v790_v2 = vpop.f32.mrf.mxu1  ;;  %v3860_v5 = vpop.f32.mrf.mxu0 }
0x10ac   :  { %v794_v6 = vrot.slane %v790_v2, 2 }
0x10ae   :  { %v796_v60 = vadd.f32 %v794_v6, %v3742_v9 }
0x10b0   :  { %3092 = vtanh.f32 %v796_v60  ;;  %v797_v8 = vsub.f32 0.0, %v796_v60 }
0x10b2   :  { %v798_v12 = vmul.f32 1.442695, %v797_v8 }
0x10b3   :  { %v1149_v61 = vpop.f32.mrf.mxu0  ;;  %v917_v60 = vpop.f32.mrf.mxu1 }
0x10b4   :  { %v1152_v62 = vadd.f32 %v1149_v61, %v898_v7  ;;  %v918_v61 = vadd.f32 %v3787_v48, %v917_v60  ;;  %v204_v60 = vld [vmem:[#allocation10] sm:$0xff] }
0x10b6   :  { %v3093_v63 = vpop.eup %3092  ;;  %3094 = vtanh.f32 %v1152_v62  ;;  %v1153_v14 = vsub.f32 0.0, %v1152_v62 }
0x10b7   :  { %822 = vrot.lane.b32.xlu0 %v3093_v63, %s3472_s30  ;;  %3096 = vpow2.f32 %v798_v12 }
0x10b8   :  { %v1154_v15 = vmul.f32 1.442695, %v1153_v14 }
0x10ba   :  { %3098 = vpow2.f32 %v1154_v15 }
0x10bc   :  { %v3095_v0 = vpop.eup %3094 }
0x10bd   :  { %1175 = vrot.lane.b32.xlu1 %v3095_v0, %s3472_s30  ;;  %v3097_v16 = vpop.eup %3096 }
0x10be   :  { %v800_v9 = vadd.f32 1.0, %v3097_v16 }
0x10c0   :  { %v3099_v17 = vpop.eup %3098  ;;  %3100 = vrcp.f32 %v800_v9  ;;  %v812_v25 = vand.u32 2147483648, %v800_v9  ;;  %vm806_vm11 = vweird.f32 %v800_v9  ;;  %v810_v26 = vand.u32 2147483647, %v800_v9 }
0x10c1   :  { %v1156_v18 = vadd.f32 1.0, %v3099_v17 }
0x10c2   :  { %v813_v29 = vor.u32 1.1754944e-38, %v812_v25  ;;  %vm811_vm13 = vcmp.eq.f32.partialorder %v810_v26, 8.507059e+37 }
0x10c3   :  { %3102 = vrcp.f32 %v1156_v18  ;;  %v1168_v35 = vand.u32 2147483648, %v1156_v18  ;;  %vm1162_vm15 = vweird.f32 %v1156_v18  ;;  %v1166_v44 = vand.u32 2147483647, %v1156_v18 }
0x10c5   :  { %v1169_v47 = vor.u32 1.1754944e-38, %v1168_v35  ;;  %vm1167_vm2 = vcmp.eq.f32.partialorder %v1166_v44, 8.507059e+37 }
0x10c6   :  { %v3101_v19 = vpop.eup %3100 }
0x10c7   :  { %v802_v20 = vmul.f32 %v3101_v19, %v800_v9  ;;  %vm807_vm10 = vweird.f32 %v3101_v19 }
0x10c8   :  { %vm808_vm12 = vmor %vm806_vm11, %vm807_vm10 }
0x10c9   :  { %v3103_v21 = vpop.eup %3102  ;;  %v803_v39 = vsub.f32 1.0, %v802_v20 }
0x10ca   :  { %v1158_v22 = vmul.f32 %v3103_v21, %v1156_v18  ;;  %vm1163_vm14 = vweird.f32 %v3103_v21 }
0x10cb   :  { %v804_v23 = vmul.f32 %v3101_v19, %v803_v39  ;;  %vm1164_vm1 = vmor %vm1162_vm15, %vm1163_vm14 }
0x10cc   :  { %v1159_v11 = vsub.f32 1.0, %v1158_v22 }
0x10cd   :  { %v805_v24 = vadd.f32 %v3101_v19, %v804_v23 }
0x10ce   :  { %v1160_v27 = vmul.f32 %v3103_v21, %v1159_v11 }
0x10cf   :  { %v809_v28 = vsel %vm808_vm12, %v3101_v19, %v805_v24 }
0x10d0   :  { %v1161_v30 = vadd.f32 %v3103_v21, %v1160_v27  ;;  %v814_v31 = vsel %vm811_vm13, %v813_v29, %v809_v28  ;;  %v938_v28 = vadd.f32 %v3787_v48, %v3782_v46 }
0x10d1   :  { %v820_v52 = vmul.f32 %v818_v51, %v814_v31 }
0x10d2   :  { %v1165_v45 = vsel %vm1164_vm1, %v3103_v21, %v1161_v30 }
0x10d3   :  { %v1170_v4 = vsel %vm1167_vm2, %v1169_v47, %v1165_v45 }
0x10d4   :  { %v1173_v55 = vmul.f32 %v1170_v4, %v3836_v53 }
0x1129   :  { %v823_v32 = vpop.permute.xlu0 %822 }
0x112a   :  { %v825_v37 = vmul.f32 %v823_v32, %v814_v31 }
0x112c   :  { %827 = vrot.lane.b32.xlu2 %v825_v37, %s3473_s7 }
0x112f   :  { %v1176_v33 = vpop.permute.xlu1 %1175 }
0x1130   :  { %v1178_v49 = vmul.f32 %v1176_v33, %v1170_v4 }
0x1132   :  { %1180 = vrot.lane.b32.xlu0 %v1178_v49, %s3473_s7 }
0x1186   :  { %v828_v13 = vpop.permute.xlu2 %827 }
0x1187   :  { %v830_v54 = vadd.f32 %v828_v13, %v820_v52 }
0x1189   :  { %3104 = vtanh.f32 %v830_v54 }
0x118f   :  { %v3105_v34 = vpop.eup %3104 }
0x1190   :  { %833 = vrot.lane.b32.xlu1 %v3105_v34, %s3472_s30 }
0x11a4   :  { %v1181_v36 = vpop.permute.xlu0 %1180 }
0x11a5   :  { %v1183_v57 = vadd.f32 %v1181_v36, %v1173_v55 }
0x11a7   :  { %3106 = vtanh.f32 %v1183_v57 }
0x11ad   :  { %v3107_v58 = vpop.eup %3106 }
0x11ae   :  { %1186 = vrot.lane.b32.xlu2 %v3107_v58, %s3472_s30 }
0x1202   :  { %v834_v43 = vpop.permute.xlu1 %833 }
0x1203   :  { %v836_v59 = vmul.f32 %v834_v43, %v814_v31 }
0x1205   :  { %v981_v1 = vrot.slane %v836_v59, 6 }
0x1207   :  { %982 = vrot.lane.b32.xlu0 %v981_v1, %s3473_s7 }
0x1208   :  { %v1187_v50 = vpop.permute.xlu2 %1186 }
0x1209   :  { %v1189_v2 = vmul.f32 %v1187_v50, %v1170_v4  ;;  %v3900_v50 = vld [vmem:[#allocation12 + $0x18] sm:$0xff] }
0x120a   :  { %1543 = vmatpush.msrb.mxu3 %v3900_v50  ;;  %1606 = vmatpush.msra.mxu0 %v3900_v50 }
0x120b   :  { %1191 = vrot.lane.b32.xlu1 %v1189_v2, %s3473_s7  ;;  %v205_v2 = vld [vmem:[#allocation10 + $0x8] sm:$0xff] }
0x120c   :  { %1522 = vmatpush.msra.mxu2 %v205_v2 }
0x120e   :  { %1523 = vmatpush.msra.mxu2 %v204_v60 }
0x1279   :  { %v3874_v6 = vpop.permute.xlu0 %982 }
0x127a   :  { %2960 = vmatmul.msk.f32.vlgmr.msrb.gmra.mxu1 %vm290_vm5, %v3874_v6 }
0x127b   :  { %1459 = vmatpush.msrb.mxu1 %v3753_v38 }
0x127d   :  { %1460 = vmatpush.msrb.mxu1 %v3755_v40  ;;  %v1192_v53 = vpop.permute.xlu1 %1191 }
0x127f   :  { %1461 = vmatpush.msrb.mxu1 %v3758_v41 }
0x1281   :  { %1462 = vmatpush.msrb.mxu1 %v3761_v42 }
0x1282   :  { %2963 = vmatmul.msk.f32.vlgmr.msra.gmra.mxu1 %vm290_vm5, %v1192_v53  ;;  %v3902_v53 = vld [vmem:[#allocation12 + $0x10] sm:$0xff] }
0x1283   :  { %1676 = vmatpush.msra.mxu1 %v3900_v50  ;;  %1544 = vmatpush.msrb.mxu3 %v3902_v53 }
0x1284   :  { %1607 = vmatpush.msra.mxu0 %v3902_v53 }
0x1285   :  { %1677 = vmatpush.msra.mxu1 %v3902_v53 }
0x12f7   :  { %v3883_v7 = vpop.f32.mrf.mxu1 }
0x12ff   :  { %v1212_v62 = vpop.f32.mrf.mxu1 }
0x1300   :  { %v1215_v63 = vadd.f32 %v1212_v62, %v918_v61  ;;  %v3905_v61 = vld [vmem:[#allocation12 + $0x8] sm:$0xff]  ;;  %v3284_v62 = vld [vmem:[%s4395_s27] sm:$0xff] }
0x1301   :  { %1545 = vmatpush.msrb.mxu3 %v3905_v61  ;;  %1608 = vmatpush.msra.mxu0 %v3905_v61 }
0x1302   :  { %3108 = vtanh.f32 %v1215_v63  ;;  %v1216_v38 = vsub.f32 0.0, %v1215_v63  ;;  %v3914_v63 = vld [vmem:[#allocation12] sm:$0xff]  ;;  %1678 = vmatpush.msra.mxu1 %v3905_v61 }
0x1303   :  { %1546 = vmatpush.msrb.mxu3 %v3914_v63  ;;  %1609 = vmatpush.msra.mxu0 %v3914_v63 }
0x1304   :  { %v1217_v40 = vmul.f32 1.442695, %v1216_v38  ;;  %1679 = vmatpush.msra.mxu1 %v3914_v63 }
0x1306   :  { %3110 = vpow2.f32 %v1217_v40 }
0x1308   :  { %v3109_v0 = vpop.eup %3108 }
0x1309   :  { %1238 = vrot.lane.b32.xlu2 %v3109_v0, %s3472_s30 }
0x130c   :  { %v3111_v41 = vpop.eup %3110 }
0x130d   :  { %v1219_v8 = vadd.f32 1.0, %v3111_v41  ;;  %v3945_v41 = vld [vmem:[%s4367_s9] ss:$0 sm:$0xff] }
0x130f   :  { %3112 = vrcp.f32 %v1219_v8  ;;  %v1231_v9 = vand.u32 2147483648, %v1219_v8  ;;  %vm1225_vm4 = vweird.f32 %v1219_v8  ;;  %v1229_v17 = vand.u32 2147483647, %v1219_v8 }
0x1311   :  { %v1232_v19 = vor.u32 1.1754944e-38, %v1231_v9  ;;  %vm1230_vm7 = vcmp.eq.f32.partialorder %v1229_v17, 8.507059e+37 }
0x1315   :  { %v3113_v42 = vpop.eup %3112 }
0x1316   :  { %v1221_v12 = vmul.f32 %v3113_v42, %v1219_v8  ;;  %vm1226_vm3 = vweird.f32 %v3113_v42 }
0x1317   :  { %vm1227_vm6 = vmor %vm1225_vm4, %vm1226_vm3 }
0x1318   :  { %v1222_v14 = vsub.f32 1.0, %v1221_v12 }
0x131a   :  { %v1223_v15 = vmul.f32 %v3113_v42, %v1222_v14 }
0x131c   :  { %v1224_v16 = vadd.f32 %v3113_v42, %v1223_v15 }
0x131e   :  { %v1228_v18 = vsel %vm1227_vm6, %v3113_v42, %v1224_v16 }
0x131f   :  { %v1233_v21 = vsel %vm1230_vm7, %v1232_v19, %v1228_v18 }
0x1320   :  { %v1236_v22 = vmul.f32 %v1233_v21, %v1183_v57 }
0x1363   :  { %v1239_v20 = vpop.permute.xlu2 %1238 }
0x1364   :  { %v1241_v39 = vmul.f32 %v1239_v20, %v1233_v21 }
0x1366   :  { %1243 = vrot.lane.b32.xlu0 %v1241_v39, %s3473_s7 }
0x13d8   :  { %v1244_v23 = vpop.permute.xlu0 %1243 }
0x13d9   :  { %v1246_v11 = vadd.f32 %v1244_v23, %v1236_v22 }
0x13db   :  { %3114 = vtanh.f32 %v1246_v11 }
0x13e1   :  { %v3115_v24 = vpop.eup %3114 }
0x13e2   :  { %1249 = vrot.lane.b32.xlu1 %v3115_v24, %s3472_s30 }
0x1454   :  { %v1250_v25 = vpop.permute.xlu1 %1249 }
0x1455   :  { %v1252_v26 = vmul.f32 %v1250_v25, %v1233_v21 }
0x1457   :  { %1254 = vrot.lane.b32.xlu2 %v1252_v26, %s3473_s7 }
0x14b1   :  { %v1255_v27 = vpop.permute.xlu2 %1254 }
0x14b2   :  { %2964 = vmatmul.msk.f32.vlgmr.msrb.gmra.mxu2 %vm290_vm5, %v1255_v27 }
0x14b3   :  { %1952 = vmatpush.msrb.mxu2 %v3900_v50 }
0x14b5   :  { %1953 = vmatpush.msrb.mxu2 %v3902_v53 }
0x14b7   :  { %1954 = vmatpush.msrb.mxu2 %v3905_v61 }
0x14b9   :  { %1955 = vmatpush.msrb.mxu2 %v3914_v63 }
0x14ba   :  { %2968 = vmatmul.msk.f32.vlgmr.msra.gmra.mxu2 %vm260_vm0, %v3284_v62 }
0x14c2   :  { %2969 = vmatmul.msk.f32.gmra.mxu2 %vm260_vm0, %v3707_v3  ;;  %v958_v3 = vadd.f32 %v3787_v48, %v3825_v56 }
0x1535   :  { %v1275_v29 = vpop.f32.mrf.mxu2 }
0x1536   :  { %v1278_v30 = vadd.f32 %v1275_v29, %v938_v28 }
0x1538   :  { %3116 = vtanh.f32 %v1278_v30  ;;  %v1279_v32 = vsub.f32 0.0, %v1278_v30 }
0x153a   :  { %v1280_v35 = vmul.f32 1.442695, %v1279_v32 }
0x153c   :  { %3118 = vpow2.f32 %v1280_v35 }
0x153d   :  { %v1525_v8 = vpop.f32.mrf.mxu2 }
0x153e   :  { %v3117_v31 = vpop.eup %3116  ;;  %v3948_v42 = vadd.f32 %v3945_v41, %v1525_v8 }
0x153f   :  { %1301 = vrot.lane.b32.xlu0 %v3117_v31, %s3472_s30 }
0x1542   :  { %v3119_v37 = vpop.eup %3118 }
0x1543   :  { %v1282_v44 = vadd.f32 1.0, %v3119_v37 }
0x1545   :  { %3120 = vrcp.f32 %v1282_v44  ;;  %v1294_v51 = vand.u32 2147483648, %v1282_v44  ;;  %vm1288_vm9 = vweird.f32 %v1282_v44  ;;  %v1292_v46 = vand.u32 2147483647, %v1282_v44 }
0x1547   :  { %v1295_v13 = vor.u32 1.1754944e-38, %v1294_v51  ;;  %vm1293_vm11 = vcmp.eq.f32.partialorder %v1292_v46, 8.507059e+37 }
0x154b   :  { %v3121_v45 = vpop.eup %3120 }
0x154c   :  { %v1284_v47 = vmul.f32 %v3121_v45, %v1282_v44  ;;  %vm1289_vm8 = vweird.f32 %v3121_v45 }
0x154d   :  { %vm1290_vm10 = vmor %vm1288_vm9, %vm1289_vm8 }
0x154e   :  { %v1285_v33 = vsub.f32 1.0, %v1284_v47 }
0x1550   :  { %v1286_v4 = vmul.f32 %v3121_v45, %v1285_v33 }
0x1552   :  { %v1287_v49 = vadd.f32 %v3121_v45, %v1286_v4 }
0x1554   :  { %v1291_v52 = vsel %vm1290_vm10, %v3121_v45, %v1287_v49 }
0x1555   :  { %v1296_v34 = vsel %vm1293_vm11, %v1295_v13, %v1291_v52 }
0x1556   :  { %v1299_v36 = vmul.f32 %v1296_v34, %v1246_v11 }
0x15b1   :  { %v1302_v54 = vpop.permute.xlu0 %1301 }
0x15b2   :  { %v1304_v55 = vmul.f32 %v1302_v54, %v1296_v34 }
0x15b4   :  { %1306 = vrot.lane.b32.xlu1 %v1304_v55, %s3473_s7 }
0x1626   :  { %v1307_v57 = vpop.permute.xlu1 %1306 }
0x1627   :  { %v3895_v58 = vadd.f32 %v1307_v57, %v1299_v36 }
0x1629   :  { %3122 = vtanh.f32 %v3895_v58 }
0x162f   :  { %v3123_v43 = vpop.eup %3122 }
0x1630   :  { %1312 = vrot.lane.b32.xlu2 %v3123_v43, %s3472_s30 }
0x168a   :  { %v1313_v59 = vpop.permute.xlu2 %1312 }
0x168b   :  { %v1315_v1 = vmul.f32 %v1313_v59, %v1296_v34 }
0x168d   :  { %1317 = vrot.lane.b32.xlu0 %v1315_v1, %s3473_s7 }
0x16ff   :  { %v1318_v0 = vpop.permute.xlu0 %1317 }
0x1700   :  { %2965 = vmatmul.msk.f32.vlgmr.msra.gmra.mxu3 %vm290_vm5, %v1318_v0 }
0x1701   :  { %1746 = vmatpush.msra.mxu3 %v3900_v50 }
0x1703   :  { %1747 = vmatpush.msra.mxu3 %v3902_v53 }
0x1705   :  { %1748 = vmatpush.msra.mxu3 %v3905_v61 }
0x1707   :  { %1749 = vmatpush.msra.mxu3 %v3914_v63 }
0x1708   :  { %1547 = vmatmul.f32.vlgmr.msrb.gmra.mxu3 %v3471_v10 }
0x1709   :  { %2022 = vmatpush.msrb.mxu3 %v3900_v50 }
0x170b   :  { %2023 = vmatpush.msrb.mxu3 %v3902_v53 }
0x170d   :  { %2024 = vmatpush.msrb.mxu3 %v3905_v61 }
0x170f   :  { %2025 = vmatpush.msrb.mxu3 %v3914_v63 }
0x1783   :  { %v1338_v38 = vpop.f32.mrf.mxu3 }
0x1784   :  { %v1341_v40 = vadd.f32 %v1338_v38, %v958_v3  ;;  %v978_v38 = vadd.f32 %v3787_v48, %v3860_v5 }
0x1786   :  { %3124 = vtanh.f32 %v1341_v40  ;;  %v1342_v18 = vsub.f32 0.0, %v1341_v40 }
0x1788   :  { %v1343_v20 = vmul.f32 1.442695, %v1342_v18 }
0x178b   :  { %v1548_v12 = vpop.f32.mrf.mxu3 }
0x178c   :  { %v3125_v14 = vpop.eup %3124  ;;  %v1551_v15 = vadd.f32 %v1548_v12, %v3948_v42 }
0x178d   :  { %1364 = vrot.lane.b32.xlu1 %v3125_v14, %s3472_s30 }
0x178e   :  { %3126 = vtanh.f32 %v1551_v15  ;;  %v1552_v16 = vsub.f32 0.0, %v1551_v15 }
0x1790   :  { %v1553_v9 = vmul.f32 1.442695, %v1552_v16 }
0x1792   :  { %3128 = vpow2.f32 %v1553_v9 }
0x1794   :  { %v3127_v56 = vpop.eup %3126 }
0x1795   :  { %1574 = vrot.lane.b32.xlu2 %v3127_v56, %s3472_s30 }
0x1798   :  { %v3129_v17 = vpop.eup %3128 }
0x1799   :  { %v1555_v19 = vadd.f32 1.0, %v3129_v17 }
0x179b   :  { %3130 = vrcp.f32 %v1555_v19  ;;  %vm1561_vm0 = vweird.f32 %v1555_v19  ;;  %v1567_v25 = vand.u32 2147483648, %v1555_v19  ;;  %v1565_v27 = vand.u32 2147483647, %v1555_v19 }
0x179c   :  { %3132 = vpow2.f32 %v1343_v20 }
0x179d   :  { %v1568_v29 = vor.u32 1.1754944e-38, %v1567_v25  ;;  %vm1566_vm14 = vcmp.eq.f32.partialorder %v1565_v27, 8.507059e+37 }
0x17a1   :  { %v3131_v21 = vpop.eup %3130 }
0x17a2   :  { %v3133_v39 = vpop.eup %3132  ;;  %v1557_v22 = vmul.f32 %v3131_v21, %v1555_v19  ;;  %vm1562_vm12 = vweird.f32 %v3131_v21 }
0x17a3   :  { %v1345_v23 = vadd.f32 1.0, %v3133_v39  ;;  %vm1563_vm13 = vmor %vm1561_vm0, %vm1562_vm12 }
0x17a4   :  { %v1558_v11 = vsub.f32 1.0, %v1557_v22 }
0x17a5   :  { %3134 = vrcp.f32 %v1345_v23  ;;  %v1357_v33 = vand.u32 2147483648, %v1345_v23  ;;  %vm1351_vm1 = vweird.f32 %v1345_v23  ;;  %v1355_v4 = vand.u32 2147483647, %v1345_v23 }
0x17a6   :  { %v1559_v24 = vmul.f32 %v3131_v21, %v1558_v11 }
0x17a7   :  { %v1358_v51 = vor.u32 1.1754944e-38, %v1357_v33  ;;  %vm1356_vm3 = vcmp.eq.f32.partialorder %v1355_v4, 8.507059e+37 }
0x17a8   :  { %v1560_v26 = vadd.f32 %v3131_v21, %v1559_v24 }
0x17aa   :  { %v1564_v30 = vsel %vm1563_vm13, %v3131_v21, %v1560_v26 }
0x17ab   :  { %v3135_v28 = vpop.eup %3134  ;;  %v1569_v35 = vsel %vm1566_vm14, %v1568_v29, %v1564_v30 }
0x17ac   :  { %v1347_v31 = vmul.f32 %v3135_v28, %v1345_v23  ;;  %vm1352_vm15 = vweird.f32 %v3135_v28  ;;  %v1572_v54 = vmul.f32 0.0, %v1569_v35 }
0x17ad   :  { %vm1353_vm2 = vmor %vm1351_vm1, %vm1352_vm15 }
0x17ae   :  { %v1348_v44 = vsub.f32 1.0, %v1347_v31 }
0x17b0   :  { %v1349_v45 = vmul.f32 %v3135_v28, %v1348_v44 }
0x17b2   :  { %v1350_v47 = vadd.f32 %v3135_v28, %v1349_v45 }
0x17b4   :  { %v1354_v49 = vsel %vm1353_vm2, %v3135_v28, %v1350_v47 }
0x17b5   :  { %v1359_v52 = vsel %vm1356_vm3, %v1358_v51, %v1354_v49 }
0x17b6   :  { %v1362_v57 = vmul.f32 %v1359_v52, %v3895_v58 }
0x17ef   :  { %v1575_v32 = vpop.permute.xlu2 %1574 }
0x17f0   :  { %v1577_v37 = vmul.f32 %v1575_v32, %v1569_v35 }
0x17f2   :  { %1579 = vrot.lane.b32.xlu1 %v1577_v37, %s3473_s7 }
0x17ff   :  { %v1365_v46 = vpop.permute.xlu1 %1364 }
0x1800   :  { %v1367_v13 = vmul.f32 %v1365_v46, %v1359_v52 }
0x1802   :  { %1369 = vrot.lane.b32.xlu0 %v1367_v13, %s3473_s7 }
0x1864   :  { %v1580_v34 = vpop.permute.xlu1 %1579 }
0x1865   :  { %v3955_v55 = vadd.f32 %v1580_v34, %v1572_v54 }
0x1867   :  { %3136 = vtanh.f32 %v3955_v55 }
0x186d   :  { %v3137_v36 = vpop.eup %3136 }
0x186e   :  { %1585 = vrot.lane.b32.xlu0 %v3137_v36, %s3472_s30 }
0x1874   :  { %v1370_v43 = vpop.permute.xlu0 %1369 }
0x1875   :  { %v3960_v59 = vadd.f32 %v1370_v43, %v1362_v57  ;;  %v1639_v57 = vrot.slane %v3955_v55, 6 }
0x1877   :  { %3138 = vtanh.f32 %v3960_v59 }
0x187d   :  { %v3139_v1 = vpop.eup %3138 }
0x187e   :  { %1375 = vrot.lane.b32.xlu2 %v3139_v1, %s3472_s30 }
0x18d8   :  { %v1376_v2 = vpop.permute.xlu2 %1375 }
0x18d9   :  { %v1378_v60 = vmul.f32 %v1376_v2, %v1359_v52 }
0x18db   :  { %1380 = vrot.lane.b32.xlu1 %v1378_v60, %s3473_s7 }
0x18e0   :  { %v1586_v62 = vpop.permute.xlu0 %1585 }
0x18e1   :  { %v1588_v0 = vmul.f32 %v1586_v62, %v1569_v35 }
0x18e3   :  { %1590 = vrot.lane.b32.xlu2 %v1588_v0, %s3473_s7 }
0x193d   :  { %v3970_v58 = vpop.permute.xlu2 %1590 }
0x194d   :  { %v1381_v3 = vpop.permute.xlu1 %1380 }
0x194e   :  { %2966 = vmatmul.msk.f32.vlgmr.msrb.gmra.mxu0 %vm290_vm5, %v1381_v3 }
0x194f   :  { %1816 = vmatpush.msrb.mxu0 %v3900_v50 }
0x1951   :  { %1817 = vmatpush.msrb.mxu0 %v3902_v53 }
0x1953   :  { %1818 = vmatpush.msrb.mxu0 %v3905_v61 }
0x1955   :  { %1819 = vmatpush.msrb.mxu0 %v3914_v63 }
0x1956   :  { %2970 = vmatmul.msk.f32.vlgmr.msra.gmra.mxu0 %vm290_vm5, %v3970_v58 }
0x19cb   :  { %v1401_v40 = vpop.f32.mrf.mxu0 }
0x19cc   :  { %v1404_v8 = vadd.f32 %v1401_v40, %v978_v38 }
0x19ce   :  { %3140 = vtanh.f32 %v1404_v8  ;;  %v1405_v9 = vsub.f32 0.0, %v1404_v8  ;;  %v3285_v8 = vld [vmem:[%s4397_s23] ss:$0 sm:$0xff] }
0x19d0   :  { %v1406_v17 = vmul.f32 1.442695, %v1405_v9 }
0x19d3   :  { %v1611_v12 = vpop.f32.mrf.mxu0 }
0x19d4   :  { %v3141_v14 = vpop.eup %3140  ;;  %v1615_v15 = vrot.slane %v1611_v12, 6  ;;  %v1004_v12 = vadd.f32 %v3285_v8, %v3883_v7 }
0x19d5   :  { %1427 = vrot.lane.b32.xlu0 %v3141_v14, %s3472_s30 }
0x19d6   :  { %v1617_v56 = vadd.f32 %v1615_v15, %v3948_v42 }
0x19d8   :  { %3142 = vtanh.f32 %v1617_v56  ;;  %v1618_v18 = vsub.f32 0.0, %v1617_v56 }
0x19d9   :  { %3144 = vpow2.f32 %v1406_v17 }
0x19da   :  { %v1619_v48 = vmul.f32 1.442695, %v1618_v18 }
0x19dc   :  { %3146 = vpow2.f32 %v1619_v48 }
0x19de   :  { %v3143_v16 = vpop.eup %3142 }
0x19df   :  { %1643 = vrot.lane.b32.xlu1 %v3143_v16, %s3472_s30  ;;  %v3145_v19 = vpop.eup %3144 }
0x19e0   :  { %v1408_v5 = vadd.f32 1.0, %v3145_v19 }
0x19e2   :  { %3148 = vrcp.f32 %v1408_v5  ;;  %v3147_v20 = vpop.eup %3146  ;;  %v1420_v27 = vand.u32 2147483648, %v1408_v5  ;;  %vm1414_vm6 = vweird.f32 %v1408_v5  ;;  %v1418_v28 = vand.u32 2147483647, %v1408_v5 }
0x19e3   :  { %v1621_v39 = vadd.f32 1.0, %v3147_v20 }
0x19e4   :  { %v1421_v31 = vor.u32 1.1754944e-38, %v1420_v27  ;;  %vm1419_vm8 = vcmp.eq.f32.partialorder %v1418_v28, 8.507059e+37 }
0x19e5   :  { %3150 = vrcp.f32 %v1621_v39  ;;  %v1633_v47 = vand.u32 2147483648, %v1621_v39  ;;  %vm1627_vm10 = vweird.f32 %v1621_v39  ;;  %v1631_v33 = vand.u32 2147483647, %v1621_v39 }
0x19e7   :  { %v1634_v49 = vor.u32 1.1754944e-38, %v1633_v47  ;;  %vm1632_vm0 = vcmp.eq.f32.partialorder %v1631_v33, 8.507059e+37 }
0x19e8   :  { %v3149_v21 = vpop.eup %3148 }
0x19e9   :  { %v1410_v22 = vmul.f32 %v3149_v21, %v1408_v5  ;;  %vm1415_vm4 = vweird.f32 %v3149_v21 }
0x19ea   :  { %vm1416_vm7 = vmor %vm1414_vm6, %vm1415_vm4 }
0x19eb   :  { %v1411_v23 = vsub.f32 1.0, %v1410_v22  ;;  %v3151_v11 = vpop.eup %3150 }
0x19ec   :  { %v1623_v25 = vmul.f32 %v3151_v11, %v1621_v39  ;;  %vm1628_vm9 = vweird.f32 %v3151_v11 }
0x19ed   :  { %v1412_v24 = vmul.f32 %v3149_v21, %v1411_v23  ;;  %vm1629_vm11 = vmor %vm1627_vm10, %vm1628_vm9 }
0x19ee   :  { %v1624_v29 = vsub.f32 1.0, %v1623_v25 }
0x19ef   :  { %v1413_v26 = vadd.f32 %v3149_v21, %v1412_v24 }
0x19f0   :  { %v1625_v32 = vmul.f32 %v3151_v11, %v1624_v29 }
0x19f1   :  { %v1417_v30 = vsel %vm1416_vm7, %v3149_v21, %v1413_v26 }
0x19f2   :  { %v1422_v37 = vsel %vm1419_vm8, %v1421_v31, %v1417_v30  ;;  %v1626_v45 = vadd.f32 %v3151_v11, %v1625_v32 }
0x19f3   :  { %v1425_v13 = vmul.f32 %v1422_v37, %v3960_v59 }
0x19f4   :  { %v1630_v4 = vsel %vm1629_vm11, %v3151_v11, %v1626_v45 }
0x19f5   :  { %v1635_v46 = vsel %vm1632_vm0, %v1634_v49, %v1630_v4 }
0x19f6   :  { %v1641_v43 = vmul.f32 %v1639_v57, %v1635_v46 }
0x1a47   :  { %v1428_v35 = vpop.permute.xlu0 %1427 }
0x1a48   :  { %v1430_v44 = vmul.f32 %v1428_v35, %v1422_v37 }
0x1a4a   :  { %1432 = vrot.lane.b32.xlu2 %v1430_v44, %s3473_s7 }
0x1a51   :  { %v1644_v51 = vpop.permute.xlu1 %1643 }
0x1a52   :  { %v1646_v52 = vmul.f32 %v1644_v51, %v1635_v46 }
0x1a54   :  { %1648 = vrot.lane.b32.xlu0 %v1646_v52, %s3473_s7 }
0x1aa4   :  { %v1433_v54 = vpop.permute.xlu2 %1432 }
0x1aa5   :  { %v3983_v34 = vadd.f32 %v1433_v54, %v1425_v13 }
0x1aa7   :  { %3152 = vtanh.f32 %v3983_v34 }
0x1aad   :  { %v3153_v36 = vpop.eup %3152 }
0x1aae   :  { %1438 = vrot.lane.b32.xlu1 %v3153_v36, %s3472_s30 }
0x1ac6   :  { %v1649_v1 = vpop.permute.xlu0 %1648 }
0x1ac7   :  { %v1651_v2 = vadd.f32 %v1649_v1, %v1641_v43 }
0x1ac9   :  { %3154 = vtanh.f32 %v1651_v2  ;;  %v1709_v25 = vrot.slane %v1651_v2, 6 }
0x1acf   :  { %v3155_v60 = vpop.eup %3154 }
0x1ad0   :  { %1654 = vrot.lane.b32.xlu2 %v3155_v60, %s3472_s30 }
0x1b20   :  { %v1439_v62 = vpop.permute.xlu1 %1438 }
0x1b21   :  { %v1441_v0 = vmul.f32 %v1439_v62, %v1422_v37 }
0x1b23   :  { %1443 = vrot.lane.b32.xlu0 %v1441_v0, %s3473_s7 }
0x1b2a   :  { %v1655_v59 = vpop.permute.xlu2 %1654 }
0x1b2b   :  { %v1657_v3 = vmul.f32 %v1655_v59, %v1635_v46 }
0x1b2d   :  { %v1659_v38 = vrot.slane %v1657_v3, 2 }
0x1b2f   :  { %1660 = vrot.lane.b32.xlu1 %v1659_v38, %s3473_s7 }
0x1b95   :  { %v1444_v40 = vpop.permute.xlu0 %1443 }
0x1b96   :  { %2967 = vmatmul.msk.f32.vlgmr.msrb.gmra.mxu1 %vm290_vm5, %v1444_v40 }
0x1b97   :  { %1882 = vmatpush.msrb.mxu1 %v3900_v50 }
0x1b99   :  { %1883 = vmatpush.msrb.mxu1 %v3902_v53 }
0x1b9b   :  { %1884 = vmatpush.msrb.mxu1 %v3905_v61 }
0x1b9d   :  { %1885 = vmatpush.msrb.mxu1 %v3914_v63 }
0x1ba1   :  { %v3996_v55 = vpop.permute.xlu1 %1660 }
0x1ba2   :  { %2971 = vmatmul.msk.f32.vlgmr.msra.gmra.mxu1 %vm290_vm5, %v3996_v55 }
0x1c13   :  { %v1464_v14 = vpop.f32.mrf.mxu1 }
0x1c14   :  { %v4004_v15 = vadd.f32 %v1464_v14, %v1004_v12 }
0x1c1f   :  { %v1681_v50 = vpop.f32.mrf.mxu1 }
0x1c20   :  { %v1685_v53 = vrot.slane %v1681_v50, 4  ;;  %v4023_v50 = vld [vmem:[#allocation13 + $0x18] sm:$0xff] }
0x1c21   :  { %2089 = vmatpush.msra.mxu0 %v4023_v50  ;;  %2109 = vmatpush.msra.mxu1 %v4023_v50 }
0x1c22   :  { %v1687_v61 = vadd.f32 %v1685_v53, %v3948_v42  ;;  %v4025_v53 = vld [vmem:[#allocation13 + $0x10] sm:$0xff]  ;;  %2129 = vmatpush.msra.mxu2 %v4023_v50 }
0x1c23   :  { %2090 = vmatpush.msra.mxu0 %v4025_v53  ;;  %2110 = vmatpush.msra.mxu1 %v4025_v53 }
0x1c24   :  { %3156 = vtanh.f32 %v1687_v61  ;;  %v1688_v56 = vsub.f32 0.0, %v1687_v61  ;;  %v4029_v61 = vld [vmem:[#allocation13 + $0x8] sm:$0xff]  ;;  %2130 = vmatpush.msra.mxu2 %v4025_v53 }
0x1c25   :  { %2091 = vmatpush.msra.mxu0 %v4029_v61  ;;  %2111 = vmatpush.msra.mxu1 %v4029_v61 }
0x1c26   :  { %v1689_v16 = vmul.f32 1.442695, %v1688_v56  ;;  %2131 = vmatpush.msra.mxu2 %v4029_v61 }
0x1c28   :  { %3158 = vpow2.f32 %v1689_v16  ;;  %v1528_v16 = vpop.f32.mrf.mxu2 }
0x1c2a   :  { %v3157_v63 = vpop.eup %3156 }
0x1c2b   :  { %1713 = vrot.lane.b32.xlu2 %v3157_v63, %s3472_s30  ;;  %v4035_v63 = vld [vmem:[#allocation13] sm:$0xff] }
0x1c2c   :  { %2092 = vmatpush.msra.mxu0 %v4035_v63  ;;  %2112 = vmatpush.msra.mxu1 %v4035_v63 }
0x1c2d   :  { %2132 = vmatpush.msra.mxu2 %v4035_v63 }
0x1c2e   :  { %v3159_v9 = vpop.eup %3158 }
0x1c2f   :  { %v1691_v17 = vadd.f32 1.0, %v3159_v9  ;;  %v4058_v9 = vadd.f32 %v3945_v41, %v1528_v16 }
0x1c31   :  { %3160 = vrcp.f32 %v1691_v17  ;;  %v1703_v20 = vand.u32 2147483648, %v1691_v17  ;;  %vm1697_vm13 = vweird.f32 %v1691_v17  ;;  %v1701_v21 = vand.u32 2147483647, %v1691_v17 }
0x1c33   :  { %v1704_v22 = vor.u32 1.1754944e-38, %v1703_v20  ;;  %vm1702_vm15 = vcmp.eq.f32.partialorder %v1701_v21, 8.507059e+37 }
0x1c37   :  { %v3161_v18 = vpop.eup %3160 }
0x1c38   :  { %v1693_v19 = vmul.f32 %v3161_v18, %v1691_v17  ;;  %vm1698_vm12 = vweird.f32 %v3161_v18 }
0x1c39   :  { %vm1699_vm14 = vmor %vm1697_vm13, %vm1698_vm12 }
0x1c3a   :  { %v1694_v7 = vsub.f32 1.0, %v1693_v19 }
0x1c3c   :  { %v1695_v48 = vmul.f32 %v3161_v18, %v1694_v7 }
0x1c3e   :  { %v1696_v5 = vadd.f32 %v3161_v18, %v1695_v48 }
0x1c40   :  { %v1700_v39 = vsel %vm1699_vm14, %v3161_v18, %v1696_v5 }
0x1c41   :  { %v1705_v11 = vsel %vm1702_vm15, %v1704_v22, %v1700_v39 }
0x1c42   :  { %v1711_v26 = vmul.f32 %v1709_v25, %v1705_v11 }
0x1c85   :  { %v1714_v23 = vpop.permute.xlu2 %1713 }
0x1c86   :  { %v1716_v24 = vmul.f32 %v1714_v23, %v1705_v11 }
0x1c88   :  { %1718 = vrot.lane.b32.xlu0 %v1716_v24, %s3473_s7 }
0x1cfa   :  { %v1719_v27 = vpop.permute.xlu0 %1718 }
0x1cfb   :  { %v1721_v28 = vadd.f32 %v1719_v27, %v1711_v26 }
0x1cfd   :  { %3162 = vtanh.f32 %v1721_v28  ;;  %v1779_v0 = vrot.slane %v1721_v28, 6 }
0x1d03   :  { %v3163_v29 = vpop.eup %3162 }
0x1d04   :  { %1724 = vrot.lane.b32.xlu1 %v3163_v29, %s3472_s30 }
0x1d76   :  { %v1725_v30 = vpop.permute.xlu1 %1724 }
0x1d77   :  { %v1727_v31 = vmul.f32 %v1725_v30, %v1705_v11 }
0x1d79   :  { %v1729_v32 = vrot.slane %v1727_v31, 4 }
0x1d7b   :  { %1730 = vrot.lane.b32.xlu2 %v1729_v32, %s3473_s7 }
0x1dd5   :  { %v4011_v35 = vpop.permute.xlu2 %1730 }
0x1dd6   :  { %2972 = vmatmul.msk.f32.vlgmr.msra.gmra.mxu3 %vm290_vm5, %v4011_v35 }
0x1dd7   :  { %2149 = vmatpush.msra.mxu3 %v4023_v50 }
0x1dd9   :  { %2150 = vmatpush.msra.mxu3 %v4025_v53 }
0x1ddb   :  { %2151 = vmatpush.msra.mxu3 %v4029_v61 }
0x1ddd   :  { %2152 = vmatpush.msra.mxu3 %v4035_v63 }
0x1e59   :  { %v1751_v37 = vpop.f32.mrf.mxu3 }
0x1e5a   :  { %v1755_v44 = vrot.slane %v1751_v37, 2 }
0x1e5c   :  { %v1757_v45 = vadd.f32 %v1755_v44, %v3948_v42 }
0x1e5e   :  { %3164 = vtanh.f32 %v1757_v45  ;;  %v1758_v33 = vsub.f32 0.0, %v1757_v45 }
0x1e60   :  { %v1759_v4 = vmul.f32 1.442695, %v1758_v33  ;;  %v4071_v33 = vld [vmem:[#allocation15 + $0x10] sm:$0xff] }
0x1e62   :  { %3166 = vpow2.f32 %v1759_v4  ;;  %v4074_v4 = vld [vmem:[#allocation15 + $0x8] sm:$0xff] }
0x1e64   :  { %v3165_v47 = vpop.eup %3164 }
0x1e65   :  { %1783 = vrot.lane.b32.xlu0 %v3165_v47, %s3472_s30  ;;  %v4069_v47 = vld [vmem:[#allocation15 + $0x18] sm:$0xff] }
0x1e68   :  { %v3167_v49 = vpop.eup %3166 }
0x1e69   :  { %v1761_v51 = vadd.f32 1.0, %v3167_v49  ;;  %v4077_v49 = vld [vmem:[#allocation15] sm:$0xff] }
0x1e6b   :  { %3168 = vrcp.f32 %v1761_v51  ;;  %v1773_v57 = vand.u32 2147483648, %v1761_v51  ;;  %vm1767_vm2 = vweird.f32 %v1761_v51  ;;  %v1771_v43 = vand.u32 2147483647, %v1761_v51 }
0x1e6d   :  { %v1774_v1 = vor.u32 1.1754944e-38, %v1773_v57  ;;  %vm1772_vm4 = vcmp.eq.f32.partialorder %v1771_v43, 8.507059e+37 }
0x1e71   :  { %v3169_v46 = vpop.eup %3168 }
0x1e72   :  { %v1763_v52 = vmul.f32 %v3169_v46, %v1761_v51  ;;  %vm1768_vm1 = vweird.f32 %v3169_v46 }
0x1e73   :  { %vm1769_vm3 = vmor %vm1767_vm2, %vm1768_vm1 }
0x1e74   :  { %v1764_v13 = vsub.f32 1.0, %v1763_v52 }
0x1e76   :  { %v1765_v54 = vmul.f32 %v3169_v46, %v1764_v13 }
0x1e78   :  { %v1766_v36 = vadd.f32 %v3169_v46, %v1765_v54 }
0x1e7a   :  { %v1770_v42 = vsel %vm1769_vm3, %v3169_v46, %v1766_v36  ;;  %v4103_v36 = vld [vmem:[%s4370_s12] ss:$0 sm:$0xff] }
0x1e7b   :  { %v1775_v60 = vsel %vm1772_vm4, %v1774_v1, %v1770_v42 }
0x1e7c   :  { %v1781_v59 = vmul.f32 %v1779_v0, %v1775_v60 }
0x1ed7   :  { %v1784_v2 = vpop.permute.xlu0 %1783 }
0x1ed8   :  { %v1786_v62 = vmul.f32 %v1784_v2, %v1775_v60 }
0x1eda   :  { %1788 = vrot.lane.b32.xlu1 %v1786_v62, %s3473_s7 }
0x1f4c   :  { %v1789_v3 = vpop.permute.xlu1 %1788 }
0x1f4d   :  { %v4018_v38 = vadd.f32 %v1789_v3, %v1781_v59 }
0x1f4f   :  { %3170 = vtanh.f32 %v4018_v38  ;;  %v1846_v29 = vrot.slane %v4018_v38, 6 }
0x1f55   :  { %v3171_v40 = vpop.eup %3170 }
0x1f56   :  { %1794 = vrot.lane.b32.xlu2 %v3171_v40, %s3472_s30 }
0x1fb0   :  { %v1795_v8 = vpop.permute.xlu2 %1794 }
0x1fb1   :  { %v1797_v12 = vmul.f32 %v1795_v8, %v1775_v60 }
0x1fb3   :  { %v1799_v14 = vrot.slane %v1797_v12, 6 }
0x1fb5   :  { %1800 = vrot.lane.b32.xlu0 %v1799_v14, %s3473_s7 }
0x2027   :  { %v4047_v56 = vpop.permute.xlu0 %1800 }
0x2028   :  { %2973 = vmatmul.msk.f32.vlgmr.msrb.gmra.mxu0 %vm290_vm5, %v4047_v56 }
0x2029   :  { %2169 = vmatpush.msrb.mxu0 %v4023_v50 }
0x202b   :  { %2170 = vmatpush.msrb.mxu0 %v4025_v53 }
0x202d   :  { %2171 = vmatpush.msrb.mxu0 %v4029_v61 }
0x202f   :  { %2172 = vmatpush.msrb.mxu0 %v4035_v63 }
0x2030   :  { %2977 = vmatmul.msk.f32.vlgmr.msra.gmra.mxu0 %vm290_vm5, %v3970_v58 }
0x2031   :  { %2255 = vmatpush.msra.mxu0 %v4069_v47 }
0x2033   :  { %2256 = vmatpush.msra.mxu0 %v4071_v33 }
0x2035   :  { %2257 = vmatpush.msra.mxu0 %v4074_v4 }
0x2037   :  { %2258 = vmatpush.msra.mxu0 %v4077_v49 }
0x20a5   :  { %v1821_v17 = vpop.f32.mrf.mxu0 }
0x20a6   :  { %v1824_v18 = vadd.f32 %v1821_v17, %v4058_v9 }
0x20a8   :  { %3172 = vtanh.f32 %v1824_v18  ;;  %v1825_v7 = vsub.f32 0.0, %v1824_v18 }
0x20aa   :  { %v1826_v48 = vmul.f32 1.442695, %v1825_v7 }
0x20ac   :  { %3174 = vpow2.f32 %v1826_v48 }
0x20ad   :  { %v2094_v46 = vpop.f32.mrf.mxu0 }
0x20ae   :  { %v3173_v19 = vpop.eup %3172 }
0x20af   :  { %1850 = vrot.lane.b32.xlu1 %v3173_v19, %s3472_s30 }
0x20b2   :  { %v3175_v5 = vpop.eup %3174 }
0x20b3   :  { %v1828_v20 = vadd.f32 1.0, %v3175_v5 }
0x20b5   :  { %3176 = vrcp.f32 %v1828_v20  ;;  %v1840_v41 = vand.u32 2147483648, %v1828_v20  ;;  %vm1834_vm7 = vweird.f32 %v1828_v20  ;;  %v1838_v11 = vand.u32 2147483647, %v1828_v20 }
0x20b7   :  { %v1841_v25 = vor.u32 1.1754944e-38, %v1840_v41  ;;  %vm1839_vm9 = vcmp.eq.f32.partialorder %v1838_v11, 8.507059e+37 }
0x20bb   :  { %v3177_v21 = vpop.eup %3176 }
0x20bc   :  { %v1830_v39 = vmul.f32 %v3177_v21, %v1828_v20  ;;  %vm1835_vm6 = vweird.f32 %v3177_v21 }
0x20bd   :  { %vm1836_vm8 = vmor %vm1834_vm7, %vm1835_vm6 }
0x20be   :  { %v1831_v58 = vsub.f32 1.0, %v1830_v39 }
0x20c0   :  { %v1832_v22 = vmul.f32 %v3177_v21, %v1831_v58 }
0x20c2   :  { %v1833_v23 = vadd.f32 %v3177_v21, %v1832_v22 }
0x20c4   :  { %v1837_v24 = vsel %vm1836_vm8, %v3177_v21, %v1833_v23 }
0x20c5   :  { %v1842_v27 = vsel %vm1839_vm9, %v1841_v25, %v1837_v24 }
0x20c6   :  { %v1848_v30 = vmul.f32 %v1846_v29, %v1842_v27 }
0x2121   :  { %v1851_v26 = vpop.permute.xlu1 %1850 }
0x2122   :  { %v1853_v28 = vmul.f32 %v1851_v26, %v1842_v27 }
0x2124   :  { %1855 = vrot.lane.b32.xlu2 %v1853_v28, %s3473_s7 }
0x217e   :  { %v1856_v31 = vpop.permute.xlu2 %1855 }
0x217f   :  { %v4064_v32 = vadd.f32 %v1856_v31, %v1848_v30 }
0x2181   :  { %3178 = vtanh.f32 %v4064_v32  ;;  %v1915_v30 = vrot.slane %v4064_v32, 6 }
0x2187   :  { %v3179_v37 = vpop.eup %3178 }
0x2188   :  { %1861 = vrot.lane.b32.xlu0 %v3179_v37, %s3472_s30 }
0x21fa   :  { %v1862_v44 = vpop.permute.xlu0 %1861 }
0x21fb   :  { %v1864_v45 = vmul.f32 %v1862_v44, %v1842_v27 }
0x21fd   :  { %1866 = vrot.lane.b32.xlu1 %v1864_v45, %s3473_s7 }
0x226f   :  { %v1867_v51 = vpop.permute.xlu1 %1866 }
0x2270   :  { %2974 = vmatmul.msk.f32.vlgmr.msrb.gmra.mxu1 %vm290_vm5, %v1867_v51  ;;  %2981 = vmatmul.msk.f32.vlgmr.msrb.gmra.mxu0 %vm290_vm5, %v1867_v51 }
0x2271   :  { %2189 = vmatpush.msrb.mxu1 %v4023_v50  ;;  %2507 = vmatpush.msrb.mxu0 %v4069_v47 }
0x2273   :  { %2190 = vmatpush.msrb.mxu1 %v4025_v53  ;;  %2508 = vmatpush.msrb.mxu0 %v4071_v33 }
0x2275   :  { %2191 = vmatpush.msrb.mxu1 %v4029_v61  ;;  %2509 = vmatpush.msrb.mxu0 %v4074_v4 }
0x2277   :  { %2192 = vmatpush.msrb.mxu1 %v4035_v63  ;;  %2510 = vmatpush.msrb.mxu0 %v4077_v49 }
0x2278   :  { %2978 = vmatmul.msk.f32.vlgmr.msra.gmra.mxu1 %vm290_vm5, %v3996_v55  ;;  %2259 = vmatmul.f32.vlgmr.msra.gmra.mxu0 %v3471_v10  ;;  %v2095_v55 = vadd.f32 %v4103_v36, %v2094_v46 }
0x2279   :  { %2318 = vmatpush.msra.mxu1 %v4069_v47 }
0x227b   :  { %2319 = vmatpush.msra.mxu1 %v4071_v33 }
0x227d   :  { %2320 = vmatpush.msra.mxu1 %v4074_v4 }
0x227f   :  { %2321 = vmatpush.msra.mxu1 %v4077_v49 }
0x22ed   :  { %v1887_v52 = vpop.f32.mrf.mxu1  ;;  %v4098_v13 = vpop.f32.mrf.mxu0 }
0x22ee   :  { %v1891_v54 = vrot.slane %v1887_v52, 6 }
0x22f0   :  { %v1893_v10 = vadd.f32 %v1891_v54, %v4058_v9 }
0x22f2   :  { %3180 = vtanh.f32 %v1893_v10  ;;  %v1894_v2 = vsub.f32 0.0, %v1893_v10 }
0x22f4   :  { %v1895_v60 = vmul.f32 1.442695, %v1894_v2 }
0x22f5   :  { %v2260_v57 = vpop.f32.mrf.mxu0 }
0x22f6   :  { %v2263_v43 = vadd.f32 %v2260_v57, %v2095_v55 }
0x22f8   :  { %v3181_v42 = vpop.eup %3180  ;;  %3182 = vtanh.f32 %v2263_v43  ;;  %v2264_v3 = vsub.f32 0.0, %v2263_v43 }
0x22f9   :  { %1919 = vrot.lane.b32.xlu2 %v3181_v42, %s3472_s30  ;;  %3184 = vpow2.f32 %v1895_v60 }
0x22fa   :  { %v2265_v40 = vmul.f32 1.442695, %v2264_v3 }
0x22fe   :  { %v3183_v1 = vpop.eup %3182 }
0x22ff   :  { %2286 = vrot.lane.b32.xlu0 %v3183_v1, %s3472_s30  ;;  %v3185_v62 = vpop.eup %3184 }
0x2300   :  { %v1897_v0 = vadd.f32 1.0, %v3185_v62 }
0x2302   :  { %3186 = vrcp.f32 %v1897_v0  ;;  %v1909_v16 = vand.u32 2147483648, %v1897_v0  ;;  %vm1903_vm11 = vweird.f32 %v1897_v0  ;;  %v1907_v18 = vand.u32 2147483647, %v1897_v0 }
0x2303   :  { %3188 = vpow2.f32 %v2265_v40 }
0x2304   :  { %v1910_v48 = vor.u32 1.1754944e-38, %v1909_v16  ;;  %vm1908_vm12 = vcmp.eq.f32.partialorder %v1907_v18, 8.507059e+37 }
0x2308   :  { %v3187_v59 = vpop.eup %3186 }
0x2309   :  { %v1899_v38 = vmul.f32 %v3187_v59, %v1897_v0  ;;  %vm1904_vm10 = vweird.f32 %v3187_v59  ;;  %v3189_v17 = vpop.eup %3188  ;;  %v2114_v0 = vpop.f32.mrf.mxu1 }
0x230a   :  { %vm1905_vm0 = vmor %vm1903_vm11, %vm1904_vm10  ;;  %v2267_v7 = vadd.f32 1.0, %v3189_v17  ;;  %v2115_v3 = vadd.f32 %v4103_v36, %v2114_v0 }
0x230b   :  { %v1900_v8 = vsub.f32 1.0, %v1899_v38 }
0x230c   :  { %3190 = vrcp.f32 %v2267_v7  ;;  %v2279_v11 = vand.u32 2147483648, %v2267_v7  ;;  %vm2273_vm14 = vweird.f32 %v2267_v7  ;;  %v2277_v24 = vand.u32 2147483647, %v2267_v7 }
0x230d   :  { %v1901_v12 = vmul.f32 %v3187_v59, %v1900_v8 }
0x230e   :  { %v2280_v26 = vor.u32 1.1754944e-38, %v2279_v11  ;;  %vm2278_vm1 = vcmp.eq.f32.partialorder %v2277_v24, 8.507059e+37 }
0x230f   :  { %v1902_v14 = vadd.f32 %v3187_v59, %v1901_v12 }
0x2311   :  { %v1906_v19 = vsel %vm1905_vm0, %v3187_v59, %v1902_v14 }
0x2312   :  { %v1911_v20 = vsel %vm1908_vm12, %v1910_v48, %v1906_v19  ;;  %v3191_v39 = vpop.eup %3190 }
0x2313   :  { %v2269_v58 = vmul.f32 %v3191_v39, %v2267_v7  ;;  %vm2274_vm13 = vweird.f32 %v3191_v39  ;;  %v1917_v31 = vmul.f32 %v1915_v30, %v1911_v20 }
0x2314   :  { %vm2275_vm15 = vmor %vm2273_vm14, %vm2274_vm13 }
0x2315   :  { %v2270_v22 = vsub.f32 1.0, %v2269_v58 }
0x2317   :  { %v2271_v23 = vmul.f32 %v3191_v39, %v2270_v22 }
0x2319   :  { %v2272_v41 = vadd.f32 %v3191_v39, %v2271_v23 }
0x231b   :  { %v2276_v25 = vsel %vm2275_vm15, %v3191_v39, %v2272_v41 }
0x231c   :  { %v2281_v28 = vsel %vm2278_vm1, %v2280_v26, %v2276_v25 }
0x231d   :  { %v2284_v45 = vmul.f32 0.0, %v2281_v28 }
0x2353   :  { %v1920_v5 = vpop.permute.xlu2 %1919 }
0x2354   :  { %v1922_v21 = vmul.f32 %v1920_v5, %v1911_v20 }
0x2356   :  { %1924 = vrot.lane.b32.xlu1 %v1922_v21, %s3473_s7 }
0x2371   :  { %v2287_v27 = vpop.permute.xlu0 %2286 }
0x2372   :  { %v2289_v29 = vmul.f32 %v2287_v27, %v2281_v28 }
0x2374   :  { %2291 = vrot.lane.b32.xlu2 %v2289_v29, %s3473_s7 }
0x23c8   :  { %v1925_v37 = vpop.permute.xlu1 %1924 }
0x23c9   :  { %v4112_v44 = vadd.f32 %v1925_v37, %v1917_v31 }
0x23cb   :  { %3192 = vtanh.f32 %v4112_v44 }
0x23ce   :  { %v2292_v51 = vpop.permute.xlu2 %2291 }
0x23cf   :  { %v4115_v46 = vadd.f32 %v2292_v51, %v2284_v45 }
0x23d1   :  { %v3193_v52 = vpop.eup %3192  ;;  %3194 = vtanh.f32 %v4115_v46 }
0x23d2   :  { %1930 = vrot.lane.b32.xlu0 %v3193_v52, %s3472_s30 }
0x23d7   :  { %v3195_v54 = vpop.eup %3194 }
0x23d8   :  { %2297 = vrot.lane.b32.xlu1 %v3195_v54, %s3472_s30 }
0x2444   :  { %v1931_v10 = vpop.permute.xlu0 %1930 }
0x2445   :  { %v1933_v32 = vmul.f32 %v1931_v10, %v1911_v20 }
0x2447   :  { %v1935_v55 = vrot.slane %v1933_v32, 2 }
0x2449   :  { %1936 = vrot.lane.b32.xlu2 %v1935_v55, %s3473_s7 }
0x244a   :  { %v2298_v57 = vpop.permute.xlu1 %2297 }
0x244b   :  { %v2300_v43 = vmul.f32 %v2298_v57, %v2281_v28 }
0x244d   :  { %2302 = vrot.lane.b32.xlu0 %v2300_v43, %s3473_s7  ;;  %v1985_v43 = vrot.slane %v4112_v44, 6 }
0x24a3   :  { %v1937_v42 = vpop.permute.xlu2 %1936 }
0x24a4   :  { %2975 = vmatmul.msk.f32.vlgmr.msrb.gmra.mxu2 %vm290_vm5, %v1937_v42  ;;  %2982 = vmatmul.msk.f32.vlgmr.msrb.gmra.mxu1 %vm290_vm5, %v1937_v42 }
0x24a5   :  { %2209 = vmatpush.msrb.mxu2 %v4023_v50  ;;  %2570 = vmatpush.msrb.mxu1 %v4069_v47 }
0x24a7   :  { %2210 = vmatpush.msrb.mxu2 %v4025_v53  ;;  %2571 = vmatpush.msrb.mxu1 %v4071_v33 }
0x24a9   :  { %2211 = vmatpush.msrb.mxu2 %v4029_v61  ;;  %2572 = vmatpush.msrb.mxu1 %v4074_v4 }
0x24ab   :  { %2212 = vmatpush.msrb.mxu2 %v4035_v63  ;;  %2573 = vmatpush.msrb.mxu1 %v4077_v49 }
0x24ac   :  { %2979 = vmatmul.msk.f32.vlgmr.msra.gmra.mxu2 %vm290_vm5, %v4011_v35 }
0x24ad   :  { %2381 = vmatpush.msra.mxu2 %v4069_v47 }
0x24af   :  { %2382 = vmatpush.msra.mxu2 %v4071_v33 }
0x24b1   :  { %2383 = vmatpush.msra.mxu2 %v4074_v4 }
0x24b3   :  { %2384 = vmatpush.msra.mxu2 %v4077_v49 }
0x24bf   :  { %v2303_v1 = vpop.permute.xlu0 %2302 }
0x24c0   :  { %2985 = vmatmul.msk.f32.vlgmr.msra.gmra.mxu1 %vm290_vm5, %v2303_v1 }
0x2521   :  { %v4141_v35 = vpop.f32.mrf.mxu1 }
0x2527   :  { %v1957_v2 = vpop.f32.mrf.mxu2 }
0x2528   :  { %v1961_v60 = vrot.slane %v1957_v2, 4 }
0x252a   :  { %v1963_v62 = vadd.f32 %v1961_v60, %v4058_v9 }
0x252c   :  { %3196 = vtanh.f32 %v1963_v62  ;;  %v1964_v14 = vsub.f32 0.0, %v1963_v62 }
0x252e   :  { %v1965_v17 = vmul.f32 1.442695, %v1964_v14 }
0x2532   :  { %v3197_v59 = vpop.eup %3196 }
0x2533   :  { %1989 = vrot.lane.b32.xlu1 %v3197_v59, %s3472_s30 }
0x253d   :  { %v2323_v38 = vpop.f32.mrf.mxu1 }
0x253e   :  { %v2326_v40 = vadd.f32 %v2323_v38, %v2115_v3 }
0x2540   :  { %3198 = vtanh.f32 %v2326_v40  ;;  %v2327_v12 = vsub.f32 0.0, %v2326_v40 }
0x2542   :  { %v2328_v16 = vmul.f32 1.442695, %v2327_v12 }
0x2544   :  { %3200 = vpow2.f32 %v2328_v16 }
0x2545   :  { %3202 = vpow2.f32 %v1965_v17 }
0x2546   :  { %v3199_v8 = vpop.eup %3198 }
0x2547   :  { %2349 = vrot.lane.b32.xlu2 %v3199_v8, %s3472_s30 }
0x254a   :  { %v3201_v18 = vpop.eup %3200 }
0x254b   :  { %v2330_v19 = vadd.f32 1.0, %v3201_v18  ;;  %v3203_v7 = vpop.eup %3202 }
0x254c   :  { %v1967_v48 = vadd.f32 1.0, %v3203_v7 }
0x254d   :  { %3204 = vrcp.f32 %v2330_v19  ;;  %v2342_v24 = vand.u32 2147483648, %v2330_v19  ;;  %vm2336_vm3 = vweird.f32 %v2330_v19  ;;  %v2340_v25 = vand.u32 2147483647, %v2330_v19 }
0x254e   :  { %3206 = vrcp.f32 %v1967_v48  ;;  %v1979_v29 = vand.u32 2147483648, %v1967_v48  ;;  %vm1973_vm8 = vweird.f32 %v1967_v48  ;;  %v1977_v30 = vand.u32 2147483647, %v1967_v48 }
0x254f   :  { %v2343_v28 = vor.u32 1.1754944e-38, %v2342_v24  ;;  %vm2341_vm7 = vcmp.eq.f32.partialorder %v2340_v25, 8.507059e+37 }
0x2550   :  { %v1980_v52 = vor.u32 1.1754944e-38, %v1979_v29  ;;  %vm1978_vm10 = vcmp.eq.f32.partialorder %v1977_v30, 8.507059e+37 }
0x2553   :  { %v3205_v5 = vpop.eup %3204 }
0x2554   :  { %v2332_v20 = vmul.f32 %v3205_v5, %v2330_v19  ;;  %v3207_v21 = vpop.eup %3206  ;;  %vm2337_vm2 = vweird.f32 %v3205_v5 }
0x2555   :  { %v1969_v58 = vmul.f32 %v3207_v21, %v1967_v48  ;;  %vm2338_vm4 = vmor %vm2336_vm3, %vm2337_vm2  ;;  %vm1974_vm6 = vweird.f32 %v3207_v21 }
0x2556   :  { %v2333_v39 = vsub.f32 1.0, %v2332_v20  ;;  %vm1975_vm9 = vmor %vm1973_vm8, %vm1974_vm6 }
0x2557   :  { %v1970_v23 = vsub.f32 1.0, %v1969_v58 }
0x2558   :  { %v2334_v22 = vmul.f32 %v3205_v5, %v2333_v39 }
0x2559   :  { %v1971_v11 = vmul.f32 %v3207_v21, %v1970_v23 }
0x255a   :  { %v2335_v41 = vadd.f32 %v3205_v5, %v2334_v22 }
0x255b   :  { %v1972_v27 = vadd.f32 %v3207_v21, %v1971_v11 }
0x255c   :  { %v2339_v26 = vsel %vm2338_vm4, %v3205_v5, %v2335_v41 }
0x255d   :  { %v2344_v37 = vsel %vm2341_vm7, %v2343_v28, %v2339_v26  ;;  %v1976_v51 = vsel %vm1975_vm9, %v3207_v21, %v1972_v27 }
0x255e   :  { %v1981_v10 = vsel %vm1978_vm10, %v1980_v52, %v1976_v51  ;;  %v2347_v55 = vmul.f32 %v2344_v37, %v4115_v46 }
0x255f   :  { %v1987_v1 = vmul.f32 %v1985_v43, %v1981_v10 }
0x25a1   :  { %v2350_v31 = vpop.permute.xlu2 %2349 }
0x25a2   :  { %v2352_v45 = vmul.f32 %v2350_v31, %v2344_v37 }
0x25a4   :  { %2354 = vrot.lane.b32.xlu1 %v2352_v45, %s3473_s7 }
0x25a5   :  { %v1990_v54 = vpop.permute.xlu1 %1989 }
0x25a6   :  { %v1992_v32 = vmul.f32 %v1990_v54, %v1981_v10 }
0x25a8   :  { %1994 = vrot.lane.b32.xlu0 %v1992_v32, %s3473_s7 }
0x2616   :  { %v2355_v57 = vpop.permute.xlu1 %2354 }
0x2617   :  { %v4149_v42 = vadd.f32 %v2355_v57, %v2347_v55 }
0x2619   :  { %3208 = vtanh.f32 %v4149_v42 }
0x261a   :  { %v1995_v2 = vpop.permute.xlu0 %1994 }
0x261b   :  { %v4152_v60 = vadd.f32 %v1995_v2, %v1987_v1 }
0x261d   :  { %3210 = vtanh.f32 %v4152_v60  ;;  %v2055_v2 = vrot.slane %v4152_v60, 6 }
0x261f   :  { %v3209_v62 = vpop.eup %3208 }
0x2620   :  { %2360 = vrot.lane.b32.xlu0 %v3209_v62, %s3472_s30 }
0x2623   :  { %v3211_v0 = vpop.eup %3210 }
0x2624   :  { %2000 = vrot.lane.b32.xlu2 %v3211_v0, %s3472_s30 }
0x267e   :  { %v2001_v46 = vpop.permute.xlu2 %2000 }
0x267f   :  { %v2003_v59 = vmul.f32 %v2001_v46, %v1981_v10 }
0x2681   :  { %v2005_v3 = vrot.slane %v2003_v59, 4 }
0x2683   :  { %2006 = vrot.lane.b32.xlu1 %v2005_v3, %s3473_s7 }
0x2692   :  { %v2361_v44 = vpop.permute.xlu0 %2360 }
0x2693   :  { %v2363_v38 = vmul.f32 %v2361_v44, %v2344_v37 }
0x2695   :  { %2365 = vrot.lane.b32.xlu2 %v2363_v38, %s3473_s7 }
0x26ef   :  { %v2366_v8 = vpop.permute.xlu2 %2365 }
0x26f5   :  { %v2007_v40 = vpop.permute.xlu1 %2006 }
0x26f6   :  { %2976 = vmatmul.msk.f32.vlgmr.msrb.gmra.mxu3 %vm290_vm5, %v2007_v40  ;;  %2983 = vmatmul.msk.f32.vlgmr.msrb.gmra.mxu2 %vm290_vm5, %v2007_v40 }
0x26f7   :  { %2235 = vmatpush.msrb.mxu3 %v4023_v50  ;;  %2633 = vmatpush.msrb.mxu2 %v4069_v47  ;;  %v2134_v50 = vpop.f32.mrf.mxu2 }
0x26f9   :  { %2236 = vmatpush.msrb.mxu3 %v4025_v53  ;;  %2634 = vmatpush.msrb.mxu2 %v4071_v33 }
0x26fb   :  { %2237 = vmatpush.msrb.mxu3 %v4029_v61  ;;  %2635 = vmatpush.msrb.mxu2 %v4074_v4 }
0x26fd   :  { %2238 = vmatpush.msrb.mxu3 %v4035_v63  ;;  %2636 = vmatpush.msrb.mxu2 %v4077_v49 }
0x26fe   :  { %2980 = vmatmul.msk.f32.vlgmr.msra.gmra.mxu3 %vm290_vm5, %v4047_v56  ;;  %2986 = vmatmul.msk.f32.vlgmr.msra.gmra.mxu2 %vm290_vm5, %v2366_v8  ;;  %v2135_v56 = vadd.f32 %v4103_v36, %v2134_v50 }
0x26ff   :  { %2444 = vmatpush.msra.mxu3 %v4069_v47 }
0x2701   :  { %2445 = vmatpush.msra.mxu3 %v4071_v33 }
0x2703   :  { %2446 = vmatpush.msra.mxu3 %v4074_v4 }
0x2705   :  { %2447 = vmatpush.msra.mxu3 %v4077_v49 }
0x2779   :  { %v2027_v53 = vpop.f32.mrf.mxu3  ;;  %v4176_v61 = vpop.f32.mrf.mxu2 }
0x277a   :  { %v2031_v63 = vrot.slane %v2027_v53, 2 }
0x277c   :  { %v2033_v12 = vadd.f32 %v2031_v63, %v4058_v9 }
0x277e   :  { %3212 = vtanh.f32 %v2033_v12  ;;  %v2034_v19 = vsub.f32 0.0, %v2033_v12 }
0x2780   :  { %v2035_v7 = vmul.f32 1.442695, %v2034_v19 }
0x2781   :  { %v2386_v14 = vpop.f32.mrf.mxu2 }
0x2782   :  { %v2389_v16 = vadd.f32 %v2386_v14, %v2135_v56  ;;  %v2154_v56 = vpop.f32.mrf.mxu3 }
0x2784   :  { %v3213_v17 = vpop.eup %3212  ;;  %3214 = vtanh.f32 %v2389_v16  ;;  %v2390_v48 = vsub.f32 0.0, %v2389_v16  ;;  %v2155_v16 = vadd.f32 %v4103_v36, %v2154_v56  ;;  %v221_v56 = vld [vmem:[%s4371_s13 + $0x8] sm:$0xff] }
0x2785   :  { %2059 = vrot.lane.b32.xlu0 %v3213_v17, %s3472_s30  ;;  %3216 = vpow2.f32 %v2035_v7 }
0x2786   :  { %v2391_v5 = vmul.f32 1.442695, %v2390_v48 }
0x2788   :  { %3218 = vpow2.f32 %v2391_v5 }
0x278a   :  { %v3215_v18 = vpop.eup %3214 }
0x278b   :  { %2412 = vrot.lane.b32.xlu1 %v3215_v18, %s3472_s30  ;;  %v3217_v20 = vpop.eup %3216 }
0x278c   :  { %v2037_v9 = vadd.f32 1.0, %v3217_v20 }
0x278e   :  { %v3219_v21 = vpop.eup %3218  ;;  %3220 = vrcp.f32 %v2037_v9  ;;  %v2049_v27 = vand.u32 2147483648, %v2037_v9  ;;  %vm2043_vm0 = vweird.f32 %v2037_v9  ;;  %v2047_v28 = vand.u32 2147483647, %v2037_v9 }
0x278f   :  { %v2393_v39 = vadd.f32 1.0, %v3219_v21 }
0x2790   :  { %v2050_v31 = vor.u32 1.1754944e-38, %v2049_v27  ;;  %vm2048_vm13 = vcmp.eq.f32.partialorder %v2047_v28, 8.507059e+37 }
0x2791   :  { %3222 = vrcp.f32 %v2393_v39  ;;  %v2405_v52 = vand.u32 2147483648, %v2393_v39  ;;  %vm2399_vm15 = vweird.f32 %v2393_v39  ;;  %v2403_v10 = vand.u32 2147483647, %v2393_v39 }
0x2793   :  { %v2406_v55 = vor.u32 1.1754944e-38, %v2405_v52  ;;  %vm2404_vm2 = vcmp.eq.f32.partialorder %v2403_v10, 8.507059e+37 }
0x2794   :  { %v3221_v58 = vpop.eup %3220 }
0x2795   :  { %v2039_v22 = vmul.f32 %v3221_v58, %v2037_v9  ;;  %vm2044_vm11 = vweird.f32 %v3221_v58 }
0x2796   :  { %vm2045_vm12 = vmor %vm2043_vm0, %vm2044_vm11 }
0x2797   :  { %v3223_v23 = vpop.eup %3222  ;;  %v2040_v41 = vsub.f32 1.0, %v2039_v22 }
0x2798   :  { %v2395_v11 = vmul.f32 %v3223_v23, %v2393_v39  ;;  %vm2400_vm14 = vweird.f32 %v3223_v23 }
0x2799   :  { %v2041_v24 = vmul.f32 %v3221_v58, %v2040_v41  ;;  %vm2401_vm1 = vmor %vm2399_vm15, %vm2400_vm14 }
0x279a   :  { %v2396_v25 = vsub.f32 1.0, %v2395_v11 }
0x279b   :  { %v2042_v26 = vadd.f32 %v3221_v58, %v2041_v24 }
0x279c   :  { %v2397_v29 = vmul.f32 %v3223_v23, %v2396_v25 }
0x279d   :  { %v2046_v30 = vsel %vm2045_vm12, %v3221_v58, %v2042_v26 }
0x279e   :  { %v2398_v37 = vadd.f32 %v3223_v23, %v2397_v29  ;;  %v2051_v45 = vsel %vm2048_vm13, %v2050_v31, %v2046_v30  ;;  %v2175_v31 = vadd.f32 %v4103_v36, %v4098_v13 }
0x279f   :  { %v2057_v62 = vmul.f32 %v2055_v2, %v2051_v45 }
0x27a0   :  { %v2402_v32 = vsel %vm2401_vm1, %v3223_v23, %v2398_v37 }
0x27a1   :  { %v2407_v43 = vsel %vm2404_vm2, %v2406_v55, %v2402_v32 }
0x27a2   :  { %v2410_v3 = vmul.f32 %v2407_v43, %v4149_v42 }
0x27f7   :  { %v2060_v51 = vpop.permute.xlu0 %2059 }
0x27f8   :  { %v2062_v54 = vmul.f32 %v2060_v51, %v2051_v45 }
0x27fa   :  { %2064 = vrot.lane.b32.xlu2 %v2062_v54, %s3473_s7 }
0x27fd   :  { %v2413_v57 = vpop.permute.xlu1 %2412 }
0x27fe   :  { %v2415_v1 = vmul.f32 %v2413_v57, %v2407_v43 }
0x2800   :  { %2417 = vrot.lane.b32.xlu0 %v2415_v1, %s3473_s7 }
0x2854   :  { %v2065_v0 = vpop.permute.xlu2 %2064 }
0x2855   :  { %v2067_v46 = vadd.f32 %v2065_v0, %v2057_v62 }
0x2857   :  { %3224 = vtanh.f32 %v2067_v46 }
0x285d   :  { %v3225_v59 = vpop.eup %3224 }
0x285e   :  { %2070 = vrot.lane.b32.xlu1 %v3225_v59, %s3472_s30 }
0x2872   :  { %v2418_v44 = vpop.permute.xlu0 %2417 }
0x2873   :  { %v2420_v38 = vadd.f32 %v2418_v44, %v2410_v3 }
0x2875   :  { %3226 = vtanh.f32 %v2420_v38 }
0x287b   :  { %v3227_v40 = vpop.eup %3226 }
0x287c   :  { %2423 = vrot.lane.b32.xlu2 %v3227_v40, %s3472_s30 }
0x28d0   :  { %v2071_v8 = vpop.permute.xlu1 %2070 }
0x28d1   :  { %v2073_v50 = vmul.f32 %v2071_v8, %v2051_v45 }
0x28d3   :  { %v2218_v53 = vrot.slane %v2073_v50, 6 }
0x28d5   :  { %2219 = vrot.lane.b32.xlu0 %v2218_v53, %s3473_s7 }
0x28d6   :  { %v2424_v60 = vpop.permute.xlu2 %2423 }
0x28d7   :  { %v2426_v63 = vmul.f32 %v2424_v60, %v2407_v43 }
0x28d9   :  { %2428 = vrot.lane.b32.xlu1 %v2426_v63, %s3473_s7  ;;  %v223_v63 = vld [vmem:[%s4371_s13 + $0x18] sm:$0xff] }
0x28da   :  { %2779 = vmatpush.msra.mxu1 %v223_v63 }
0x2947   :  { %v4190_v12 = vpop.permute.xlu0 %2219 }
0x2948   :  { %2984 = vmatmul.msk.f32.vlgmr.msrb.gmra.mxu3 %vm290_vm5, %v4190_v12 }
0x2949   :  { %2696 = vmatpush.msrb.mxu3 %v4069_v47 }
0x294b   :  { %2697 = vmatpush.msrb.mxu3 %v4071_v33  ;;  %v2429_v42 = vpop.permute.xlu1 %2428 }
0x294d   :  { %2698 = vmatpush.msrb.mxu3 %v4074_v4 }
0x294f   :  { %2699 = vmatpush.msrb.mxu3 %v4077_v49 }
0x2950   :  { %2987 = vmatmul.msk.f32.vlgmr.msra.gmra.mxu3 %vm290_vm5, %v2429_v42  ;;  %v222_v42 = vld [vmem:[%s4371_s13 + $0x10] sm:$0xff] }
0x2951   :  { %2780 = vmatpush.msra.mxu1 %v222_v42 }
0x2953   :  { %2781 = vmatpush.msra.mxu1 %v221_v56 }
0x29cb   :  { %v4199_v14 = vpop.f32.mrf.mxu3 }
0x29d3   :  { %v2449_v17 = vpop.f32.mrf.mxu3 }
0x29d4   :  { %v2452_v18 = vadd.f32 %v2449_v17, %v2155_v16  ;;  %v220_v16 = vld [vmem:[%s4371_s13] sm:$0xff] }
0x29d5   :  { %2782 = vmatpush.msra.mxu1 %v220_v16 }
0x29d6   :  { %3228 = vtanh.f32 %v2452_v18  ;;  %v2453_v47 = vsub.f32 0.0, %v2452_v18  ;;  %v2195_v18 = vadd.f32 %v4103_v36, %v4141_v35 }
0x29d8   :  { %v2454_v33 = vmul.f32 1.442695, %v2453_v47 }
0x29da   :  { %3230 = vpow2.f32 %v2454_v33 }
0x29dc   :  { %v3229_v19 = vpop.eup %3228 }
0x29dd   :  { %2475 = vrot.lane.b32.xlu2 %v3229_v19, %s3472_s30 }
0x29e0   :  { %v3231_v4 = vpop.eup %3230 }
0x29e1   :  { %v2456_v7 = vadd.f32 1.0, %v3231_v4 }
0x29e3   :  { %3232 = vrcp.f32 %v2456_v7  ;;  %v2468_v21 = vand.u32 2147483648, %v2456_v7  ;;  %vm2462_vm4 = vweird.f32 %v2456_v7  ;;  %v2466_v39 = vand.u32 2147483647, %v2456_v7 }
0x29e5   :  { %v2469_v22 = vor.u32 1.1754944e-38, %v2468_v21  ;;  %vm2467_vm7 = vcmp.eq.f32.partialorder %v2466_v39, 8.507059e+37 }
0x29e9   :  { %v3233_v49 = vpop.eup %3232 }
0x29ea   :  { %v2458_v48 = vmul.f32 %v3233_v49, %v2456_v7  ;;  %vm2463_vm3 = vweird.f32 %v3233_v49 }
0x29eb   :  { %vm2464_vm6 = vmor %vm2462_vm4, %vm2463_vm3 }
0x29ec   :  { %v2459_v5 = vsub.f32 1.0, %v2458_v48 }
0x29ee   :  { %v2460_v20 = vmul.f32 %v3233_v49, %v2459_v5 }
0x29f0   :  { %v2461_v9 = vadd.f32 %v3233_v49, %v2460_v20 }
0x29f2   :  { %v2465_v58 = vsel %vm2464_vm6, %v3233_v49, %v2461_v9 }
0x29f3   :  { %v2470_v41 = vsel %vm2467_vm7, %v2469_v22, %v2465_v58 }
0x29f4   :  { %v2473_v24 = vmul.f32 %v2470_v41, %v2420_v38 }
0x2a37   :  { %v2476_v23 = vpop.permute.xlu2 %2475 }
0x2a38   :  { %v2478_v11 = vmul.f32 %v2476_v23, %v2470_v41 }
0x2a3a   :  { %2480 = vrot.lane.b32.xlu0 %v2478_v11, %s3473_s7 }
0x2aac   :  { %v2481_v25 = vpop.permute.xlu0 %2480 }
0x2aad   :  { %v2483_v26 = vadd.f32 %v2481_v25, %v2473_v24 }
0x2aaf   :  { %3234 = vtanh.f32 %v2483_v26 }
0x2ab5   :  { %v3235_v27 = vpop.eup %3234 }
0x2ab6   :  { %2486 = vrot.lane.b32.xlu1 %v3235_v27, %s3472_s30 }
0x2b28   :  { %v2487_v28 = vpop.permute.xlu1 %2486 }
0x2b29   :  { %v2489_v29 = vmul.f32 %v2487_v28, %v2470_v41 }
0x2b2b   :  { %2491 = vrot.lane.b32.xlu2 %v2489_v29, %s3473_s7 }
0x2b85   :  { %v2492_v30 = vpop.permute.xlu2 %2491 }
0x2b86   :  { %2988 = vmatmul.msk.f32.vlgmr.msrb.gmra.mxu0 %vm290_vm5, %v2492_v30 }
0x2c03   :  { %v2512_v37 = vpop.f32.mrf.mxu0 }
0x2c04   :  { %v2515_v45 = vadd.f32 %v2512_v37, %v2175_v31  ;;  %v2215_v31 = vadd.f32 %v4103_v36, %v4176_v61 }
0x2c06   :  { %3236 = vtanh.f32 %v2515_v45  ;;  %v2516_v52 = vsub.f32 0.0, %v2515_v45 }
0x2c08   :  { %v2517_v54 = vmul.f32 1.442695, %v2516_v52 }
0x2c0a   :  { %3238 = vpow2.f32 %v2517_v54 }
0x2c0c   :  { %v3237_v51 = vpop.eup %3236 }
0x2c0d   :  { %2538 = vrot.lane.b32.xlu0 %v3237_v51, %s3472_s30 }
0x2c10   :  { %v3239_v10 = vpop.eup %3238 }
0x2c11   :  { %v2519_v32 = vadd.f32 1.0, %v3239_v10 }
0x2c13   :  { %3240 = vrcp.f32 %v2519_v32  ;;  %v2531_v62 = vand.u32 2147483648, %v2519_v32  ;;  %vm2525_vm9 = vweird.f32 %v2519_v32  ;;  %v2529_v13 = vand.u32 2147483647, %v2519_v32 }
0x2c15   :  { %v2532_v46 = vor.u32 1.1754944e-38, %v2531_v62  ;;  %vm2530_vm11 = vcmp.eq.f32.partialorder %v2529_v13, 8.507059e+37 }
0x2c19   :  { %v3241_v55 = vpop.eup %3240 }
0x2c1a   :  { %v2521_v57 = vmul.f32 %v3241_v55, %v2519_v32  ;;  %vm2526_vm8 = vweird.f32 %v3241_v55 }
0x2c1b   :  { %vm2527_vm10 = vmor %vm2525_vm9, %vm2526_vm8 }
0x2c1c   :  { %v2522_v43 = vsub.f32 1.0, %v2521_v57 }
0x2c1e   :  { %v2523_v1 = vmul.f32 %v3241_v55, %v2522_v43 }
0x2c20   :  { %v2524_v2 = vadd.f32 %v3241_v55, %v2523_v1 }
0x2c22   :  { %v2528_v0 = vsel %vm2527_vm10, %v3241_v55, %v2524_v2 }
0x2c23   :  { %v2533_v3 = vsel %vm2530_vm11, %v2532_v46, %v2528_v0 }
0x2c24   :  { %v2536_v38 = vmul.f32 %v2533_v3, %v2483_v26 }
0x2c7f   :  { %v2539_v59 = vpop.permute.xlu0 %2538 }
0x2c80   :  { %v2541_v44 = vmul.f32 %v2539_v59, %v2533_v3 }
0x2c82   :  { %2543 = vrot.lane.b32.xlu1 %v2541_v44, %s3473_s7 }
0x2cf4   :  { %v2544_v40 = vpop.permute.xlu1 %2543 }
0x2cf5   :  { %v2546_v8 = vadd.f32 %v2544_v40, %v2536_v38 }
0x2cf7   :  { %3242 = vtanh.f32 %v2546_v8 }
0x2cfd   :  { %v3243_v50 = vpop.eup %3242 }
0x2cfe   :  { %2549 = vrot.lane.b32.xlu2 %v3243_v50, %s3472_s30 }
0x2d58   :  { %v2550_v53 = vpop.permute.xlu2 %2549 }
0x2d59   :  { %v2552_v60 = vmul.f32 %v2550_v53, %v2533_v3  ;;  %v1468_v53 = vsub.f32 0.0, %v4004_v15 }
0x2d5b   :  { %2554 = vrot.lane.b32.xlu0 %v2552_v60, %s3473_s7  ;;  %v1469_v60 = vmul.f32 1.442695, %v1468_v53  ;;  %v232_v53 = vld [vmem:[%s4373_s15 + $0x18] sm:$0xff] }
0x2dcd   :  { %v2555_v17 = vpop.permute.xlu0 %2554 }
0x2dce   :  { %2989 = vmatmul.msk.f32.vlgmr.msrb.gmra.mxu1 %vm290_vm5, %v2555_v17 }
0x2dd6   :  { %2993 = vmatmul.msk.f32.vlgmr.msra.gmra.mxu1 %vm290_vm5, %v3874_v6 }
0x2e4b   :  { %v2575_v19 = vpop.f32.mrf.mxu1 }
0x2e4c   :  { %v2578_v47 = vadd.f32 %v2575_v19, %v2195_v18 }
0x2e4e   :  { %3244 = vtanh.f32 %v2578_v47  ;;  %v2579_v4 = vsub.f32 0.0, %v2578_v47 }
0x2e50   :  { %v2580_v7 = vmul.f32 1.442695, %v2579_v4 }
0x2e52   :  { %3246 = vpow2.f32 %v2580_v7 }
0x2e54   :  { %v3245_v33 = vpop.eup %3244 }
0x2e55   :  { %2601 = vrot.lane.b32.xlu1 %v3245_v33, %s3472_s30 }
0x2e58   :  { %v3247_v49 = vpop.eup %3246 }
0x2e59   :  { %v2582_v48 = vadd.f32 1.0, %v3247_v49 }
0x2e5b   :  { %3248 = vrcp.f32 %v2582_v48  ;;  %v2594_v39 = vand.u32 2147483648, %v2582_v48  ;;  %vm2588_vm12 = vweird.f32 %v2582_v48  ;;  %v2592_v35 = vand.u32 2147483647, %v2582_v48 }
0x2e5d   :  { %v2595_v22 = vor.u32 1.1754944e-38, %v2594_v39  ;;  %vm2593_vm14 = vcmp.eq.f32.partialorder %v2592_v35, 8.507059e+37 }
0x2e61   :  { %v3249_v5 = vpop.eup %3248 }
0x2e62   :  { %v2584_v20 = vmul.f32 %v3249_v5, %v2582_v48  ;;  %vm2589_vm0 = vweird.f32 %v3249_v5 }
0x2e63   :  { %vm2590_vm13 = vmor %vm2588_vm12, %vm2589_vm0  ;;  %vm2800_vm12 = vcmask 523264  }
0x2e64   :  { %v2585_v9 = vsub.f32 1.0, %v2584_v20 }
0x2e66   :  { %v2586_v21 = vmul.f32 %v3249_v5, %v2585_v9 }
0x2e68   :  { %v2587_v6 = vadd.f32 %v3249_v5, %v2586_v21  ;;  %v2241_v21 = vadd.f32 %v4103_v36, %v4199_v14 }
0x2e6a   :  { %v2591_v58 = vsel %vm2590_vm13, %v3249_v5, %v2587_v6 }
0x2e6b   :  { %v2596_v41 = vsel %vm2593_vm14, %v2595_v22, %v2591_v58 }
0x2e6c   :  { %v2599_v24 = vmul.f32 %v2596_v41, %v2546_v8 }
0x2ec7   :  { %v2602_v23 = vpop.permute.xlu1 %2601 }
0x2ec8   :  { %v2604_v11 = vmul.f32 %v2602_v23, %v2596_v41 }
0x2eca   :  { %2606 = vrot.lane.b32.xlu2 %v2604_v11, %s3473_s7 }
0x2f24   :  { %v2607_v25 = vpop.permute.xlu2 %2606 }
0x2f25   :  { %v2609_v26 = vadd.f32 %v2607_v25, %v2599_v24 }
0x2f27   :  { %3250 = vtanh.f32 %v2609_v26 }
0x2f2d   :  { %v3251_v27 = vpop.eup %3250 }
0x2f2e   :  { %2612 = vrot.lane.b32.xlu0 %v3251_v27, %s3472_s30 }
0x2fa0   :  { %v2613_v28 = vpop.permute.xlu0 %2612 }
0x2fa1   :  { %v2615_v29 = vmul.f32 %v2613_v28, %v2596_v41 }
0x2fa3   :  { %2617 = vrot.lane.b32.xlu1 %v2615_v29, %s3473_s7 }
0x3015   :  { %v2618_v30 = vpop.permute.xlu1 %2617 }
0x3016   :  { %2990 = vmatmul.msk.f32.vlgmr.msrb.gmra.mxu2 %vm290_vm5, %v2618_v30 }
0x3099   :  { %v2638_v37 = vpop.f32.mrf.mxu2 }
0x309a   :  { %v2641_v45 = vadd.f32 %v2638_v37, %v2215_v31 }
0x309c   :  { %3252 = vtanh.f32 %v2641_v45  ;;  %v2642_v52 = vsub.f32 0.0, %v2641_v45 }
0x309e   :  { %v2643_v54 = vmul.f32 1.442695, %v2642_v52 }
0x30a0   :  { %3254 = vpow2.f32 %v2643_v54 }
0x30a2   :  { %v3253_v51 = vpop.eup %3252 }
0x30a3   :  { %2664 = vrot.lane.b32.xlu2 %v3253_v51, %s3472_s30 }
0x30a6   :  { %v3255_v10 = vpop.eup %3254 }
0x30a7   :  { %v2645_v32 = vadd.f32 1.0, %v3255_v10 }
0x30a9   :  { %3256 = vrcp.f32 %v2645_v32  ;;  %v2657_v62 = vand.u32 2147483648, %v2645_v32  ;;  %vm2651_vm1 = vweird.f32 %v2645_v32  ;;  %v2655_v61 = vand.u32 2147483647, %v2645_v32 }
0x30aa   :  { %3258 = vtanh.f32 %v4004_v15 }
0x30ab   :  { %v2658_v0 = vor.u32 1.1754944e-38, %v2657_v62  ;;  %vm2656_vm3 = vcmp.eq.f32.partialorder %v2655_v61, 8.507059e+37  ;;  %v239_v62 = vld [vmem:[%s4375_s17 + $0x8] sm:$0xff]  ;;  %v238_v61 = vld [vmem:[%s4375_s17] sm:$0xff] }
0x30af   :  { %v3257_v55 = vpop.eup %3256 }
0x30b0   :  { %v2647_v57 = vmul.f32 %v3257_v55, %v2645_v32  ;;  %vm2652_vm15 = vweird.f32 %v3257_v55  ;;  %v3259_v44 = vpop.eup %3258  ;;  %v227_v32 = vld [vmem:[%s4371_s13 + $0x38] sm:$0xff] }
0x30b1   :  { %vm2653_vm2 = vmor %vm2651_vm1, %vm2652_vm15  ;;  %2759 = vmatpush.msra.mxu0 %v227_v32 }
0x30b2   :  { %v2648_v43 = vsub.f32 1.0, %v2647_v57  ;;  %v225_v57 = vld [vmem:[%s4371_s13 + $0x28] sm:$0xff] }
0x30b4   :  { %v2649_v1 = vmul.f32 %v3257_v55, %v2648_v43  ;;  %v224_v43 = vld [vmem:[%s4371_s13 + $0x20] sm:$0xff] }
0x30b6   :  { %v2650_v2 = vadd.f32 %v3257_v55, %v2649_v1  ;;  %v241_v1 = vld [vmem:[%s4375_s17 + $0x18] sm:$0xff] }
0x30b8   :  { %v2654_v13 = vsel %vm2653_vm2, %v3257_v55, %v2650_v2  ;;  %v226_v55 = vld [vmem:[%s4371_s13 + $0x30] sm:$0xff] }
0x30b9   :  { %v2659_v59 = vsel %vm2656_vm3, %v2658_v0, %v2654_v13  ;;  %2760 = vmatpush.msra.mxu0 %v226_v55  ;;  %v240_v2 = vld [vmem:[%s4375_s17 + $0x10] sm:$0xff]  ;;  %vm2934_vm3 = vcmask 1024  }
0x30ba   :  { %v2662_v38 = vmul.f32 %v2659_v59, %v2609_v26 }
0x30bb   :  { %2761 = vmatpush.msra.mxu0 %v225_v57 }
0x30bd   :  { %2762 = vmatpush.msra.mxu0 %v224_v43 }
0x30bf   :  { %2861 = vmatpush.msrb.mxu0 %v241_v1 }
0x30c1   :  { %2862 = vmatpush.msrb.mxu0 %v240_v2 }
0x30c3   :  { %2863 = vmatpush.msrb.mxu0 %v239_v62 }
0x30c5   :  { %2864 = vmatpush.msrb.mxu0 %v238_v61  ;;  %v3017_v61 = vld [vmem:[#allocation2] ss:$0 sm:$0xff] }
0x30fd   :  { %v2665_v46 = vpop.permute.xlu2 %2664 }
0x30fe   :  { %v2667_v3 = vmul.f32 %v2665_v46, %v2659_v59 }
0x3100   :  { %2669 = vrot.lane.b32.xlu0 %v2667_v3, %s3473_s7 }
0x3108   :  { %1490 = vrot.lane.b32.xlu0 %v3259_v44, %s3472_s30 }
0x3172   :  { %v2670_v40 = vpop.permute.xlu0 %2669 }
0x3173   :  { %v4241_v8 = vadd.f32 %v2670_v40, %v2662_v38  ;;  %v236_v40 = vld [vmem:[%s4373_s15 + $0x38] sm:$0xff] }
0x3174   :  { %2812 = vmatpush.msra.mxu2 %v236_v40 }
0x3175   :  { %3260 = vtanh.f32 %v4241_v8 }
0x3176   :  { %3262 = vpow2.f32 %v1469_v60  ;;  %v231_v60 = vld [vmem:[%s4373_s15 + $0x10] sm:$0xff] }
0x317a   :  { %v1491_v49 = vpop.permute.xlu0 %1490 }
0x317b   :  { %v3261_v50 = vpop.eup %3260 }
0x317c   :  { %2675 = vrot.lane.b32.xlu1 %v3261_v50, %s3472_s30  ;;  %v3263_v63 = vpop.eup %3262  ;;  %v234_v50 = vld [vmem:[%s4373_s15 + $0x28] sm:$0xff] }
0x317d   :  { %v1471_v42 = vadd.f32 1.0, %v3263_v63  ;;  %v230_v63 = vld [vmem:[%s4373_s15 + $0x8] sm:$0xff] }
0x317f   :  { %3264 = vrcp.f32 %v1471_v42  ;;  %v1483_v4 = vand.u32 2147483648, %v1471_v42  ;;  %vm1477_vm6 = vweird.f32 %v1471_v42  ;;  %v1481_v7 = vand.u32 2147483647, %v1471_v42 }
0x3181   :  { %v1484_v48 = vor.u32 1.1754944e-38, %v1483_v4  ;;  %vm1482_vm8 = vcmp.eq.f32.partialorder %v1481_v7, 8.507059e+37 }
0x3185   :  { %v3265_v56 = vpop.eup %3264 }
0x3186   :  { %v1473_v16 = vmul.f32 %v3265_v56, %v1471_v42  ;;  %vm1478_vm4 = vweird.f32 %v3265_v56  ;;  %v229_v42 = vld [vmem:[%s4373_s15] sm:$0xff] }
0x3187   :  { %vm1479_vm7 = vmor %vm1477_vm6, %vm1478_vm4 }
0x3188   :  { %v1474_v17 = vsub.f32 1.0, %v1473_v16  ;;  %v244_v16 = vld [vmem:[%s4375_s17 + $0x30] sm:$0xff] }
0x318a   :  { %v1475_v18 = vmul.f32 %v3265_v56, %v1474_v17  ;;  %v243_v17 = vld [vmem:[%s4375_s17 + $0x28] sm:$0xff] }
0x318c   :  { %v1476_v47 = vadd.f32 %v3265_v56, %v1475_v18  ;;  %v242_v18 = vld [vmem:[%s4375_s17 + $0x20] sm:$0xff] }
0x318e   :  { %v1480_v15 = vsel %vm1479_vm7, %v3265_v56, %v1476_v47  ;;  %v245_v56 = vld [vmem:[%s4375_s17 + $0x38] sm:$0xff]  ;;  %v2784_v47 = vpop.f32.mrf.mxu1 }
0x318f   :  { %v1485_v5 = vsel %vm1482_vm8, %v1484_v48, %v1480_v15  ;;  %2841 = vmatpush.msra.mxu3 %v245_v56 }
0x3190   :  { %v1493_v20 = vmul.f32 %v1491_v49, %v1485_v5  ;;  %v1488_v58 = vmul.f32 %v1485_v5, %v3983_v34 }
0x3191   :  { %2842 = vmatpush.msra.mxu3 %v244_v16 }
0x3193   :  { %2843 = vmatpush.msra.mxu3 %v243_v17 }
0x3195   :  { %2844 = vmatpush.msra.mxu3 %v242_v18 }
0x31ee   :  { %v2676_v19 = vpop.permute.xlu1 %2675 }
0x31ef   :  { %v2678_v33 = vmul.f32 %v2676_v19, %v2659_v59  ;;  %v3016_v19 = vld [vmem:[%s4372_s14] ss:$0 sm:$0xff] }
0x31f1   :  { %2680 = vrot.lane.b32.xlu2 %v2678_v33, %s3473_s7 }
0x31f9   :  { %1495 = vrot.lane.b32.xlu2 %v1493_v20, %s3473_s7 }
0x324b   :  { %v2681_v9 = vpop.permute.xlu2 %2680 }
0x324c   :  { %2991 = vmatmul.msk.f32.vlgmr.msrb.gmra.mxu3 %vm290_vm5, %v2681_v9 }
0x3253   :  { %v1496_v35 = vpop.permute.xlu2 %1495 }
0x3254   :  { %v1498_v22 = vadd.f32 %v1496_v35, %v1488_v58  ;;  %v251_v35 = vld [vmem:[%s4377_s19 + $0x20] sm:$0xff]  ;;  %v250_v58 = vld [vmem:[%s4377_s19 + $0x18] sm:$0xff] }
0x32cf   :  { %v2701_v6 = vpop.f32.mrf.mxu3 }
0x32d0   :  { %v2704_v39 = vadd.f32 %v2701_v6, %v2241_v21  ;;  %v254_v21 = vld [vmem:[%s4377_s19 + $0x38] sm:$0xff]  ;;  %v253_v6 = vld [vmem:[%s4377_s19 + $0x30] sm:$0xff] }
0x32d1   :  { %2893 = vmatpush.msrb.mxu1 %v254_v21 }
0x32d2   :  { %3266 = vtanh.f32 %v2704_v39  ;;  %v2705_v11 = vsub.f32 0.0, %v2704_v39  ;;  %v252_v39 = vld [vmem:[%s4377_s19 + $0x28] sm:$0xff] }
0x32d3   :  { %3268 = vtanh.f32 %v1498_v22  ;;  %2894 = vmatpush.msrb.mxu1 %v253_v6  ;;  %v249_v22 = vld [vmem:[%s4377_s19 + $0x10] sm:$0xff] }
0x32d4   :  { %v2706_v24 = vmul.f32 1.442695, %v2705_v11  ;;  %v3018_v11 = vld [vmem:[%s4376_s18] ss:$0 sm:$0xff] }
0x32d5   :  { %2895 = vmatpush.msrb.mxu1 %v252_v39 }
0x32d6   :  { %3270 = vpow2.f32 %v2706_v24 }
0x32d7   :  { %2896 = vmatpush.msrb.mxu1 %v251_v35 }
0x32d8   :  { %v3267_v23 = vpop.eup %3266 }
0x32d9   :  { %2727 = vrot.lane.b32.xlu1 %v3267_v23, %s3472_s30  ;;  %v3269_v41 = vpop.eup %3268  ;;  %2897 = vmatpush.msrb.mxu1 %v250_v58  ;;  %v248_v23 = vld [vmem:[%s4377_s19 + $0x8] sm:$0xff] }
0x32db   :  { %2898 = vmatpush.msrb.mxu1 %v249_v22 }
0x32dc   :  { %v3271_v25 = vpop.eup %3270 }
0x32dd   :  { %v2708_v26 = vadd.f32 1.0, %v3271_v25  ;;  %2899 = vmatpush.msrb.mxu1 %v248_v23 }
0x32df   :  { %3272 = vrcp.f32 %v2708_v26  ;;  %v2720_v34 = vand.u32 2147483648, %v2708_v26  ;;  %vm2714_vm10 = vweird.f32 %v2708_v26  ;;  %v2718_v30 = vand.u32 2147483647, %v2708_v26 }
0x32e1   :  { %1501 = vrot.lane.b32.xlu1 %v3269_v41, %s3472_s30  ;;  %v2721_v37 = vor.u32 1.1754944e-38, %v2720_v34  ;;  %vm2719_vm0 = vcmp.eq.f32.partialorder %v2718_v30, 8.507059e+37  ;;  %v247_v41 = vld [vmem:[%s4377_s19] sm:$0xff] }
0x32e2   :  { %2900 = vmatpush.msrb.mxu1 %v247_v41  ;;  %v256_v30 = vld [vmem:[#allocation4] sm:$0x1] }
0x32e5   :  { %v3273_v36 = vpop.eup %3272 }
0x32e6   :  { %v2710_v14 = vmul.f32 %v3273_v36, %v2708_v26  ;;  %vm2715_vm9 = vweird.f32 %v3273_v36 }
0x32e7   :  { %vm2716_vm11 = vmor %vm2714_vm10, %vm2715_vm9 }
0x32e8   :  { %v2711_v27 = vsub.f32 1.0, %v2710_v14 }
0x32ea   :  { %v2712_v28 = vmul.f32 %v3273_v36, %v2711_v27 }
0x32ec   :  { %v2713_v29 = vadd.f32 %v3273_v36, %v2712_v28 }
0x32ee   :  { %v2717_v31 = vsel %vm2716_vm11, %v3273_v36, %v2713_v29 }
0x32ef   :  { %v2722_v51 = vsel %vm2719_vm0, %v2721_v37, %v2717_v31  ;;  %v2905_v31 = vsub.f32 0.0, %v256_v30 }
0x32f0   :  { %v2725_v13 = vmul.f32 %v2722_v51, %v4241_v8  ;;  %v235_v8 = vld [vmem:[%s4373_s15 + $0x30] sm:$0xff] }
0x32f1   :  { %2813 = vmatpush.msra.mxu2 %v235_v8  ;;  %v2906_v37 = vmul.f32 1.442695, %v2905_v31 }
0x32f3   :  { %2814 = vmatpush.msra.mxu2 %v234_v50 }
0x334b   :  { %v2728_v45 = vpop.permute.xlu1 %2727 }
0x334c   :  { %v2730_v52 = vmul.f32 %v2728_v45, %v2722_v51 }
0x334e   :  { %2732 = vrot.lane.b32.xlu0 %v2730_v52, %s3473_s7 }
0x3353   :  { %v1502_v54 = vpop.permute.xlu1 %1501 }
0x3354   :  { %v1504_v10 = vmul.f32 %v1502_v54, %v1485_v5 }
0x3356   :  { %2743 = vrot.lane.b32.xlu0 %v1504_v10, %s3473_s7 }
0x33c0   :  { %v2733_v0 = vpop.permute.xlu0 %2732 }
0x33c1   :  { %v2735_v46 = vadd.f32 %v2733_v0, %v2725_v13 }
0x33c3   :  { %3274 = vtanh.f32 %v2735_v46  ;;  %v3019_v46 = vld [vmem:[#allocation3] ss:$0 sm:$0xff] }
0x33c8   :  { %v2744_v59 = vpop.permute.xlu0 %2743 }
0x33c9   :  { %v3275_v3 = vpop.eup %3274  ;;  %2992 = vmatmul.msk.f32.vlgmr.msra.gmra.mxu0 %vm290_vm5, %v2744_v59 }
0x33ca   :  { %2738 = vrot.lane.b32.xlu2 %v3275_v3, %s3472_s30 }
0x33d1   :  { %2997 = vmatmul.msk.f32.vlgmr.msrb.gmra.mxu0 %vm290_vm5, %v4190_v12  ;;  %v233_v12 = vld [vmem:[%s4373_s15 + $0x20] sm:$0xff] }
0x33d2   :  { %2815 = vmatpush.msra.mxu2 %v233_v12 }
0x33d4   :  { %2816 = vmatpush.msra.mxu2 %v232_v53 }
0x33d6   :  { %2817 = vmatpush.msra.mxu2 %v231_v60 }
0x33d8   :  { %2818 = vmatpush.msra.mxu2 %v230_v63 }
0x33da   :  { %2819 = vmatpush.msra.mxu2 %v229_v42 }
0x3424   :  { %v2739_v44 = vpop.permute.xlu2 %2738 }
0x3425   :  { %v2741_v38 = vmul.f32 %v2739_v44, %v2722_v51 }
0x3427   :  { %2825 = vrot.lane.b32.xlu1 %v2741_v38, %s3473_s7 }
0x3446   :  { %v2764_v33 = vpop.f32.mrf.mxu0 }
0x3447   :  { %v2785_v4 = vadd.f32 %v2784_v47, %v2764_v33 }
0x3449   :  { %v2790_v7 = vadd.f32 %v3016_v19, %v2785_v4 }
0x344b   :  { %v2792_v15 = vmin.f32 %v2790_v7, 0.0  ;;  %vm2791_vm13 = vcmp.gt.f32.partialorder %v2790_v7, 0.0 }
0x344d   :  { %v2793_v49 = vmul.f32 1.442695, %v2792_v15 }
0x344e   :  { %v2866_v24 = vpop.f32.mrf.mxu0 }
0x344f   :  { %3276 = vpow2.f32 %v2793_v49 }
0x3455   :  { %v3277_v48 = vpop.eup %3276 }
0x3456   :  { %v2994_v5 = vadd.f32 -1.0, %v3277_v48 }
0x3458   :  { %v2796_v20 = vsel %vm2791_vm13, %v2790_v7, %v2994_v5 }
0x3459   :  { %2995 = vmatmul.msk.f32.vlgmr.msra.gmra.mxu2 %vm2800_vm12, %v2796_v20 }
0x3499   :  { %v2826_v9 = vpop.permute.xlu1 %2825 }
0x349a   :  { %2996 = vmatmul.msk.f32.vlgmr.msra.gmra.mxu3 %vm290_vm5, %v2826_v9 }
0x34dc   :  { %v2821_v0 = vpop.f32.mrf.mxu2 }
0x34dd   :  { %v2822_v59 = vadd.f32 %v3017_v61, %v2821_v0 }
0x351d   :  { %v2846_v25 = vpop.f32.mrf.mxu3 }
0x351e   :  { %v2867_v26 = vadd.f32 %v2866_v24, %v2846_v25 }
0x3520   :  { %v2872_v36 = vadd.f32 %v3018_v11, %v2867_v26 }
0x3522   :  { %v2874_v14 = vmin.f32 %v2872_v36, 0.0  ;;  %vm2873_vm5 = vcmp.gt.f32.partialorder %v2872_v36, 0.0 }
0x3524   :  { %v2875_v27 = vmul.f32 1.442695, %v2874_v14 }
0x3526   :  { %3278 = vpow2.f32 %v2875_v27 }
0x3527   :  { %3280 = vpow2.f32 %v2906_v37 }
0x352c   :  { %v3279_v28 = vpop.eup %3278 }
0x352d   :  { %v2998_v29 = vadd.f32 -1.0, %v3279_v28  ;;  %v3281_v45 = vpop.eup %3280 }
0x352e   :  { %v2908_v51 = vadd.f32 1.0, %v3281_v45 }
0x352f   :  { %v2878_v34 = vsel %vm2873_vm5, %v2872_v36, %v2998_v29 }
0x3530   :  { %2999 = vmatmul.msk.f32.vlgmr.msrb.gmra.mxu1 %vm2800_vm12, %v2878_v34  ;;  %3282 = vrcp.f32 %v2908_v51  ;;  %vm2914_vm14 = vweird.f32 %v2908_v51  ;;  %v2920_v55 = vand.u32 2147483648, %v2908_v51  ;;  %v2918_v43 = vand.u32 2147483647, %v2908_v51 }
0x3532   :  { %v2921_v1 = vor.u32 1.1754944e-38, %v2920_v55  ;;  %vm2919_vm2 = vcmp.eq.f32.partialorder %v2918_v43, 8.507059e+37 }
0x3536   :  { %v3283_v52 = vpop.eup %3282 }
0x3537   :  { %v2910_v54 = vmul.f32 %v3283_v52, %v2908_v51  ;;  %vm2915_vm15 = vweird.f32 %v3283_v52 }
0x3538   :  { %vm2916_vm1 = vmor %vm2914_vm14, %vm2915_vm15 }
0x3539   :  { %v2911_v10 = vsub.f32 1.0, %v2910_v54 }
0x353b   :  { %v2912_v32 = vmul.f32 %v3283_v52, %v2911_v10 }
0x353d   :  { %v2913_v57 = vadd.f32 %v3283_v52, %v2912_v32 }
0x353f   :  { %v2917_v2 = vsel %vm2916_vm1, %v3283_v52, %v2913_v57 }
0x3540   :  { %v2922_v62 = vsel %vm2919_vm2, %v2921_v1, %v2917_v2 }
0x3541   :  { %v2928_v13 = vsub.f32 1.0, %v2922_v62  ;;  %v2925_v3 = vperm.slane %v2922_v62, 0 }
0x3543   :  { %v2930_v44 = vperm.slane %v2928_v13, 0  ;;  %v2927_v8 = vmul.f32 %v2925_v3, %v2822_v59 }
0x35ad   :  { %v2902_v38 = vpop.f32.mrf.mxu1 }
0x35ae   :  { %v2903_v40 = vadd.f32 %v3019_v46, %v2902_v38 }
0x35b0   :  { %v2932_v50 = vmul.f32 %v2930_v44, %v2903_v40 }
0x35b2   :  { %v2933_v12 = vadd.f32 %v2932_v50, %v2927_v8 }
0x35b4   :  { %2935 = vst.msk [vmem:[%s4378_s22] sm:$0x3] %vm2934_vm3, %v2933_v12 }
0x35b5   :  { %2940 = vsyncpa [#allocation6], 1 }
0x35b6   :  { %2941 = vsyncpa [#allocation8], 1 }
0x35b7   :  { %2942 = vsyncpa [#allocation11], 1 }
0x35b8   :  { %2943 = vsyncpa [#allocation14], 1 }

</bundles_post_ra>
